<compile_context>
chip_gen: v6e
topology: v6e:2x2x1
jax: 0.10.0
libtpu: 0.0.40
codegen_flags: <defaults>
</compile_context>

<pallas_src>
import jax
import jax.numpy as jnp
from jax import lax
from jax.experimental import pallas as pl
from jax.experimental.pallas import tpu as pltpu

SPACE = ("none", "skip_connect", "nor_conv_1x1", "nor_conv_3x3", "avg_pool_3x3")


def _mixedop_kernel(xpad_ref, wbd_ref, bias_ref, skip_ref, invcnt_ref, out_ref):
    # xpad_ref  : (TB, H+2, (W+2)*C)  zero-padded input, flat lane-dense layout
    # wbd_ref   : (9*W*C, W*C)        fused block-structured conv weights (resident)
    # bias_ref  : (1, W*C)            fused conv bias (BN shift, mix weights folded)
    # skip_ref  : (1, W*C)            w_skip broadcast plane
    # invcnt_ref: (H, W*C)            w_pool / pool-count plane
    # out_ref   : (TB, H, W*C)
    TB = xpad_ref.shape[0]
    _, H, WC = out_ref.shape
    C = (xpad_ref.shape[2] - WC) // 2

    xp = xpad_ref[...]                                   # (TB, H+2, (W+2)*C)

    psum = jnp.zeros((TB, H, WC), jnp.float32)
    groups = []
    center = None
    for kh in range(3):
        for kw in range(3):
            p = xp[:, kh:kh + H, kw * C:kw * C + WC]     # (TB, H, W*C), sliced once
            psum = psum + p                              # avg-pool numerator (raw x)
            groups.append(jnp.maximum(p, 0.0))           # ReLU input for the convs
            if kh == 1 and kw == 1:
                center = p                               # raw x, for skip_connect

    # (TB, H, 9*W*C): concat at 256-lane-aligned offsets, then one MXU matmul.
    patches2d = jnp.concatenate(groups, axis=-1).reshape(TB * H, 9 * WC)
    y = jnp.dot(patches2d, wbd_ref[...],
                preferred_element_type=jnp.float32).reshape(TB, H, WC)

    # conv(3x3 + 1x1, BN + mix folded) + skip_connect + avg-pool, all lane-dense.
    out_ref[...] = (y + bias_ref[...]
                    + center * skip_ref[...]
                    + psum * invcnt_ref[...])


@jax.jit
def mixed_op_forward(x_nchw, mix_weights, params):
    x = jnp.transpose(x_nchw, (0, 2, 3, 1)).astype(jnp.float32)   # NCHW -> NHWC
    B, H, W, C = x.shape
    WC = W * C

    # Flat lane-dense layout + spatial halo (zero pad of 1 pixel == C lanes).
    x_flat = x.reshape(B, H, WC)
    xpad = jnp.pad(x_flat, ((0, 0), (1, 1), (C, C)))              # (B, H+2, (W+2)*C)

    eps = 1e-5
    mw = mix_weights.astype(jnp.float32)
    w_skip, w_c1, w_c3, w_pool = mw[1], mw[2], mw[3], mw[4]       # mw[0] = 'none' (zero)

    s1 = params["bn1_gamma"] / jnp.sqrt(params["bn1_var"] + eps)
    s3 = params["bn3_gamma"] / jnp.sqrt(params["bn3_var"] + eps)
    b1 = params["bn1_beta"] - params["bn1_mean"] * s1
    b3 = params["bn3_beta"] - params["bn3_mean"] * s3

    # Fold BN scale + mixing weights into the conv taps; fold the 1x1 conv into
    # the 3x3 center tap (tap index 4).
    w1 = params["w1_hwio"][0, 0]                                  # (Cin, Cout)
    w3 = params["w3_hwio"].reshape(9, C, C)                       # tap = kh*3+kw
    w_comb = (w_c3 * s3)[None, None, :] * w3                      # (9, C, C)
    w_comb = w_comb.at[4].add((w_c1 * s1)[None, :] * w1)

    # Block-diagonal expansion so the matmul output comes out directly in the
    # flat (row=h, lanes=W*C) layout: (9*W*C, W*C).
    eye_w = jnp.eye(W, dtype=jnp.float32)
    w_bd = jnp.einsum("wv,tio->twivo", eye_w, w_comb).reshape(9 * WC, WC)

    # Fused conv bias (BN shift, mix weights folded), tiled to lane layout.
    b_comb = w_c3 * b3 + w_c1 * b1                                # (C,)
    bias_flat = jnp.tile(b_comb, (W,))[None, :]                   # (1, WC)

    # skip_connect scale plane (stride=1 -> Identity).
    skip_flat = jnp.full((1, WC), w_skip, dtype=jnp.float32)      # (1, WC)

    # avg_pool_3x3, stride 1, pad 1, count_include_pad=False -> precomputed
    # reciprocal-count plane, already multiplied by w_pool.
    hh = jnp.arange(H)
    ww = jnp.arange(W)
    cnt_h = 3.0 - (hh == 0).astype(jnp.float32) - (hh == H - 1).astype(jnp.float32)
    cnt_w = 3.0 - (ww == 0).astype(jnp.float32) - (ww == W - 1).astype(jnp.float32)
    cnt = cnt_h[:, None] * cnt_w[None, :]                         # (H, W)
    invcnt_flat = jnp.broadcast_to((w_pool / cnt)[:, :, None],
                                   (H, W, C)).reshape(H, WC)      # (H, WC)

    # Batch tile: biggest of {8,4,2,1} dividing B (amortizes per-step overhead,
    # keeps per-step VMEM small; grid axis is parallel for multi-TC chips).
    tb = max(t for t in (8, 4, 2, 1) if B % t == 0)
    grid = (B // tb,)

    out_flat = pl.pallas_call(
        _mixedop_kernel,
        out_shape=jax.ShapeDtypeStruct((B, H, WC), jnp.float32),
        grid=grid,
        in_specs=[
            pl.BlockSpec((tb, H + 2, WC + 2 * C), lambda b: (b, 0, 0)),
            pl.BlockSpec((9 * WC, WC), lambda b: (0, 0)),         # resident
            pl.BlockSpec((1, WC), lambda b: (0, 0)),              # resident
            pl.BlockSpec((1, WC), lambda b: (0, 0)),              # resident
            pl.BlockSpec((H, WC), lambda b: (0, 0)),              # resident
        ],
        out_specs=pl.BlockSpec((tb, H, WC), lambda b: (b, 0, 0)),
        compiler_params=pltpu.CompilerParams(
            dimension_semantics=("parallel",)),
    )(xpad, w_bd, bias_flat, skip_flat, invcnt_flat)

    out = out_flat.reshape(B, H, W, C)
    return jnp.transpose(out, (0, 3, 1, 2))                       # NHWC -> NCHW


def ref_forward(x_nchw, mix_weights, params):
    """Pure-JAX reference (lax.conv / reduce_window), f32-accurate convs."""
    x = jnp.transpose(x_nchw, (0, 2, 3, 1)).astype(jnp.float32)
    eps = 1e-5
    relu = jnp.maximum(x, 0.0)
    dn = ("NHWC", "HWIO", "NHWC")
    hp = lax.Precision.HIGHEST
    y1 = lax.conv_general_dilated(relu, params["w1_hwio"], (1, 1), "SAME",
                                  dimension_numbers=dn, precision=hp)
    s1 = params["bn1_gamma"] / jnp.sqrt(params["bn1_var"] + eps)
    y1 = y1 * s1 + (params["bn1_beta"] - params["bn1_mean"] * s1)
    y3 = lax.conv_general_dilated(relu, params["w3_hwio"], (1, 1), "SAME",
                                  dimension_numbers=dn, precision=hp)
    s3 = params["bn3_gamma"] / jnp.sqrt(params["bn3_var"] + eps)
    y3 = y3 * s3 + (params["bn3_beta"] - params["bn3_mean"] * s3)
    psum = lax.reduce_window(x, 0.0, lax.add, (1, 3, 3, 1), (1, 1, 1, 1), "SAME")
    cnt = lax.reduce_window(jnp.ones_like(x), 0.0, lax.add,
                            (1, 3, 3, 1), (1, 1, 1, 1), "SAME")
    ypool = psum / cnt
    out = (mix_weights[1] * x + mix_weights[2] * y1
           + mix_weights[3] * y3 + mix_weights[4] * ypool)
    return jnp.transpose(out, (0, 3, 1, 2))


if __name__ == "__main__":
    key = jax.random.PRNGKey(0)
    ks = jax.random.split(key, 12)
    B, C, H, W = 2, 16, 16, 16

    x = jax.random.normal(ks[0], (B, C, H, W), jnp.float32)
    mix_weights = jax.nn.softmax(jax.random.normal(ks[1], (len(SPACE),), jnp.float32))

    params = {
        "w1_hwio": jax.random.normal(ks[2], (1, 1, C, C), jnp.float32) / jnp.sqrt(1.0 * C),
        "w3_hwio": jax.random.normal(ks[3], (3, 3, C, C), jnp.float32) / jnp.sqrt(9.0 * C),
        "bn1_gamma": 1.0 + 0.1 * jax.random.normal(ks[4], (C,), jnp.float32),
        "bn1_beta": 0.1 * jax.random.normal(ks[5], (C,), jnp.float32),
        "bn1_mean": 0.1 * jax.random.normal(ks[6], (C,), jnp.float32),
        "bn1_var": jnp.abs(1.0 + 0.1 * jax.random.normal(ks[7], (C,), jnp.float32)),
        "bn3_gamma": 1.0 + 0.1 * jax.random.normal(ks[8], (C,), jnp.float32),
        "bn3_beta": 0.1 * jax.random.normal(ks[9], (C,), jnp.float32),
        "bn3_mean": 0.1 * jax.random.normal(ks[10], (C,), jnp.float32),
        "bn3_var": jnp.abs(1.0 + 0.1 * jax.random.normal(ks[11], (C,), jnp.float32)),
    }

    out = jax.block_until_ready(mixed_op_forward(x, mix_weights, params))
    ref = ref_forward(x, mix_weights, params)

    assert out.shape == (B, C, H, W)
    max_err = float(jnp.max(jnp.abs(out - ref)))
    # Tolerance leaves headroom for MXU pass-precision differences vs the
    # HIGHEST-precision XLA reference; real logic bugs produce O(0.1+) errors.
    assert jnp.allclose(out, ref, atol=5e-3, rtol=5e-3), f"max_err={max_err}"
    print("KERNEL_OK")
</pallas_src>

<mosaic_0001>
module attributes {stable_mosaic.version = 11 : i64} {
  func.func @_mixedop_kernel(%arg0: i32, %arg1: memref<2x18x288xf32, #tpu.memory_space<vmem>>, %arg2: memref<2304x256xf32, #tpu.memory_space<vmem>>, %arg3: memref<1x256xf32, #tpu.memory_space<vmem>>, %arg4: memref<1x256xf32, #tpu.memory_space<vmem>>, %arg5: memref<16x256xf32, #tpu.memory_space<vmem>>, %arg6: memref<2x16x256xf32, #tpu.memory_space<vmem>>) attributes {dimension_semantics = [#tpu.dimension_semantics<parallel>], iteration_bounds = array<i64: 1>, scalar_prefetch = 0 : i64, scratch_operands = 0 : i64, tpu.core_type = #tpu.core_type<tc>, window_params = [{transform_indices = @transform_0, window_bounds = array<i64: 2, 18, 288>}, {pipeline_mode = #tpu.pipeline_mode<synchronous>, transform_indices = @transform_1, window_bounds = array<i64: 2304, 256>}, {pipeline_mode = #tpu.pipeline_mode<synchronous>, transform_indices = @transform_2, window_bounds = array<i64: 1, 256>}, {pipeline_mode = #tpu.pipeline_mode<synchronous>, transform_indices = @transform_3, window_bounds = array<i64: 1, 256>}, {pipeline_mode = #tpu.pipeline_mode<synchronous>, transform_indices = @transform_4, window_bounds = array<i64: 16, 256>}, {transform_indices = @transform_5, window_bounds = array<i64: 2, 16, 256>}]} {
    %c0 = arith.constant 0 : index
    %c0_0 = arith.constant 0 : index
    %c0_1 = arith.constant 0 : index
    %0 = vector.load %arg1[%c0, %c0_0, %c0_1] : memref<2x18x288xf32, #tpu.memory_space<vmem>>, vector<2x18x288xf32>
    %cst = arith.constant 0.000000e+00 : f32
    %1 = vector.broadcast %cst : f32 to vector<2x16x256xf32>
    %2 = vector.extract_strided_slice %0 {offsets = [0, 0, 0], sizes = [2, 16, 256], strides = [1, 1, 1]} : vector<2x18x288xf32> to vector<2x16x256xf32>
    %3 = arith.addf %1, %2 : vector<2x16x256xf32>
    %cst_2 = arith.constant 0.000000e+00 : f32
    %4 = vector.broadcast %cst_2 : f32 to vector<2x16x256xf32>
    %5 = arith.maximumf %2, %4 : vector<2x16x256xf32>
    %6 = vector.extract_strided_slice %0 {offsets = [0, 0, 16], sizes = [2, 16, 256], strides = [1, 1, 1]} : vector<2x18x288xf32> to vector<2x16x256xf32>
    %7 = arith.addf %3, %6 : vector<2x16x256xf32>
    %cst_3 = arith.constant 0.000000e+00 : f32
    %8 = vector.broadcast %cst_3 : f32 to vector<2x16x256xf32>
    %9 = arith.maximumf %6, %8 : vector<2x16x256xf32>
    %10 = vector.extract_strided_slice %0 {offsets = [0, 0, 32], sizes = [2, 16, 256], strides = [1, 1, 1]} : vector<2x18x288xf32> to vector<2x16x256xf32>
    %11 = arith.addf %7, %10 : vector<2x16x256xf32>
    %cst_4 = arith.constant 0.000000e+00 : f32
    %12 = vector.broadcast %cst_4 : f32 to vector<2x16x256xf32>
    %13 = arith.maximumf %10, %12 : vector<2x16x256xf32>
    %14 = vector.extract_strided_slice %0 {offsets = [0, 1, 0], sizes = [2, 16, 256], strides = [1, 1, 1]} : vector<2x18x288xf32> to vector<2x16x256xf32>
    %15 = arith.addf %11, %14 : vector<2x16x256xf32>
    %cst_5 = arith.constant 0.000000e+00 : f32
    %16 = vector.broadcast %cst_5 : f32 to vector<2x16x256xf32>
    %17 = arith.maximumf %14, %16 : vector<2x16x256xf32>
    %18 = vector.extract_strided_slice %0 {offsets = [0, 1, 16], sizes = [2, 16, 256], strides = [1, 1, 1]} : vector<2x18x288xf32> to vector<2x16x256xf32>
    %19 = arith.addf %15, %18 : vector<2x16x256xf32>
    %cst_6 = arith.constant 0.000000e+00 : f32
    %20 = vector.broadcast %cst_6 : f32 to vector<2x16x256xf32>
    %21 = arith.maximumf %18, %20 : vector<2x16x256xf32>
    %22 = vector.extract_strided_slice %0 {offsets = [0, 1, 32], sizes = [2, 16, 256], strides = [1, 1, 1]} : vector<2x18x288xf32> to vector<2x16x256xf32>
    %23 = arith.addf %19, %22 : vector<2x16x256xf32>
    %cst_7 = arith.constant 0.000000e+00 : f32
    %24 = vector.broadcast %cst_7 : f32 to vector<2x16x256xf32>
    %25 = arith.maximumf %22, %24 : vector<2x16x256xf32>
    %26 = vector.extract_strided_slice %0 {offsets = [0, 2, 0], sizes = [2, 16, 256], strides = [1, 1, 1]} : vector<2x18x288xf32> to vector<2x16x256xf32>
    %27 = arith.addf %23, %26 : vector<2x16x256xf32>
    %cst_8 = arith.constant 0.000000e+00 : f32
    %28 = vector.broadcast %cst_8 : f32 to vector<2x16x256xf32>
    %29 = arith.maximumf %26, %28 : vector<2x16x256xf32>
    %30 = vector.extract_strided_slice %0 {offsets = [0, 2, 16], sizes = [2, 16, 256], strides = [1, 1, 1]} : vector<2x18x288xf32> to vector<2x16x256xf32>
    %31 = arith.addf %27, %30 : vector<2x16x256xf32>
    %cst_9 = arith.constant 0.000000e+00 : f32
    %32 = vector.broadcast %cst_9 : f32 to vector<2x16x256xf32>
    %33 = arith.maximumf %30, %32 : vector<2x16x256xf32>
    %34 = vector.extract_strided_slice %0 {offsets = [0, 2, 32], sizes = [2, 16, 256], strides = [1, 1, 1]} : vector<2x18x288xf32> to vector<2x16x256xf32>
    %35 = arith.addf %31, %34 : vector<2x16x256xf32>
    %cst_10 = arith.constant 0.000000e+00 : f32
    %36 = vector.broadcast %cst_10 : f32 to vector<2x16x256xf32>
    %37 = arith.maximumf %34, %36 : vector<2x16x256xf32>
    %38 = tpu.concatenate %5, %9, %13, %17, %21, %25, %29, %33, %37 in 2 : vector<2x16x256xf32>, vector<2x16x256xf32>, vector<2x16x256xf32>, vector<2x16x256xf32>, vector<2x16x256xf32>, vector<2x16x256xf32>, vector<2x16x256xf32>, vector<2x16x256xf32>, vector<2x16x256xf32> -> vector<2x16x2304xf32>
    %39 = vector.shape_cast %38 : vector<2x16x2304xf32> to vector<32x2304xf32>
    %c0_11 = arith.constant 0 : index
    %c0_12 = arith.constant 0 : index
    %40 = vector.load %arg2[%c0_11, %c0_12] : memref<2304x256xf32, #tpu.memory_space<vmem>>, vector<2304x256xf32>
    %cst_13 = arith.constant dense<0.000000e+00> : vector<32x256xf32>
    %41 = tpu.matmul %39, %40, %cst_13 {dimension_numbers = #tpu.dot_dimension_numbers<[1], [0], [0], [1], [0, 0, 1, 1], [], []>} : vector<32x2304xf32>, vector<2304x256xf32>, vector<32x256xf32> -> vector<32x256xf32>
    %42 = vector.shape_cast %41 : vector<32x256xf32> to vector<2x16x256xf32>
    %c0_14 = arith.constant 0 : index
    %c0_15 = arith.constant 0 : index
    %43 = vector.load %arg3[%c0_14, %c0_15] : memref<1x256xf32, #tpu.memory_space<vmem>>, vector<1x256xf32>
    %44 = vector.shape_cast %43 : vector<1x256xf32> to vector<1x1x256xf32>
    %45 = vector.broadcast %44 : vector<1x1x256xf32> to vector<2x16x256xf32>
    %46 = arith.addf %42, %45 : vector<2x16x256xf32>
    %c0_16 = arith.constant 0 : index
    %c0_17 = arith.constant 0 : index
    %47 = vector.load %arg4[%c0_16, %c0_17] : memref<1x256xf32, #tpu.memory_space<vmem>>, vector<1x256xf32>
    %48 = vector.shape_cast %47 : vector<1x256xf32> to vector<1x1x256xf32>
    %49 = vector.broadcast %48 : vector<1x1x256xf32> to vector<2x16x256xf32>
    %50 = arith.mulf %18, %49 : vector<2x16x256xf32>
    %51 = arith.addf %46, %50 : vector<2x16x256xf32>
    %c0_18 = arith.constant 0 : index
    %c0_19 = arith.constant 0 : index
    %52 = vector.load %arg5[%c0_18, %c0_19] : memref<16x256xf32, #tpu.memory_space<vmem>>, vector<16x256xf32>
    %53 = vector.shape_cast %52 : vector<16x256xf32> to vector<1x16x256xf32>
    %54 = vector.broadcast %53 : vector<1x16x256xf32> to vector<2x16x256xf32>
    %55 = arith.mulf %35, %54 : vector<2x16x256xf32>
    %56 = arith.addf %51, %55 : vector<2x16x256xf32>
    %c0_20 = arith.constant 0 : index
    %c0_21 = arith.constant 0 : index
    %c0_22 = arith.constant 0 : index
    %57 = vector.load %arg6[%c0_20, %c0_21, %c0_22] : memref<2x16x256xf32, #tpu.memory_space<vmem>>, vector<2x16x256xf32>
    tpu.vector_store %arg6[%c0_20, %c0_21, %c0_22], %56 {strides = array<i32>} : memref<2x16x256xf32, #tpu.memory_space<vmem>>, vector<2x16x256xf32>,
    return
  }
  func.func @transform_0(%arg0: i32) -> (i32, i32, i32) {
    %c0_i32 = arith.constant 0 : i32
    %c0_i32_0 = arith.constant 0 : i32
    %c0_i32_1 = arith.constant 0 : i32
    return %arg0, %c0_i32, %c0_i32_0 : i32, i32, i32
  }
  func.func @transform_1(%arg0: i32) -> (i32, i32) {
    %c0_i32 = arith.constant 0 : i32
    %c0_i32_0 = arith.constant 0 : i32
    %c0_i32_1 = arith.constant 0 : i32
    return %c0_i32, %c0_i32_0 : i32, i32
  }
  func.func @transform_2(%arg0: i32) -> (i32, i32) {
    %c0_i32 = arith.constant 0 : i32
    %c0_i32_0 = arith.constant 0 : i32
    %c0_i32_1 = arith.constant 0 : i32
    return %c0_i32, %c0_i32_0 : i32, i32
  }
  func.func @transform_3(%arg0: i32) -> (i32, i32) {
    %c0_i32 = arith.constant 0 : i32
    %c0_i32_0 = arith.constant 0 : i32
    %c0_i32_1 = arith.constant 0 : i32
    return %c0_i32, %c0_i32_0 : i32, i32
  }
  func.func @transform_4(%arg0: i32) -> (i32, i32) {
    %c0_i32 = arith.constant 0 : i32
    %c0_i32_0 = arith.constant 0 : i32
    %c0_i32_1 = arith.constant 0 : i32
    return %c0_i32, %c0_i32_0 : i32, i32
  }
  func.func @transform_5(%arg0: i32) -> (i32, i32, i32) {
    %c0_i32 = arith.constant 0 : i32
    %c0_i32_0 = arith.constant 0 : i32
    %c0_i32_1 = arith.constant 0 : i32
    return %arg0, %c0_i32, %c0_i32_0 : i32, i32, i32
  }
}

</mosaic_0001>

<bundles_post_ra>
// kernel: tile.8
= control target key start
LH: loop header
LB: loop body
LE: loop exit
PB: predicated region body
PF: predicated region fallthrough
CT: control target
= control target key end

     0   :  { %s28_s0 = inlined_call_operand.vmem [shape: f32[16], index: 0, kind: input, shape index: {}]   ;;  %s29_s1 = inlined_call_operand.vmem [shape: f32[16,16], index: 1, kind: output, shape index: {}]  }
   0x1   :  { %v4_v0 = vld [vmem:[%s28_s0] ss:$0 sm:$0xff] }
   0x2   :  { %5 = vst [vmem:[%s29_s1] sm:$0xff] %v4_v0  ;;  %8 = vst [vmem:[%s29_s1 + $0x8] sm:$0xff] %v4_v0 }

// kernel: tile.9
= control target key start
LH: loop header
LB: loop body
LE: loop exit
PB: predicated region body
PF: predicated region fallthrough
CT: control target
= control target key end

     0   :  { %s7_s6 = smov 3  ;;  %s21_s9 = smov 3  ;;  %vm4_vm0 = vcmask 130048   ;;  %vm11_vm1 = vcmask 1048448   ;;  %vm18_vm2 = vcmask 917248   ;;  %vm25_vm3 = vcmask 786048   ;;  %s131_s0 = inlined_call_operand.vmem [shape: f32[16,16], index: 0, kind: input, shape index: {}]   ;;  %s132_s1 = inlined_call_operand.vmem [shape: f32[1,256], index: 1, kind: output, shape index: {}]  }
   0x1   :  { %v69_v0 = vld [vmem:[%s131_s0 + $0x7] ss:$8 sm:%s7_s6]   ;;  %s84_s10 = smov 112   ;;  %v71_v1 = vld [vmem:[%s131_s0 + $0x5] ss:$8 sm:%s21_s9]   ;;  %s14_s13 = smov 3 }
   0x2   :  { %9 = vrot.lane.b32.xlu0 %v69_v0, %s84_s10  ;;  %s85_s14 = smov 80   ;;  %v70_v2 = vld [vmem:[%s131_s0 + $0x6] ss:$8 sm:%s14_s13]   ;;  %s28_s17 = smov 3  ;;  %vm32_vm4 = vcmask 654848   ;;  %vm39_vm5 = vcmask 523648  }
   0x3   :  { %23 = vrot.lane.b32.xlu1 %v71_v1, %s85_s14  ;;  %v72_v3 = vld [vmem:[%s131_s0 + $0x4] ss:$8 sm:%s28_s17]   ;;  %s35_s20 = smov 3  ;;  %s42_s21 = smov 3  ;;  %vm46_vm6 = vcmask 392448   ;;  %vm53_vm7 = vcmask 261248  }
   0x4   :  { %s86_s22 = smov 96   ;;  %s87_s23 = smov 64   ;;  %v73_v4 = vld [vmem:[%s131_s0 + $0x3] ss:$8 sm:%s35_s20]   ;;  %v74_v5 = vld [vmem:[%s131_s0 + $0x2] ss:$8 sm:%s42_s21]  }
   0x5   :  { %s2_s26 = smov 3  ;;  %s49_s29 = smov 3 }
   0x6   :  { %16 = vrot.lane.b32.xlu0 %v70_v2, %s86_s22  ;;  %v3_v6 = vld [vmem:[%s131_s0] ss:$8 sm:%s2_s26]   ;;  %s88_s3 = smov 48   ;;  %s89_s4 = smov 32  }
   0x7   :  { %30 = vrot.lane.b32.xlu1 %v72_v3, %s87_s23  ;;  %5 = vst.msk [vmem:[#allocation0] ss:$8 sm:$0x3] %vm4_vm0, %v3_v6   ;;  %v75_v7 = vld [vmem:[%s131_s0 + $0x1] ss:$8 sm:%s49_s29]   ;;  %s90_s0 = smov 16  }
   0xa   :  { %37 = vrot.lane.b32.xlu0 %v73_v4, %s88_s3 }
   0xb   :  { %44 = vrot.lane.b32.xlu1 %v74_v5, %s89_s4 }
   0xe   :  { %51 = vrot.lane.b32.xlu0 %v75_v7, %s90_s0 }
  0x74   :  { %v10_v8 = vpop.permute.xlu0 %9  }
  0x75   :  { %12 = vst.msk [vmem:[#allocation0] ss:$8 sm:$0x3] %vm11_vm1, %v10_v8   ;;  %v24_v9 = vpop.permute.xlu1 %23  }
  0x78   :  { %v17_v10 = vpop.permute.xlu0 %16  }
  0x79   :  { %19 = vst.msk [vmem:[#allocation0] ss:$8 sm:$0x3] %vm18_vm2, %v17_v10   ;;  %v31_v11 = vpop.permute.xlu1 %30  }
  0x7a   :  { %26 = vst.msk [vmem:[#allocation0] ss:$8 sm:$0x3] %vm25_vm3, %v24_v9  }
  0x7b   :  { %33 = vst.msk [vmem:[#allocation0] ss:$8 sm:$0x3] %vm32_vm4, %v31_v11  }
  0x7c   :  { %v38_v12 = vpop.permute.xlu0 %37  }
  0x7d   :  { %40 = vst.msk [vmem:[#allocation0] ss:$8 sm:$0x3] %vm39_vm5, %v38_v12   ;;  %v45_v13 = vpop.permute.xlu1 %44  }
  0x7e   :  { %47 = vst.msk [vmem:[#allocation0] ss:$8 sm:$0x3] %vm46_vm6, %v45_v13  }
  0x80   :  { %v52_v14 = vpop.permute.xlu0 %51  }
  0x81   :  { %54 = vst.msk [vmem:[#allocation0] ss:$8 sm:$0x3] %vm53_vm7, %v52_v14  }
  0x88   :  { %v59_v15 = vld [vmem:[#allocation0] sm:$0x1]  ;;  %v64_v16 = vld [vmem:[#allocation0 + $0x8] sm:$0x1] }
  0x89   :  { %62 = vst [vmem:[%s132_s1] sm:$0x1] %v59_v15  ;;  %76 = vst [vmem:[%s132_s1 + $0x1] sm:$0x1] %v64_v16 }

// kernel: mixed_op_forward.1
= control target key start
LH: loop header
LB: loop body
LE: loop exit
PB: predicated region body
PF: predicated region fallthrough
CT: control target
= control target key end

     0   :  { %s2630_s23 = smov 112   ;;  %vm323_vm0 = vcmask 1045504   ;;  %s2631_s7 = smov 96   ;;  %vm172_vm1 = vcmask 1046528   ;;  %vm90_vm2 = vcmask 916480   ;;  %vm143_vm3 = vcmask 785408   ;;  %s6156_s0 = inlined_call_operand.vmem [shape: f32[2,18,288], index: 0, kind: input, shape index: {}]   ;;  %s6157_s1 = inlined_call_operand.vmem [shape: f32[2304,256], index: 1, kind: input, shape index: {}]   ;;  %s6158_s3 = inlined_call_operand.vmem [shape: f32[1,256], index: 3, kind: input, shape index: {}]   ;;  %s6159_s2 = inlined_call_operand.vmem [shape: f32[1,256], index: 2, kind: input, shape index: {}]   ;;  %s6160_s4 = inlined_call_operand.vmem [shape: f32[16,256], index: 4, kind: input, shape index: {}]   ;;  %s6161_s5 = inlined_call_operand.vmem [shape: f32[2,16,256], index: 5, kind: output, shape index: {}]  }
   0x1   :  { %v21_v0 = vld [vmem:[%s6156_s0 + $0x8] sm:$0xff]  ;;  %v22_v1 = vld [vmem:[%s6156_s0 + $0x10] sm:$0xff]  ;;  %v24_v2 = vld [vmem:[%s6156_s0 + $0x20] sm:$0xff]  ;;  %s2632_s12 = smov 16   ;;  %vm2211_vm4 = vcmask 130048  }
   0x2   :  { %v2672_v3 = vmax.f32 %v21_v0, 0.0  ;;  %v2674_v4 = vmax.f32 %v22_v1, 0.0  ;;  %v25_v5 = vld [vmem:[%s6156_s0 + $0x28] sm:$0xff]  ;;  %v2679_v6 = vmax.f32 %v24_v2, 0.0  ;;  %v831_v7 = vld [vmem:[%s6157_s1 + $0xf8] sm:$0xff]  ;;  %v830_v8 = vld [vmem:[%s6157_s1 + $0xf0] sm:$0xff] }
   0x3   :  { %v2687_v9 = vmax.f32 %v25_v5, 0.0  ;;  %1376 = vmatprep.subr.mxu0 %v831_v7  ;;  %v20_v10 = vld [vmem:[%s6156_s0] sm:$0xff]  ;;  %v829_v11 = vld [vmem:[%s6157_s1 + $0xe8] sm:$0xff]  ;;  %v23_v12 = vld [vmem:[%s6156_s0 + $0x18] sm:$0xff] }
   0x4   :  { %v2700_v13 = vpack.i.bf16 %v2674_v4, %v2672_v3  ;;  %1377 = vmatpush1.msra.mxu0 %v830_v8  ;;  %v30_v14 = vld [vmem:[%s6156_s0 + $0x50] sm:$0xff]  ;;  %v2705_v15 = vmax.f32 %v23_v12, 0.0  ;;  %v828_v16 = vld [vmem:[%s6157_s1 + $0xe0] sm:$0xff]  ;;  %v827_v17 = vld [vmem:[%s6157_s1 + $0xd8] sm:$0xff]  ;;  %1440 = vmatprep.mubr.f32.mxu0 %v2672_v3  ;;  %v2731_v23 = vmax.f32 %v20_v10, 0.0  ;;  %v710_v47 = vrot.slane %v2674_v4, 2 }
   0x5   :  { %v2716_v18 = vpack.i.bf16 %v2687_v9, %v2679_v6  ;;  %1378 = vmatprep.subr.mxu0 %v829_v11  ;;  %v2718_v19 = vmax.f32 %v30_v14, 0.0  ;;  %v826_v20 = vld [vmem:[%s6157_s1 + $0xd0] sm:$0xff]  ;;  %v29_v21 = vld [vmem:[%s6156_s0 + $0x48] sm:$0xff]  ;;  %v31_v22 = vld [vmem:[%s6156_s0 + $0x58] sm:$0xff]  ;;  %v711_v45 = vrot.slane %v2687_v9, 2  ;;  %v565_v61 = vrot.slane %v2672_v3, 1 }
   0x6   :  { %2430 = vrot.lane.b32.xlu0 %v2700_v13, %s2630_s23  ;;  %1379 = vmatpush1.msra.mxu0 %v828_v16  ;;  %v2733_v24 = vmax.f32 %v29_v21, 0.0  ;;  %v2735_v25 = vmax.f32 %v31_v22, 0.0  ;;  %v825_v26 = vld [vmem:[%s6157_s1 + $0xc8] sm:$0xff]  ;;  %v34_v28 = vld [vmem:[%s6156_s0 + $0x70] sm:$0xff]  ;;  %v824_v32 = vld [vmem:[%s6157_s1 + $0xc0] sm:$0xff]  ;;  %v566_v62 = vrot.slane %v2679_v6, 1 }
   0x7   :  { %v33_v27 = vld [vmem:[%s6156_s0 + $0x68] sm:$0xff]  ;;  %2435 = vrot.lane.b32.xlu1 %v2716_v18, %s2630_s23  ;;  %v2750_v29 = vpack.i.bf16 %v2718_v19, %v2705_v15  ;;  %1380 = vmatprep.subr.mxu0 %v827_v17  ;;  %v2754_v31 = vmax.f32 %v34_v28, 0.0  ;;  %v823_v33 = vld [vmem:[%s6157_s1 + $0xb8] sm:$0xff]  ;;  %v822_v34 = vld [vmem:[%s6157_s1 + $0xb0] sm:$0xff]  ;;  %v2821_v51 = vsel %vm323_vm0, %v710_v47, %v711_v45  ;;  %v562_v22 = vrot.slane %v2731_v23, 1 }
   0x8   :  { %v2752_v30 = vmax.f32 %v33_v27, 0.0  ;;  %1381 = vmatpush1.msra.mxu0 %v826_v20  ;;  %v2769_v35 = vpack.i.bf16 %v2733_v24, %v2735_v25  ;;  %v821_v36 = vld [vmem:[%s6157_s1 + $0xa8] sm:$0xff]  ;;  %v32_v38 = vld [vmem:[%s6156_s0 + $0x60] sm:$0xff]  ;;  %v819_v40 = vld [vmem:[%s6157_s1 + $0x98] sm:$0xff]  ;;  %v715_v49 = vrot.slane %v2735_v25, 2  ;;  %v2886_v10 = vsel %vm172_vm1, %v565_v61, %v566_v62 }
   0x9   :  { %1382 = vmatprep.subr.mxu0 %v825_v26  ;;  %v820_v39 = vld [vmem:[%s6157_s1 + $0xa0] sm:$0xff]  ;;  %v818_v41 = vld [vmem:[%s6157_s1 + $0x90] sm:$0xff]  ;;  %v2794_v42 = vmax.f32 %v32_v38, 0.0  ;;  %v817_v43 = vld [vmem:[%s6157_s1 + $0x88] sm:$0xff]  ;;  %v716_v52 = vrot.slane %v2754_v31, 2  ;;  %v563_v26 = vrot.slane %v2705_v15, 1 }
   0xa   :  { %478 = vrot.lane.b32.xlu0 %v2731_v23, %s2630_s23  ;;  %1383 = vmatpush1.msra.mxu0 %v824_v32  ;;  %v2778_v37 = vpack.i.bf16 %v2754_v31, %v2752_v30  ;;  %v816_v44 = vld [vmem:[%s6157_s1 + $0x80] sm:$0xff]  ;;  %v815_v46 = vld [vmem:[%s6157_s1 + $0x78] sm:$0xff]  ;;  %v814_v48 = vld [vmem:[%s6157_s1 + $0x70] sm:$0xff]  ;;  %v592_v27 = vrot.slane %v2674_v4, 1  ;;  %v593_v28 = vrot.slane %v2687_v9, 1  ;;  %v576_v9 = vrot.slane %v2752_v30, 1 }
   0xb   :  { %2440 = vrot.lane.b32.xlu1 %v2750_v29, %s2630_s23  ;;  %1384 = vmatprep.subr.mxu0 %v823_v33  ;;  %v813_v50 = vld [vmem:[%s6157_s1 + $0x68] sm:$0xff]  ;;  %v812_v53 = vld [vmem:[%s6157_s1 + $0x60] sm:$0xff]  ;;  %v811_v54 = vld [vmem:[%s6157_s1 + $0x58] sm:$0xff]  ;;  %v2835_v55 = vsel %vm323_vm0, %v715_v49, %v716_v52  ;;  %v2479_v17 = vpack.i.bf16 %v2886_v10, %v2794_v42 }
   0xc   :  { %1385 = vmatpush1.msra.mxu0 %v822_v34  ;;  %v810_v56 = vld [vmem:[%s6157_s1 + $0x50] sm:$0xff]  ;;  %v809_v57 = vld [vmem:[%s6157_s1 + $0x48] sm:$0xff]  ;;  %v895_v58 = vld [vmem:[%s6157_s1 + $0x2f8] sm:$0xff] }
   0xd   :  { %1386 = vmatprep.subr.mxu0 %v821_v36  ;;  %v808_v59 = vld [vmem:[%s6157_s1 + $0x40] sm:$0xff]  ;;  %v894_v60 = vld [vmem:[%s6157_s1 + $0x2f0] sm:$0xff]  ;;  %v807_v63 = vld [vmem:[%s6157_s1 + $0x38] sm:$0xff]  ;;  %1465 = vmatprep.subr.mxu1 %v895_v58 }
   0xe   :  { %2445 = vrot.lane.b32.xlu0 %v2769_v35, %s2630_s23  ;;  %1387 = vmatpush1.msra.mxu0 %v820_v39  ;;  %v806_v0 = vld [vmem:[%s6157_s1 + $0x30] sm:$0xff]  ;;  %v893_v1 = vld [vmem:[%s6157_s1 + $0x2e8] sm:$0xff]  ;;  %v892_v5 = vld [vmem:[%s6157_s1 + $0x2e0] sm:$0xff] }
   0xf   :  { %2450 = vrot.lane.b32.xlu1 %v2778_v37, %s2630_s23  ;;  %1388 = vmatprep.subr.mxu0 %v819_v40  ;;  %v805_v2 = vld [vmem:[%s6157_s1 + $0x28] sm:$0xff]  ;;  %v804_v7 = vld [vmem:[%s6157_s1 + $0x20] sm:$0xff]  ;;  %v891_v8 = vld [vmem:[%s6157_s1 + $0x2d8] sm:$0xff]  ;;  %v2956_v40 = vsel %vm172_vm1, %v562_v22, %v563_v26 }
  0x10   :  { %1389 = vmatpush1.msra.mxu0 %v818_v41  ;;  %1466 = vmatpush1.msra.mxu1 %v894_v60  ;;  %v803_v11 = vld [vmem:[%s6157_s1 + $0x18] sm:$0xff]  ;;  %v890_v12 = vld [vmem:[%s6157_s1 + $0x2d0] sm:$0xff]  ;;  %v801_v14 = vld [vmem:[%s6157_s1 + $0x8] sm:$0xff]  ;;  %v2959_v41 = vsel %vm172_vm1, %v592_v27, %v593_v28 }
  0x11   :  { %1390 = vmatprep.subr.mxu0 %v817_v43  ;;  %1467 = vmatprep.subr.mxu1 %v893_v1  ;;  %v889_v16 = vld [vmem:[%s6157_s1 + $0x2c8] sm:$0xff]  ;;  %v863_v20 = vld [vmem:[%s6157_s1 + $0x1f8] sm:$0xff]  ;;  %v888_v21 = vld [vmem:[%s6157_s1 + $0x2c0] sm:$0xff]  ;;  %v2489_v58 = vpack.i.bf16 %v2956_v40, %v2959_v41  ;;  %v2484_v27 = vpack.i.bf16 %v2959_v41, %v2886_v10 }
  0x12   :  { %496 = vrot.lane.b32.xlu0 %v2794_v42, %s2630_s23  ;;  %1391 = vmatpush1.msra.mxu0 %v816_v44  ;;  %v887_v32 = vld [vmem:[%s6157_s1 + $0x2b8] sm:$0xff]  ;;  %v861_v33 = vld [vmem:[%s6157_s1 + $0x1e8] sm:$0xff]  ;;  %v860_v4 = vld [vmem:[%s6157_s1 + $0x1e0] sm:$0xff] }
  0x13   :  { %2455 = vrot.lane.b32.xlu1 %v2700_v13, %s2631_s7  ;;  %1392 = vmatprep.subr.mxu0 %v815_v46  ;;  %v802_v13 = vld [vmem:[%s6157_s1 + $0x10] sm:$0xff]  ;;  %v2942_v36 = vld [vmem:[%s6156_s0 + $0x38] sm:$0x3]  ;;  %v884_v39 = vld [vmem:[%s6157_s1 + $0x2a0] sm:$0xff] }
  0x14   :  { %1393 = vmatpush1.msra.mxu0 %v814_v48  ;;  %1468 = vmatpush1.msra.mxu1 %v892_v5  ;;  %v886_v34 = vld [vmem:[%s6157_s1 + $0x2b0] sm:$0xff]  ;;  %v859_v38 = vld [vmem:[%s6157_s1 + $0x1d8] sm:$0xff]  ;;  %v210_v43 = vmax.f32 %v2942_v36, 0.0  ;;  %v857_v48 = vld [vmem:[%s6157_s1 + $0x1c8] sm:$0xff] }
  0x15   :  { %1394 = vmatprep.subr.mxu0 %v813_v50  ;;  %1469 = vmatprep.subr.mxu1 %v891_v8  ;;  %v858_v46 = vld [vmem:[%s6157_s1 + $0x1d0] sm:$0xff]  ;;  %v883_v47 = vld [vmem:[%s6157_s1 + $0x298] sm:$0xff]  ;;  %v853_v5 = vld [vmem:[%s6157_s1 + $0x1a8] sm:$0xff] }
  0x16   :  { %518 = vrot.lane.b32.xlu0 %v2731_v23, %s2631_s7  ;;  %1395 = vmatpush1.msra.mxu0 %v812_v53  ;;  %v882_v49 = vld [vmem:[%s6157_s1 + $0x290] sm:$0xff]  ;;  %v570_v50 = vrot.slane %v210_v43, 1  ;;  %v855_v61 = vld [vmem:[%s6157_s1 + $0x1b8] sm:$0xff]  ;;  %v845_v41 = vld [vmem:[%s6157_s1 + $0x168] sm:$0xff] }
  0x17   :  { %1396 = vmatprep.subr.mxu0 %v811_v54  ;;  %2460 = vrot.lane.b32.xlu1 %v2716_v18, %s2631_s7  ;;  %v800_v18 = vld [vmem:[%s6157_s1] sm:$0xff]  ;;  %v2979_v54 = vld [vmem:[%s6156_s0 + $0x30] sm:$0x3]  ;;  %v875_v22 = vld [vmem:[%s6157_s1 + $0x258] sm:$0xff] }
  0x18   :  { %1397 = vmatpush1.msra.mxu0 %v810_v56  ;;  %1470 = vmatpush1.msra.mxu1 %v890_v12  ;;  %v856_v56 = vld [vmem:[%s6157_s1 + $0x1c0] sm:$0xff]  ;;  %v3002_v1 = vsel %vm172_vm1, %v566_v62, %v570_v50 }
  0x19   :  { %1398 = vmatprep.subr.mxu0 %v809_v57  ;;  %1471 = vmatprep.subr.mxu1 %v889_v16  ;;  %v881_v57 = vld [vmem:[%s6157_s1 + $0x288] sm:$0xff]  ;;  %v852_v62 = vld [vmem:[%s6157_s1 + $0x1a0] sm:$0xff] }
  0x1a   :  { %1399 = vmatpush1.msra.mxu0 %v808_v59  ;;  %2465 = vrot.lane.b32.xlu0 %v2750_v29, %s2631_s7  ;;  %v862_v29 = vld [vmem:[%s6157_s1 + $0x1f0] sm:$0xff]  ;;  %v209_v59 = vmax.f32 %v2979_v54, 0.0  ;;  %v872_v50 = vld [vmem:[%s6157_s1 + $0x240] sm:$0xff] }
  0x1b   :  { %1400 = vmatprep.subr.mxu0 %v807_v63  ;;  %2470 = vrot.lane.b32.xlu1 %v2769_v35, %s2631_s7  ;;  %v885_v35 = vld [vmem:[%s6157_s1 + $0x2a8] sm:$0xff]  ;;  %v854_v63 = vld [vmem:[%s6157_s1 + $0x1b0] sm:$0xff]  ;;  %v988_v54 = vld [vmem:[%s6157_s1 + $0x5e0] sm:$0xff] }
  0x1c   :  { %1401 = vmatpush1.msra.mxu0 %v806_v0  ;;  %1472 = vmatpush1.msra.mxu1 %v888_v21  ;;  %v880_v0 = vld [vmem:[%s6157_s1 + $0x280] sm:$0xff]  ;;  %v568_v12 = vrot.slane %v209_v59, 1 }
  0x1d   :  { %1402 = vmatprep.subr.mxu0 %v805_v2  ;;  %1473 = vmatprep.subr.mxu1 %v887_v32  ;;  %v876_v21 = vld [vmem:[%s6157_s1 + $0x260] sm:$0xff] }
  0x1e   :  { %1403 = vmatpush1.msra.mxu0 %v804_v7  ;;  %2475 = vrot.lane.b32.xlu0 %v2778_v37, %s2631_s7  ;;  %v28_v37 = vld [vmem:[%s6156_s0 + $0x40] sm:$0x3]  ;;  %v879_v7 = vld [vmem:[%s6157_s1 + $0x278] sm:$0xff] }
  0x1f   :  { %1404 = vmatprep.subr.mxu0 %v803_v11  ;;  %2480 = vrot.lane.b32.xlu1 %v2479_v17, %s2631_s7  ;;  %v273_v44 = vmax.f32 %v28_v37, 0.0  ;;  %v878_v11 = vld [vmem:[%s6157_s1 + $0x270] sm:$0xff]  ;;  %v3066_v32 = vld [vmem:[%s6156_s0 + $0x80] sm:$0x3]  ;;  %v573_v37 = vrot.slane %v2794_v42, 1 }
  0x20   :  { %1405 = vmatpush1.msra.mxu0 %v802_v13  ;;  %1474 = vmatpush1.msra.mxu1 %v886_v34  ;;  %v575_v13 = vrot.slane %v2718_v19, 1  ;;  %v850_v17 = vld [vmem:[%s6157_s1 + $0x190] sm:$0xff]  ;;  %v972_v36 = vld [vmem:[%s6157_s1 + $0x560] sm:$0xff] }
  0x21   :  { %1406 = vmatprep.subr.mxu0 %v801_v14  ;;  %1475 = vmatprep.subr.mxu1 %v885_v35  ;;  %v595_v53 = vrot.slane %v273_v44, 1  ;;  %v713_v60 = vrot.slane %v273_v44, 2  ;;  %v877_v14 = vld [vmem:[%s6157_s1 + $0x268] sm:$0xff]  ;;  %v874_v34 = vld [vmem:[%s6157_s1 + $0x250] sm:$0xff]  ;;  %v572_v35 = vrot.slane %v2733_v24, 1 }
  0x22   :  { %1407 = vmatpush1.msra.mxu0 %v800_v18  ;;  %1476 = vmatpush1.msra.mxu1 %v884_v39  ;;  %v849_v18 = vld [vmem:[%s6157_s1 + $0x188] sm:$0xff]  ;;  %v598_v39 = vrot.slane %v2754_v31, 1 }
  0x23   :  { %1408 = vmatprep.subr.mxu0 %v863_v20  ;;  %1477 = vmatprep.subr.mxu1 %v883_v47  ;;  %v596_v2 = vsel %vm172_vm1, %v593_v28, %v595_v53  ;;  %v3014_v8 = vsel %vm323_vm0, %v711_v45, %v713_v60  ;;  %v851_v45 = vld [vmem:[%s6157_s1 + $0x198] sm:$0xff]  ;;  %v848_v20 = vld [vmem:[%s6157_s1 + $0x180] sm:$0xff]  ;;  %v3056_v28 = vsel %vm172_vm1, %v563_v26, %v568_v12  ;;  %v873_v44 = vld [vmem:[%s6157_s1 + $0x248] sm:$0xff]  ;;  %v212_v47 = vmax.f32 %v3066_v32, 0.0 }
  0x24   :  { %1409 = vmatpush2.msra.mxu0 %v862_v29  ;;  %1478 = vmatpush1.msra.mxu1 %v882_v49  ;;  %v3034_v16 = vpack.i.bf16 %v596_v2, %v3002_v1  ;;  %v3061_v29 = vsel %vm172_vm1, %v575_v13, %v576_v9  ;;  %v847_v26 = vld [vmem:[%s6157_s1 + $0x178] sm:$0xff]  ;;  %v842_v53 = vld [vmem:[%s6157_s1 + $0x150] sm:$0xff]  ;;  %v840_v2 = vld [vmem:[%s6157_s1 + $0x140] sm:$0xff] }
  0x25   :  { %1410 = vmatprep.subr.mxu0 %v861_v33  ;;  %1479 = vmatprep.subr.mxu1 %v881_v57  ;;  %v3071_v33 = vld [vmem:[%s6156_s0 + $0x88] sm:$0x3]  ;;  %v843_v49 = vld [vmem:[%s6157_s1 + $0x158] sm:$0xff]  ;;  %v3119_v57 = vsel %vm172_vm1, %v572_v35, %v573_v37  ;;  %v838_v13 = vld [vmem:[%s6157_s1 + $0x130] sm:$0xff] }
  0x26   :  { %1411 = vmatpush2.msra.mxu0 %v860_v4  ;;  %2490 = vrot.lane.b32.xlu1 %v2489_v58, %s2631_s7  ;;  %v846_v4 = vld [vmem:[%s6157_s1 + $0x170] sm:$0xff]  ;;  %v3125_v60 = vld [vmem:[%s6156_s0 + $0x78] sm:$0x3]  ;;  %v865_v35 = vld [vmem:[%s6157_s1 + $0x208] sm:$0xff] }
  0x27   :  { %1412 = vmatprep.subr.mxu0 %v859_v38  ;;  %1480 = vmatpush1.msra.mxu1 %v880_v0  ;;  %v597_v38 = vrot.slane %v2735_v25, 1  ;;  %v274_v25 = vmax.f32 %v3071_v33, 0.0  ;;  %v211_v12 = vmax.f32 %v3125_v60, 0.0  ;;  %v983_v32 = vld [vmem:[%s6157_s1 + $0x5b8] sm:$0xff]  ;;  %v1014_v60 = vld [vmem:[%s6157_s1 + $0x6b0] sm:$0xff] }
  0x28   :  { %1413 = vmatpush2.msra.mxu0 %v858_v46  ;;  %1481 = vmatprep.subr.mxu1 %v879_v7  ;;  %v3096_v46 = vpack.i.bf16 %v3061_v29, %v3056_v28  ;;  %v839_v7 = vld [vmem:[%s6157_s1 + $0x138] sm:$0xff] }
  0x29   :  { %1414 = vmatprep.subr.mxu0 %v857_v48  ;;  %1482 = vmatpush1.msra.mxu1 %v878_v11  ;;  %v844_v48 = vld [vmem:[%s6157_s1 + $0x160] sm:$0xff]  ;;  %v599_v58 = vsel %vm172_vm1, %v597_v38, %v598_v39  ;;  %v600_v0 = vrot.slane %v274_v25, 1 }
  0x2a   :  { %1415 = vmatpush2.msra.mxu0 %v856_v56  ;;  %1483 = vmatprep.subr.mxu1 %v877_v14  ;;  %v871_v56 = vld [vmem:[%s6157_s1 + $0x238] sm:$0xff]  ;;  %v3149_v11 = vpack.i.bf16 %v3119_v57, %v599_v58  ;;  %v868_v14 = vld [vmem:[%s6157_s1 + $0x220] sm:$0xff] }
  0x2b   :  { %1416 = vmatprep.subr.mxu0 %v855_v61  ;;  %2495 = vrot.lane.b32.xlu1 %v3034_v16, %s2630_s23  ;;  %v841_v61 = vld [vmem:[%s6157_s1 + $0x148] sm:$0xff]  ;;  %v956_v58 = vld [vmem:[%s6157_s1 + $0x4e0] sm:$0xff] }
  0x2c   :  { %1417 = vmatpush2.msra.mxu0 %v854_v63  ;;  %1484 = vmatpush1.msra.mxu1 %v876_v21  ;;  %v580_v63 = vrot.slane %v212_v47, 1  ;;  %v867_v21 = vld [vmem:[%s6157_s1 + $0x218] sm:$0xff] }
  0x2d   :  { %1418 = vmatprep.subr.mxu0 %v853_v5  ;;  %1485 = vmatprep.subr.mxu1 %v875_v22  ;;  %v870_v5 = vld [vmem:[%s6157_s1 + $0x230] sm:$0xff]  ;;  %v835_v22 = vld [vmem:[%s6157_s1 + $0x118] sm:$0xff] }
  0x2e   :  { %1419 = vmatpush2.msra.mxu0 %v852_v62  ;;  %2485 = vrot.lane.b32.xlu0 %v2484_v27, %s2630_s23  ;;  %v869_v62 = vld [vmem:[%s6157_s1 + $0x228] sm:$0xff]  ;;  %v578_v27 = vrot.slane %v211_v12, 1 }
  0x2f   :  { %1420 = vmatprep.subr.mxu0 %v851_v45  ;;  %1486 = vmatpush1.msra.mxu1 %v874_v34  ;;  %v837_v45 = vld [vmem:[%s6157_s1 + $0x128] sm:$0xff]  ;;  %v834_v34 = vld [vmem:[%s6157_s1 + $0x110] sm:$0xff] }
  0x30   :  { %1421 = vmatpush2.msra.mxu0 %v850_v17  ;;  %1487 = vmatprep.subr.mxu1 %v873_v44  ;;  %v3166_v17 = vsel %vm172_vm1, %v576_v9, %v580_v63  ;;  %v866_v9 = vld [vmem:[%s6157_s1 + $0x210] sm:$0xff]  ;;  %v959_v44 = vld [vmem:[%s6157_s1 + $0x4f8] sm:$0xff] }
  0x31   :  { %1422 = vmatprep.subr.mxu0 %v849_v18  ;;  %2505 = vrot.lane.b32.xlu1 %v3096_v46, %s2630_s23  ;;  %v601_v18 = vsel %vm172_vm1, %v598_v39, %v600_v0  ;;  %v832_v39 = vld [vmem:[%s6157_s1 + $0x100] sm:$0xff]  ;;  %v955_v0 = vld [vmem:[%s6157_s1 + $0x4d8] sm:$0xff] }
  0x32   :  { %1423 = vmatpush2.msra.mxu0 %v848_v20  ;;  %1488 = vmatpush1.msra.mxu1 %v872_v50  ;;  %v836_v20 = vld [vmem:[%s6157_s1 + $0x120] sm:$0xff]  ;;  %v3194_v38 = vpack.i.bf16 %v601_v18, %v3166_v17  ;;  %v958_v50 = vld [vmem:[%s6157_s1 + $0x4f0] sm:$0xff]  ;;  %v921_v18 = vld [vmem:[%s6157_s1 + $0x3c8] sm:$0xff] }
  0x33   :  { %1424 = vmatprep.subr.mxu0 %v847_v26  ;;  %1489 = vmatprep.subr.mxu1 %v871_v56  ;;  %v685_v26 = vrot.slane %v2672_v3, 2  ;;  %v833_v3 = vld [vmem:[%s6157_s1 + $0x108] sm:$0xff]  ;;  %v926_v56 = vld [vmem:[%s6157_s1 + $0x3f0] sm:$0xff] }
  0x34   :  { %1425 = vmatpush2.msra.mxu0 %v846_v4  ;;  %602 = vrot.lane.b32.xlu0 %v2956_v40, %s2630_s23  ;;  %v686_v4 = vrot.slane %v2679_v6, 2 }
  0x35   :  { %1426 = vmatprep.subr.mxu0 %v845_v41  ;;  %1490 = vmatpush1.msra.mxu1 %v870_v5  ;;  %v864_v41 = vld [vmem:[%s6157_s1 + $0x200] sm:$0xff] }
  0x36   :  { %1427 = vmatpush2.msra.mxu0 %v844_v48  ;;  %1491 = vmatprep.subr.mxu1 %v869_v62  ;;  %v3211_v48 = vsel %vm172_vm1, %v573_v37, %v578_v27  ;;  %v957_v37 = vld [vmem:[%s6157_s1 + $0x4e8] sm:$0xff]  ;;  %v924_v5 = vld [vmem:[%s6157_s1 + $0x3e0] sm:$0xff]  ;;  %v923_v62 = vld [vmem:[%s6157_s1 + $0x3d8] sm:$0xff] }
  0x37   :  { %1428 = vmatprep.subr.mxu0 %v843_v49  ;;  %2515 = vrot.lane.b32.xlu1 %v3149_v11, %s2630_s23  ;;  %v3216_v49 = vsel %vm323_vm0, %v685_v26, %v686_v4  ;;  %v948_v27 = vld [vmem:[%s6157_s1 + $0x4a0] sm:$0xff]  ;;  %v918_v26 = vld [vmem:[%s6157_s1 + $0x3b0] sm:$0xff] }
  0x38   :  { %1429 = vmatpush2.msra.mxu0 %v842_v53  ;;  %1492 = vmatpush1.msra.mxu1 %v868_v14  ;;  %v927_v53 = vld [vmem:[%s6157_s1 + $0x3f8] sm:$0xff]  ;;  %v2534_v63 = vpack.i.bf16 %v3216_v49, %v3211_v48 }
  0x39   :  { %1430 = vmatprep.subr.mxu0 %v841_v61  ;;  %1493 = vmatprep.subr.mxu1 %v867_v21  ;;  %v925_v61 = vld [vmem:[%s6157_s1 + $0x3e8] sm:$0xff]  ;;  %v951_v14 = vld [vmem:[%s6157_s1 + $0x4b8] sm:$0xff]  ;;  %v920_v21 = vld [vmem:[%s6157_s1 + $0x3c0] sm:$0xff] }
  0x3a   :  { %1431 = vmatpush2.msra.mxu0 %v840_v2  ;;  %1494 = vmatpush1.msra.mxu1 %v866_v9  ;;  %v954_v2 = vld [vmem:[%s6157_s1 + $0x4d0] sm:$0xff]  ;;  %v919_v9 = vld [vmem:[%s6157_s1 + $0x3b8] sm:$0xff] }
  0x3b   :  { %1432 = vmatprep.subr.mxu0 %v839_v7  ;;  %1495 = vmatprep.subr.mxu1 %v865_v35  ;;  %v953_v7 = vld [vmem:[%s6157_s1 + $0x4c8] sm:$0xff] }
  0x3c   :  { %1433 = vmatpush2.msra.mxu0 %v838_v13  ;;  %2525 = vrot.lane.b32.xlu1 %v3194_v38, %s2630_s23  ;;  %v952_v13 = vld [vmem:[%s6157_s1 + $0x4c0] sm:$0xff]  ;;  %v917_v35 = vld [vmem:[%s6157_s1 + $0x3a8] sm:$0xff] }
  0x3d   :  { %1434 = vmatprep.subr.mxu0 %v837_v45  ;;  %1496 = vmatpush1.msra.mxu1 %v864_v41  ;;  %v922_v45 = vld [vmem:[%s6157_s1 + $0x3d0] sm:$0xff]  ;;  %v945_v41 = vld [vmem:[%s6157_s1 + $0x488] sm:$0xff] }
  0x3e   :  { %1435 = vmatpush2.msra.mxu0 %v836_v20  ;;  %1497 = vmatprep.subr.mxu1 %v927_v53  ;;  %v950_v20 = vld [vmem:[%s6157_s1 + $0x4b0] sm:$0xff] }
  0x3f   :  { %1436 = vmatprep.subr.mxu0 %v835_v22  ;;  %1498 = vmatpush2.msra.mxu1 %v926_v56  ;;  %v949_v22 = vld [vmem:[%s6157_s1 + $0x4a8] sm:$0xff]  ;;  %v914_v53 = vld [vmem:[%s6157_s1 + $0x390] sm:$0xff] }
  0x40   :  { %1437 = vmatpush2.msra.mxu0 %v834_v34  ;;  %1499 = vmatprep.subr.mxu1 %v925_v61  ;;  %v947_v34 = vld [vmem:[%s6157_s1 + $0x498] sm:$0xff]  ;;  %v913_v56 = vld [vmem:[%s6157_s1 + $0x388] sm:$0xff]  ;;  %v912_v61 = vld [vmem:[%s6157_s1 + $0x380] sm:$0xff] }
  0x41   :  { %1438 = vmatprep.subr.mxu0 %v833_v3  ;;  %2535 = vrot.lane.b32.xlu1 %v2534_v63, %s2630_s23  ;;  %v946_v3 = vld [vmem:[%s6157_s1 + $0x490] sm:$0xff]  ;;  %v941_v63 = vld [vmem:[%s6157_s1 + $0x468] sm:$0xff] }
  0x42   :  { %1439 = vmatpush2.msra.mxu0 %v832_v39  ;;  %1500 = vmatpush2.msra.mxu1 %v924_v5  ;;  %v916_v39 = vld [vmem:[%s6157_s1 + $0x3a0] sm:$0xff]  ;;  %v910_v5 = vld [vmem:[%s6157_s1 + $0x370] sm:$0xff] }
  0x43   :  { %1554 = vmatprep.subr.mxu0 %v959_v44  ;;  %1441 = vmatmul.mubr.f32.vlgmr.msra.gmra.mxu0 %v2731_v23  ;;  %v915_v44 = vld [vmem:[%s6157_s1 + $0x398] sm:$0xff] }
  0x44   :  { %1555 = vmatpush1.msra.mxu0 %v958_v50  ;;  %1501 = vmatprep.subr.mxu1 %v923_v62  ;;  %v944_v50 = vld [vmem:[%s6157_s1 + $0x480] sm:$0xff]  ;;  %v909_v62 = vld [vmem:[%s6157_s1 + $0x368] sm:$0xff] }
  0x45   :  { %1556 = vmatprep.subr.mxu0 %v957_v37  ;;  %1502 = vmatpush2.msra.mxu1 %v922_v45  ;;  %v943_v37 = vld [vmem:[%s6157_s1 + $0x478] sm:$0xff]  ;;  %v908_v45 = vld [vmem:[%s6157_s1 + $0x360] sm:$0xff] }
  0x46   :  { %1557 = vmatpush1.msra.mxu0 %v956_v58  ;;  %1503 = vmatprep.subr.mxu1 %v921_v18  ;;  %v942_v58 = vld [vmem:[%s6157_s1 + $0x470] sm:$0xff]  ;;  %v907_v18 = vld [vmem:[%s6157_s1 + $0x358] sm:$0xff] }
  0x47   :  { %1558 = vmatprep.subr.mxu0 %v955_v0  ;;  %1504 = vmatpush2.msra.mxu1 %v920_v21  ;;  %v911_v0 = vld [vmem:[%s6157_s1 + $0x378] sm:$0xff]  ;;  %v906_v21 = vld [vmem:[%s6157_s1 + $0x350] sm:$0xff] }
  0x48   :  { %1559 = vmatpush1.msra.mxu0 %v954_v2  ;;  %1505 = vmatprep.subr.mxu1 %v919_v9  ;;  %v940_v2 = vld [vmem:[%s6157_s1 + $0x460] sm:$0xff]  ;;  %v905_v9 = vld [vmem:[%s6157_s1 + $0x348] sm:$0xff] }
  0x49   :  { %1560 = vmatprep.subr.mxu0 %v953_v7  ;;  %1506 = vmatpush2.msra.mxu1 %v918_v26  ;;  %v939_v7 = vld [vmem:[%s6157_s1 + $0x458] sm:$0xff]  ;;  %v904_v26 = vld [vmem:[%s6157_s1 + $0x340] sm:$0xff] }
  0x4a   :  { %1561 = vmatpush1.msra.mxu0 %v952_v13  ;;  %1507 = vmatprep.subr.mxu1 %v917_v35  ;;  %v938_v13 = vld [vmem:[%s6157_s1 + $0x450] sm:$0xff]  ;;  %v903_v35 = vld [vmem:[%s6157_s1 + $0x338] sm:$0xff] }
  0x4b   :  { %1562 = vmatprep.subr.mxu0 %v951_v14  ;;  %1508 = vmatpush2.msra.mxu1 %v916_v39  ;;  %v937_v14 = vld [vmem:[%s6157_s1 + $0x448] sm:$0xff]  ;;  %v902_v39 = vld [vmem:[%s6157_s1 + $0x330] sm:$0xff] }
  0x4c   :  { %1563 = vmatpush1.msra.mxu0 %v950_v20  ;;  %1509 = vmatprep.subr.mxu1 %v915_v44  ;;  %v936_v20 = vld [vmem:[%s6157_s1 + $0x440] sm:$0xff]  ;;  %v901_v44 = vld [vmem:[%s6157_s1 + $0x328] sm:$0xff] }
  0x4d   :  { %1564 = vmatprep.subr.mxu0 %v949_v22  ;;  %1510 = vmatpush2.msra.mxu1 %v914_v53  ;;  %v935_v22 = vld [vmem:[%s6157_s1 + $0x438] sm:$0xff]  ;;  %v900_v53 = vld [vmem:[%s6157_s1 + $0x320] sm:$0xff] }
  0x4e   :  { %1565 = vmatpush1.msra.mxu0 %v948_v27  ;;  %1511 = vmatprep.subr.mxu1 %v913_v56  ;;  %v934_v27 = vld [vmem:[%s6157_s1 + $0x430] sm:$0xff]  ;;  %v683_v56 = vrot.slane %v2705_v15, 2 }
  0x4f   :  { %1566 = vmatprep.subr.mxu0 %v947_v34  ;;  %1512 = vmatpush2.msra.mxu1 %v912_v61  ;;  %v933_v34 = vld [vmem:[%s6157_s1 + $0x428] sm:$0xff]  ;;  %v899_v61 = vld [vmem:[%s6157_s1 + $0x318] sm:$0xff] }
  0x50   :  { %1567 = vmatpush1.msra.mxu0 %v946_v3  ;;  %1513 = vmatprep.subr.mxu1 %v911_v0  ;;  %v932_v3 = vld [vmem:[%s6157_s1 + $0x420] sm:$0xff]  ;;  %v991_v0 = vld [vmem:[%s6157_s1 + $0x5f8] sm:$0xff] }
  0x51   :  { %1568 = vmatprep.subr.mxu0 %v945_v41  ;;  %1514 = vmatpush2.msra.mxu1 %v910_v5  ;;  %v931_v41 = vld [vmem:[%s6157_s1 + $0x418] sm:$0xff]  ;;  %v990_v5 = vld [vmem:[%s6157_s1 + $0x5f0] sm:$0xff] }
  0x52   :  { %1569 = vmatpush1.msra.mxu0 %v944_v50  ;;  %1515 = vmatprep.subr.mxu1 %v909_v62  ;;  %v930_v50 = vld [vmem:[%s6157_s1 + $0x410] sm:$0xff] }
  0x53   :  { %1570 = vmatprep.subr.mxu0 %v943_v37  ;;  %1516 = vmatpush2.msra.mxu1 %v908_v45  ;;  %v682_v37 = vrot.slane %v2731_v23, 2  ;;  %v898_v23 = vld [vmem:[%s6157_s1 + $0x310] sm:$0xff]  ;;  %v695_v45 = vrot.slane %v2718_v19, 2 }
  0x54   :  { %1571 = vmatpush1.msra.mxu0 %v942_v58  ;;  %1517 = vmatprep.subr.mxu1 %v907_v18  ;;  %v929_v58 = vld [vmem:[%s6157_s1 + $0x408] sm:$0xff] }
  0x55   :  { %1572 = vmatprep.subr.mxu0 %v941_v63  ;;  %1518 = vmatpush2.msra.mxu1 %v906_v21  ;;  %v928_v63 = vld [vmem:[%s6157_s1 + $0x400] sm:$0xff]  ;;  %v3422_v62 = vsel %vm323_vm0, %v682_v37, %v683_v56  ;;  %v989_v18 = vld [vmem:[%s6157_s1 + $0x5e8] sm:$0xff]  ;;  %v2564_v37 = vpack.i.bf16 %v2821_v51, %v3216_v49 }
  0x56   :  { %1573 = vmatpush1.msra.mxu0 %v940_v2  ;;  %1519 = vmatprep.subr.mxu1 %v905_v9  ;;  %v897_v2 = vld [vmem:[%s6157_s1 + $0x308] sm:$0xff]  ;;  %v2539_v21 = vpack.i.bf16 %v3422_v62, %v2821_v51 }
  0x57   :  { %1574 = vmatprep.subr.mxu0 %v939_v7  ;;  %1520 = vmatpush2.msra.mxu1 %v904_v26  ;;  %v896_v7 = vld [vmem:[%s6157_s1 + $0x300] sm:$0xff]  ;;  %v700_v26 = vrot.slane %v212_v47, 2  ;;  %v982_v47 = vld [vmem:[%s6157_s1 + $0x5b0] sm:$0xff] }
  0x58   :  { %1575 = vmatpush1.msra.mxu0 %v938_v13  ;;  %1521 = vmatprep.subr.mxu1 %v903_v35  ;;  %v688_v13 = vrot.slane %v209_v59, 2  ;;  %v987_v59 = vld [vmem:[%s6157_s1 + $0x5d8] sm:$0xff]  ;;  %v985_v35 = vld [vmem:[%s6157_s1 + $0x5c8] sm:$0xff] }
  0x59   :  { %1576 = vmatprep.subr.mxu0 %v937_v14  ;;  %1522 = vmatpush2.msra.mxu1 %v902_v39  ;;  %v696_v14 = vrot.slane %v2752_v30, 2  ;;  %v981_v39 = vld [vmem:[%s6157_s1 + $0x5a8] sm:$0xff] }
  0x5a   :  { %1577 = vmatpush1.msra.mxu0 %v936_v20  ;;  %1523 = vmatprep.subr.mxu1 %v901_v44  ;;  %v1023_v20 = vld [vmem:[%s6157_s1 + $0x6f8] sm:$0xff]  ;;  %v3446_v9 = vsel %vm323_vm0, %v683_v56, %v688_v13  ;;  %v692_v44 = vrot.slane %v2733_v24, 2 }
  0x5b   :  { %1578 = vmatprep.subr.mxu0 %v935_v22  ;;  %1524 = vmatpush2.msra.mxu1 %v900_v53  ;;  %v986_v22 = vld [vmem:[%s6157_s1 + $0x5d0] sm:$0xff]  ;;  %v975_v53 = vld [vmem:[%s6157_s1 + $0x578] sm:$0xff] }
  0x5c   :  { %1579 = vmatpush1.msra.mxu0 %v934_v27  ;;  %1525 = vmatprep.subr.mxu1 %v899_v61  ;;  %v3449_v27 = vsel %vm323_vm0, %v695_v45, %v696_v14  ;;  %v969_v61 = vld [vmem:[%s6157_s1 + $0x548] sm:$0xff]  ;;  %v964_v45 = vld [vmem:[%s6157_s1 + $0x520] sm:$0xff] }
  0x5d   :  { %1580 = vmatprep.subr.mxu0 %v933_v34  ;;  %1526 = vmatpush2.msra.mxu1 %v898_v23  ;;  %v718_v34 = vrot.slane %v274_v25, 2  ;;  %v2549_v33 = vpack.i.bf16 %v3449_v27, %v3446_v9  ;;  %v3475_v25 = vsel %vm323_vm0, %v696_v14, %v700_v26  ;;  %v967_v23 = vld [vmem:[%s6157_s1 + $0x538] sm:$0xff]  ;;  %v1020_v26 = vld [vmem:[%s6157_s1 + $0x6e0] sm:$0xff] }
  0x5e   :  { %1581 = vmatpush1.msra.mxu0 %v932_v3  ;;  %1527 = vmatprep.subr.mxu1 %v897_v2  ;;  %v984_v3 = vld [vmem:[%s6157_s1 + $0x5c0] sm:$0xff] }
  0x5f   :  { %1582 = vmatprep.subr.mxu0 %v931_v41  ;;  %1528 = vmatpush2.msra.mxu1 %v896_v7  ;;  %v980_v41 = vld [vmem:[%s6157_s1 + $0x5a0] sm:$0xff]  ;;  %v966_v7 = vld [vmem:[%s6157_s1 + $0x530] sm:$0xff] }
  0x60   :  { %1583 = vmatpush1.msra.mxu0 %v930_v50  ;;  %1643 = vmatprep.subr.mxu1 %v1023_v20  ;;  %v693_v50 = vrot.slane %v2794_v42, 2  ;;  %v963_v20 = vld [vmem:[%s6157_s1 + $0x518] sm:$0xff] }
  0x61   :  { %1584 = vmatprep.subr.mxu0 %v929_v58  ;;  %1446 = vmatprep.mubr.f32.mxu0 %v2679_v6  ;;  %v970_v58 = vld [vmem:[%s6157_s1 + $0x550] sm:$0xff]  ;;  %v968_v6 = vld [vmem:[%s6157_s1 + $0x540] sm:$0xff] }
  0x62   :  { %1585 = vmatpush1.msra.mxu0 %v928_v63  ;;  %2500 = vrot.lane.b32.xlu0 %v3034_v16, %s2631_s7  ;;  %v719_v16 = vsel %vm323_vm0, %v716_v52, %v718_v34  ;;  %v977_v52 = vld [vmem:[%s6157_s1 + $0x588] sm:$0xff]  ;;  %v3535_v51 = vsel %vm323_vm0, %v692_v44, %v693_v50 }
  0x63   :  { %1586 = vmatprep.subr.mxu0 %v991_v0  ;;  %2540 = vrot.lane.b32.xlu1 %v2539_v21, %s2630_s23  ;;  %v3494_v31 = vpack.i.bf16 %v719_v16, %v3475_v25  ;;  %v1021_v21 = vld [vmem:[%s6157_s1 + $0x6e8] sm:$0xff]  ;;  %v1018_v16 = vld [vmem:[%s6157_s1 + $0x6d0] sm:$0xff] }
  0x64   :  { %1587 = vmatpush2.msra.mxu0 %v990_v5  ;;  %v961_v34 = vld [vmem:[%s6157_s1 + $0x508] sm:$0xff] }
  0x65   :  { %1588 = vmatprep.subr.mxu0 %v989_v18  ;;  %1447 = vmatmul.mubr.f32.gmra.mxu0 %v2705_v15  ;;  %v979_v15 = vld [vmem:[%s6157_s1 + $0x598] sm:$0xff]  ;;  %v1022_v18 = vld [vmem:[%s6157_s1 + $0x6f0] sm:$0xff] }
  0x66   :  { %1589 = vmatpush2.msra.mxu0 %v988_v54  ;;  %1452 = vmatprep.mubr.f32.mxu0 %v2718_v19  ;;  %v978_v19 = vld [vmem:[%s6157_s1 + $0x590] sm:$0xff] }
  0x67   :  { %1590 = vmatprep.subr.mxu0 %v987_v59  ;;  %2510 = vrot.lane.b32.xlu0 %v3096_v46, %s2631_s7  ;;  %v976_v46 = vld [vmem:[%s6157_s1 + $0x580] sm:$0xff] }
  0x68   :  { %1591 = vmatpush2.msra.mxu0 %v986_v22  ;;  %2550 = vrot.lane.b32.xlu1 %v2549_v33, %s2630_s23  ;;  %v962_v22 = vld [vmem:[%s6157_s1 + $0x510] sm:$0xff]  ;;  %v960_v33 = vld [vmem:[%s6157_s1 + $0x500] sm:$0xff] }
  0x69   :  { %1592 = vmatprep.subr.mxu0 %v985_v35  ;;  %1453 = vmatmul.mubr.f32.gmra.mxu0 %v2733_v24  ;;  %v974_v24 = vld [vmem:[%s6157_s1 + $0x570] sm:$0xff] }
  0x6a   :  { %1593 = vmatpush2.msra.mxu0 %v984_v3  ;;  %1458 = vmatprep.mubr.f32.mxu0 %v2752_v30  ;;  %v690_v30 = vrot.slane %v210_v43, 2  ;;  %v971_v43 = vld [vmem:[%s6157_s1 + $0x558] sm:$0xff] }
  0x6b   :  { %1594 = vmatprep.subr.mxu0 %v983_v32  ;;  %2520 = vrot.lane.b32.xlu0 %v3149_v11, %s2631_s7  ;;  %v973_v11 = vld [vmem:[%s6157_s1 + $0x568] sm:$0xff]  ;;  %v1019_v32 = vld [vmem:[%s6157_s1 + $0x6d8] sm:$0xff] }
  0x6c   :  { %1595 = vmatpush2.msra.mxu0 %v982_v47  ;;  %2560 = vrot.lane.b32.xlu1 %v3494_v31, %s2630_s23  ;;  %v3543_v56 = vsel %vm323_vm0, %v686_v4, %v690_v30  ;;  %v1013_v30 = vld [vmem:[%s6157_s1 + $0x6a8] sm:$0xff] }
  0x6d   :  { %1596 = vmatprep.subr.mxu0 %v981_v39  ;;  %1459 = vmatmul.mubr.f32.gmra.mxu0 %v2794_v42  ;;  %v3561_v4 = vpack.i.bf16 %v3014_v8, %v3543_v56  ;;  %v965_v8 = vld [vmem:[%s6157_s1 + $0x528] sm:$0xff]  ;;  %v1087_v39 = vld [vmem:[%s6157_s1 + $0x8f8] sm:$0xff] }
  0x6e   :  { %1597 = vmatpush2.msra.mxu0 %v980_v41  ;;  %v2554_v41 = vpack.i.bf16 %v3535_v51, %v2835_v55  ;;  %v1011_v42 = vld [vmem:[%s6157_s1 + $0x698] sm:$0xff] }
  0x6f   :  { %1598 = vmatprep.subr.mxu0 %v979_v15  ;;  %2530 = vrot.lane.b32.xlu0 %v3194_v38, %s2631_s7  ;;  %v2574_v38 = vpack.i.bf16 %v3535_v51, %v3422_v62 }
  0x70   :  { %1599 = vmatpush2.msra.mxu0 %v978_v19  ;;  %2565 = vrot.lane.b32.xlu1 %v2564_v37, %s2631_s7  ;;  %v698_v19 = vrot.slane %v211_v12, 2 }
  0x71   :  { %1600 = vmatprep.subr.mxu0 %v977_v52  ;;  %v1016_v52 = vld [vmem:[%s6157_s1 + $0x6c0] sm:$0xff] }
  0x72   :  { %1601 = vmatpush2.msra.mxu0 %v976_v46  ;;  %v1015_v46 = vld [vmem:[%s6157_s1 + $0x6b8] sm:$0xff]  ;;  %v3650_v37 = vsel %vm323_vm0, %v693_v50, %v698_v19  ;;  %v1074_v19 = vld [vmem:[%s6157_s1 + $0x890] sm:$0xff] }
  0x73   :  { %1602 = vmatprep.subr.mxu0 %v975_v53  ;;  %660 = vrot.lane.b32.xlu0 %v3211_v48, %s2631_s7 }
  0x74   :  { %1603 = vmatpush2.msra.mxu0 %v974_v24  ;;  %2575 = vrot.lane.b32.xlu1 %v2574_v38, %s2631_s7  ;;  %v3655_v24 = vld [vmem:[%s6156_s0] sm:$0xff] }
  0x75   :  { %1604 = vmatprep.subr.mxu0 %v973_v11 }
  0x76   :  { %1605 = vmatpush2.msra.mxu0 %v972_v36 }
  0x77   :  { %1606 = vmatprep.subr.mxu0 %v971_v43  ;;  %2545 = vrot.lane.b32.xlu0 %v3561_v4, %s2630_s23  ;;  %v1012_v43 = vld [vmem:[%s6157_s1 + $0x6a0] sm:$0xff] }
  0x78   :  { %v2431_v63 = vpop.permute.xlu0 %2430  ;;  %1607 = vmatpush2.msra.mxu0 %v970_v58  ;;  %2585 = vrot.lane.b32.xlu1 %v3494_v31, %s2631_s7  ;;  %v1017_v31 = vld [vmem:[%s6157_s1 + $0x6c8] sm:$0xff]  ;;  %v1010_v58 = vld [vmem:[%s6157_s1 + $0x690] sm:$0xff] }
  0x79   :  { %v2433_v0 = vunpack.i.h.bf16 %v2431_v63  ;;  %v2432_v2 = vunpack.i.l.bf16 %v2431_v63  ;;  %v3567_v5 = vpop.permute.xlu1 %2435  ;;  %1608 = vmatprep.subr.mxu0 %v969_v61  ;;  %v1086_v61 = vld [vmem:[%s6157_s1 + $0x8f0] sm:$0xff]  ;;  %v1009_v63 = vld [vmem:[%s6157_s1 + $0x688] sm:$0xff] }
  0x7a   :  { %1609 = vmatpush2.msra.mxu0 %v968_v6  ;;  %v2438_v35 = vunpack.i.h.bf16 %v3567_v5  ;;  %v2437_v3 = vunpack.i.l.bf16 %v3567_v5  ;;  %v1039_v5 = vld [vmem:[%s6157_s1 + $0x778] sm:$0xff] }
  0x7b   :  { %v503_v13 = vsel %vm90_vm2, %v2432_v2, %v2433_v0  ;;  %1610 = vmatprep.subr.mxu0 %v967_v23  ;;  %2555 = vrot.lane.b32.xlu0 %v2554_v41, %s2630_s23  ;;  %v1085_v23 = vld [vmem:[%s6157_s1 + $0x8e8] sm:$0xff]  ;;  %v1008_v0 = vld [vmem:[%s6157_s1 + $0x680] sm:$0xff]  ;;  %v1075_v41 = vld [vmem:[%s6157_s1 + $0x898] sm:$0xff] }
  0x7c   :  { %1529 = vmatprep.mubr.f32.mxu1 %v503_v13  ;;  %v479_v14 = vpop.permute.xlu0 %478  ;;  %1611 = vmatpush2.msra.mxu0 %v966_v7  ;;  %v505_v44 = vsel %vm90_vm2, %v2437_v3, %v2438_v35  ;;  %v1007_v7 = vld [vmem:[%s6157_s1 + $0x678] sm:$0xff]  ;;  %v1006_v13 = vld [vmem:[%s6157_s1 + $0x670] sm:$0xff]  ;;  %v1001_v35 = vld [vmem:[%s6157_s1 + $0x648] sm:$0xff] }
  0x7d   :  { %v3587_v54 = vpop.permute.xlu1 %2440  ;;  %v502_v59 = vsel %vm90_vm2, %v479_v14, %v2432_v2  ;;  %1612 = vmatprep.subr.mxu0 %v965_v8  ;;  %66 = vrot.lane.b32.xlu1 %v3655_v24, %s2630_s23  ;;  %v1084_v2 = vld [vmem:[%s6157_s1 + $0x8e0] sm:$0xff]  ;;  %v1083_v8 = vld [vmem:[%s6157_s1 + $0x8d8] sm:$0xff]  ;;  %v1005_v14 = vld [vmem:[%s6157_s1 + $0x668] sm:$0xff] }
  0x7e   :  { %1530 = vmatmul.mubr.f32.vlgmr.msra.gmra.mxu1 %v502_v59  ;;  %1613 = vmatpush2.msra.mxu0 %v964_v45  ;;  %v1082_v45 = vld [vmem:[%s6157_s1 + $0x8d0] sm:$0xff]  ;;  %v1080_v59 = vld [vmem:[%s6157_s1 + $0x8c0] sm:$0xff] }
  0x7f   :  { %1644 = vmatpush1.msra.mxu1 %v1022_v18  ;;  %1614 = vmatprep.subr.mxu0 %v963_v20  ;;  %v1081_v18 = vld [vmem:[%s6157_s1 + $0x8c8] sm:$0xff]  ;;  %v1004_v20 = vld [vmem:[%s6157_s1 + $0x660] sm:$0xff] }
  0x80   :  { %1645 = vmatprep.subr.mxu1 %v1021_v21  ;;  %v3612_v47 = vpop.permute.xlu0 %2445  ;;  %1615 = vmatpush2.msra.mxu0 %v962_v22  ;;  %v1003_v21 = vld [vmem:[%s6157_s1 + $0x658] sm:$0xff] }
  0x81   :  { %1646 = vmatpush1.msra.mxu1 %v1020_v26  ;;  %v3622_v15 = vpop.permute.xlu1 %2450  ;;  %1616 = vmatprep.subr.mxu0 %v961_v34  ;;  %v1079_v22 = vld [vmem:[%s6157_s1 + $0x8b8] sm:$0xff]  ;;  %v1002_v26 = vld [vmem:[%s6157_s1 + $0x650] sm:$0xff] }
  0x82   :  { %1647 = vmatprep.subr.mxu1 %v1019_v32  ;;  %1617 = vmatpush2.msra.mxu0 %v960_v33  ;;  %v1078_v34 = vld [vmem:[%s6157_s1 + $0x8b0] sm:$0xff]  ;;  %v1077_v32 = vld [vmem:[%s6157_s1 + $0x8a8] sm:$0xff]  ;;  %v1000_v33 = vld [vmem:[%s6157_s1 + $0x640] sm:$0xff] }
  0x83   :  { %1648 = vmatpush1.msra.mxu1 %v1018_v16  ;;  %1732 = vmatprep.subr.mxu0 %v1087_v39  ;;  %v1076_v16 = vld [vmem:[%s6157_s1 + $0x8a0] sm:$0xff]  ;;  %v999_v39 = vld [vmem:[%s6157_s1 + $0x638] sm:$0xff] }
  0x84   :  { %1649 = vmatprep.subr.mxu1 %v1017_v31  ;;  %v3638_v53 = vpop.permute.xlu0 %496  ;;  %1535 = vmatprep.mubr.f32.mxu1 %v505_v44  ;;  %v998_v31 = vld [vmem:[%s6157_s1 + $0x630] sm:$0xff]  ;;  %v996_v44 = vld [vmem:[%s6157_s1 + $0x620] sm:$0xff] }
  0x85   :  { %1650 = vmatpush1.msra.mxu1 %v1016_v52  ;;  %v2456_v12 = vpop.permute.xlu1 %2455  ;;  %738 = vrot.lane.b32.xlu0 %v3650_v37, %s2630_s23  ;;  %v997_v52 = vld [vmem:[%s6157_s1 + $0x628] sm:$0xff] }
  0x86   :  { %v2458_v11 = vunpack.i.h.bf16 %v2456_v12  ;;  %v2457_v36 = vunpack.i.l.bf16 %v2456_v12  ;;  %1651 = vmatprep.subr.mxu1 %v1015_v46  ;;  %v1073_v46 = vld [vmem:[%s6157_s1 + $0x888] sm:$0xff]  ;;  %v995_v12 = vld [vmem:[%s6157_s1 + $0x618] sm:$0xff] }
  0x87   :  { %1652 = vmatpush1.msra.mxu1 %v1014_v60  ;;  %v1072_v60 = vld [vmem:[%s6157_s1 + $0x880] sm:$0xff] }
  0x88   :  { %1653 = vmatprep.subr.mxu1 %v1013_v30  ;;  %v519_v50 = vpop.permute.xlu0 %518  ;;  %v543_v38 = vsel %vm143_vm3, %v2457_v36, %v2458_v11  ;;  %v1071_v30 = vld [vmem:[%s6157_s1 + $0x878] sm:$0xff]  ;;  %v994_v11 = vld [vmem:[%s6157_s1 + $0x610] sm:$0xff] }
  0x89   :  { %1654 = vmatpush1.msra.mxu1 %v1012_v43  ;;  %v542_v6 = vsel %vm143_vm3, %v519_v50, %v2457_v36  ;;  %1618 = vmatprep.mubr.f32.mxu0 %v543_v38  ;;  %v1070_v36 = vld [vmem:[%s6157_s1 + $0x870] sm:$0xff]  ;;  %v993_v43 = vld [vmem:[%s6157_s1 + $0x608] sm:$0xff]  ;;  %v992_v50 = vld [vmem:[%s6157_s1 + $0x600] sm:$0xff] }
  0x8a   :  { %1655 = vmatprep.subr.mxu1 %v1011_v42  ;;  %1619 = vmatmul.mubr.f32.vlgmr.msra.gmra.mxu0 %v542_v6  ;;  %v1069_v42 = vld [vmem:[%s6157_s1 + $0x868] sm:$0xff]  ;;  %v1068_v38 = vld [vmem:[%s6157_s1 + $0x860] sm:$0xff]  ;;  %v2569_v6 = vpack.i.bf16 %v2835_v55, %v3449_v27 }
  0x8b   :  { %1656 = vmatpush1.msra.mxu1 %v1010_v58  ;;  %1733 = vmatpush1.msra.mxu0 %v1086_v61  ;;  %v1055_v58 = vld [vmem:[%s6157_s1 + $0x7f8] sm:$0xff]  ;;  %v1065_v55 = vld [vmem:[%s6157_s1 + $0x848] sm:$0xff] }
  0x8c   :  { %1657 = vmatprep.subr.mxu1 %v1009_v63  ;;  %1734 = vmatprep.subr.mxu0 %v1085_v23  ;;  %v1067_v61 = vld [vmem:[%s6157_s1 + $0x858] sm:$0xff]  ;;  %v1054_v63 = vld [vmem:[%s6157_s1 + $0x7f0] sm:$0xff] }
  0x8d   :  { %1658 = vmatpush1.msra.mxu1 %v1008_v0  ;;  %1735 = vmatpush1.msra.mxu0 %v1084_v2  ;;  %v1066_v23 = vld [vmem:[%s6157_s1 + $0x850] sm:$0xff]  ;;  %v1053_v0 = vld [vmem:[%s6157_s1 + $0x7e8] sm:$0xff]  ;;  %v1052_v2 = vld [vmem:[%s6157_s1 + $0x7e0] sm:$0xff] }
  0x8e   :  { %1659 = vmatprep.subr.mxu1 %v1007_v7  ;;  %1736 = vmatprep.subr.mxu0 %v1083_v8  ;;  %v1064_v7 = vld [vmem:[%s6157_s1 + $0x840] sm:$0xff]  ;;  %v1051_v8 = vld [vmem:[%s6157_s1 + $0x7d8] sm:$0xff] }
  0x8f   :  { %1660 = vmatpush1.msra.mxu1 %v1006_v13  ;;  %1737 = vmatpush1.msra.mxu0 %v1082_v45  ;;  %v1063_v13 = vld [vmem:[%s6157_s1 + $0x838] sm:$0xff]  ;;  %v1050_v45 = vld [vmem:[%s6157_s1 + $0x7d0] sm:$0xff] }
  0x90   :  { %1661 = vmatprep.subr.mxu1 %v1005_v14  ;;  %1738 = vmatprep.subr.mxu0 %v1081_v18  ;;  %v1062_v14 = vld [vmem:[%s6157_s1 + $0x830] sm:$0xff]  ;;  %v1049_v18 = vld [vmem:[%s6157_s1 + $0x7c8] sm:$0xff] }
  0x91   :  { %1662 = vmatpush1.msra.mxu1 %v1004_v20  ;;  %1739 = vmatpush1.msra.mxu0 %v1080_v59  ;;  %v1061_v20 = vld [vmem:[%s6157_s1 + $0x828] sm:$0xff]  ;;  %v1048_v59 = vld [vmem:[%s6157_s1 + $0x7c0] sm:$0xff] }
  0x92   :  { %1663 = vmatprep.subr.mxu1 %v1003_v21  ;;  %1740 = vmatprep.subr.mxu0 %v1079_v22  ;;  %v1060_v21 = vld [vmem:[%s6157_s1 + $0x820] sm:$0xff]  ;;  %v1047_v22 = vld [vmem:[%s6157_s1 + $0x7b8] sm:$0xff] }
  0x93   :  { %1664 = vmatpush1.msra.mxu1 %v1002_v26  ;;  %1741 = vmatpush1.msra.mxu0 %v1078_v34  ;;  %v1059_v26 = vld [vmem:[%s6157_s1 + $0x818] sm:$0xff]  ;;  %v1046_v34 = vld [vmem:[%s6157_s1 + $0x7b0] sm:$0xff] }
  0x94   :  { %1665 = vmatprep.subr.mxu1 %v1001_v35  ;;  %1742 = vmatprep.subr.mxu0 %v1077_v32  ;;  %v1058_v35 = vld [vmem:[%s6157_s1 + $0x810] sm:$0xff]  ;;  %v1045_v32 = vld [vmem:[%s6157_s1 + $0x7a8] sm:$0xff] }
  0x95   :  { %1666 = vmatpush1.msra.mxu1 %v1000_v33  ;;  %1743 = vmatpush1.msra.mxu0 %v1076_v16  ;;  %v2461_v33 = vpop.permute.xlu1 %2460  ;;  %v1057_v16 = vld [vmem:[%s6157_s1 + $0x808] sm:$0xff] }
  0x96   :  { %1667 = vmatprep.subr.mxu1 %v999_v39  ;;  %1744 = vmatprep.subr.mxu0 %v1075_v41  ;;  %v1044_v39 = vld [vmem:[%s6157_s1 + $0x7a0] sm:$0xff]  ;;  %v2442_v41 = vunpack.i.l.bf16 %v3587_v54 }
  0x97   :  { %1668 = vmatpush1.msra.mxu1 %v998_v31  ;;  %1745 = vmatpush1.msra.mxu0 %v1074_v19  ;;  %v1056_v31 = vld [vmem:[%s6157_s1 + $0x800] sm:$0xff]  ;;  %v1043_v19 = vld [vmem:[%s6157_s1 + $0x798] sm:$0xff] }
  0x98   :  { %1669 = vmatprep.subr.mxu1 %v997_v52  ;;  %1746 = vmatprep.subr.mxu0 %v1073_v46  ;;  %v2463_v52 = vunpack.i.h.bf16 %v2461_v33  ;;  %v2462_v46 = vunpack.i.l.bf16 %v2461_v33  ;;  %v2453_v33 = vunpack.i.h.bf16 %v3622_v15 }
  0x99   :  { %1670 = vmatpush1.msra.mxu1 %v996_v44  ;;  %1747 = vmatpush1.msra.mxu0 %v1072_v60  ;;  %v1119_v44 = vld [vmem:[%s6157_s1 + $0x9f8] sm:$0xff]  ;;  %v3870_v60 = vpop.permute.xlu0 %2465 }
  0x9a   :  { %1671 = vmatprep.subr.mxu1 %v995_v12  ;;  %1748 = vmatprep.subr.mxu0 %v1071_v30  ;;  %v1042_v12 = vld [vmem:[%s6157_s1 + $0x790] sm:$0xff] }
  0x9b   :  { %1672 = vmatpush1.msra.mxu1 %v994_v11  ;;  %1749 = vmatpush1.msra.mxu0 %v1070_v36  ;;  %v1118_v30 = vld [vmem:[%s6157_s1 + $0x9f0] sm:$0xff]  ;;  %v1041_v11 = vld [vmem:[%s6157_s1 + $0x788] sm:$0xff] }
  0x9c   :  { %1673 = vmatprep.subr.mxu1 %v993_v43  ;;  %1750 = vmatprep.subr.mxu0 %v1069_v42  ;;  %v1117_v36 = vld [vmem:[%s6157_s1 + $0x9e8] sm:$0xff]  ;;  %v2467_v42 = vunpack.i.l.bf16 %v3870_v60 }
  0x9d   :  { %1674 = vmatpush1.msra.mxu1 %v992_v50  ;;  %1751 = vmatpush1.msra.mxu0 %v1068_v38  ;;  %v3887_v43 = vld [vmem:[%s6156_s0 + $0x8] sm:$0xff]  ;;  %v504_v50 = vsel %vm90_vm2, %v2442_v41, %v2437_v3  ;;  %v1116_v38 = vld [vmem:[%s6157_s1 + $0x9e0] sm:$0xff]  ;;  %v2448_v3 = vunpack.i.h.bf16 %v3612_v47 }
  0x9e   :  { %1675 = vmatprep.subr.mxu1 %v1055_v58  ;;  %1752 = vmatprep.subr.mxu0 %v1067_v61  ;;  %v2443_v58 = vunpack.i.h.bf16 %v3587_v54  ;;  %v2447_v61 = vunpack.i.l.bf16 %v3612_v47  ;;  %v1115_v54 = vld [vmem:[%s6157_s1 + $0x9d8] sm:$0xff]  ;;  %v1033_v41 = vld [vmem:[%s6157_s1 + $0x748] sm:$0xff] }
  0x9f   :  { %2570 = vrot.lane.b32.xlu0 %v2569_v6, %s2631_s7  ;;  %1676 = vmatpush2.msra.mxu1 %v1054_v63  ;;  %v1040_v6 = vld [vmem:[%s6157_s1 + $0x780] sm:$0xff]  ;;  %v2471_v63 = vpop.permute.xlu1 %2470 }
  0xa0   :  { %1753 = vmatpush1.msra.mxu0 %v1066_v23  ;;  %1677 = vmatprep.subr.mxu1 %v1053_v0  ;;  %v545_v23 = vsel %vm143_vm3, %v2462_v46, %v2463_v52  ;;  %v2468_v0 = vunpack.i.h.bf16 %v3870_v60  ;;  %v507_v47 = vsel %vm90_vm2, %v2443_v58, %v2447_v61  ;;  %v1109_v52 = vld [vmem:[%s6157_s1 + $0x9a8] sm:$0xff]  ;;  %v4008_v61 = vld [vmem:[%s6156_s0 + $0x50] sm:$0xff] }
  0xa1   :  { %1754 = vmatprep.subr.mxu0 %v1065_v55  ;;  %1678 = vmatpush2.msra.mxu1 %v1052_v2  ;;  %v2472_v55 = vunpack.i.l.bf16 %v2471_v63  ;;  %v544_v2 = vsel %vm143_vm3, %v2467_v42, %v2462_v46  ;;  %v1032_v46 = vld [vmem:[%s6157_s1 + $0x740] sm:$0xff] }
  0xa2   :  { %1755 = vmatpush1.msra.mxu0 %v1064_v7  ;;  %1679 = vmatprep.subr.mxu1 %v1051_v8  ;;  %v1038_v7 = vld [vmem:[%s6157_s1 + $0x770] sm:$0xff] }
  0xa3   :  { %1756 = vmatprep.subr.mxu0 %v1063_v13  ;;  %2580 = vrot.lane.b32.xlu0 %v3561_v4, %s2631_s7  ;;  %v2589_v4 = vpack.i.bf16 %v3650_v37, %v3446_v9  ;;  %v1114_v8 = vld [vmem:[%s6157_s1 + $0x9d0] sm:$0xff]  ;;  %v3923_v13 = vld [vmem:[%s6156_s0 + $0x18] sm:$0xff]  ;;  %v3989_v60 = vpop.permute.xlu1 %2480 }
  0xa4   :  { %1680 = vmatpush2.msra.mxu1 %v1050_v45  ;;  %1757 = vmatpush1.msra.mxu0 %v1062_v14  ;;  %v3930_v45 = vld [vmem:[%s6156_s0 + $0x10] sm:$0xff]  ;;  %v1037_v14 = vld [vmem:[%s6157_s1 + $0x768] sm:$0xff] }
  0xa5   :  { %1681 = vmatprep.subr.mxu1 %v1049_v18  ;;  %1758 = vmatprep.subr.mxu0 %v1061_v20  ;;  %v1113_v18 = vld [vmem:[%s6157_s1 + $0x9c8] sm:$0xff]  ;;  %v2473_v20 = vunpack.i.h.bf16 %v2471_v63 }
  0xa6   :  { %1682 = vmatpush2.msra.mxu1 %v1048_v59  ;;  %1759 = vmatpush1.msra.mxu0 %v1060_v21  ;;  %v506_v59 = vsel %vm90_vm2, %v2448_v3, %v2443_v58  ;;  %v1112_v21 = vld [vmem:[%s6157_s1 + $0x9c0] sm:$0xff]  ;;  %v1106_v58 = vld [vmem:[%s6157_s1 + $0x990] sm:$0xff]  ;;  %v1029_v63 = vld [vmem:[%s6157_s1 + $0x728] sm:$0xff] }
  0xa7   :  { %1683 = vmatprep.subr.mxu1 %v1047_v22  ;;  %1760 = vmatprep.subr.mxu0 %v1059_v26  ;;  %v1036_v22 = vld [vmem:[%s6157_s1 + $0x760] sm:$0xff]  ;;  %v547_v26 = vsel %vm143_vm3, %v2468_v0, %v2472_v55  ;;  %v1027_v55 = vld [vmem:[%s6157_s1 + $0x718] sm:$0xff] }
  0xa8   :  { %2590 = vrot.lane.b32.xlu0 %v2589_v4, %s2631_s7  ;;  %1684 = vmatpush2.msra.mxu1 %v1046_v34  ;;  %v1035_v4 = vld [vmem:[%s6157_s1 + $0x758] sm:$0xff]  ;;  %v1104_v3 = vld [vmem:[%s6157_s1 + $0x980] sm:$0xff] }
  0xa9   :  { %1761 = vmatpush1.msra.mxu0 %v1058_v35  ;;  %1685 = vmatprep.subr.mxu1 %v1045_v32  ;;  %v1111_v34 = vld [vmem:[%s6157_s1 + $0x9b8] sm:$0xff]  ;;  %v546_v35 = vsel %vm143_vm3, %v2473_v20, %v2468_v0  ;;  %v1034_v32 = vld [vmem:[%s6157_s1 + $0x750] sm:$0xff]  ;;  %v1024_v20 = vld [vmem:[%s6157_s1 + $0x700] sm:$0xff] }
  0xaa   :  { %1762 = vmatprep.subr.mxu0 %v1057_v16  ;;  %1686 = vmatpush2.msra.mxu1 %v1044_v39  ;;  %v2452_v16 = vunpack.i.l.bf16 %v3622_v15  ;;  %v1110_v39 = vld [vmem:[%s6157_s1 + $0x9b0] sm:$0xff]  ;;  %v3976_v15 = vld [vmem:[%s6156_s0 + $0x20] sm:$0xff] }
  0xab   :  { %1763 = vmatpush1.msra.mxu0 %v1056_v31  ;;  %1687 = vmatprep.subr.mxu1 %v1043_v19  ;;  %v2476_v31 = vpop.permute.xlu0 %2475  ;;  %v3969_v19 = vld [vmem:[%s6156_s0 + $0x28] sm:$0xff] }
  0xac   :  { %1764 = vmatprep.subr.mxu0 %v1119_v44  ;;  %68 = vrot.lane.b32.xlu0 %v3887_v43, %s2630_s23  ;;  %v1108_v44 = vld [vmem:[%s6157_s1 + $0x9a0] sm:$0xff]  ;;  %v509_v42 = vsel %vm90_vm2, %v2452_v16, %v2453_v33  ;;  %v4094_v33 = vld [vmem:[%s6156_s0 + $0x70] sm:$0xff] }
  0xad   :  { %1688 = vmatpush2.msra.mxu1 %v1042_v12  ;;  %1765 = vmatpush2.msra.mxu0 %v1118_v30  ;;  %v1031_v12 = vld [vmem:[%s6157_s1 + $0x738] sm:$0xff]  ;;  %v2478_v30 = vunpack.i.h.bf16 %v2476_v31 }
  0xae   :  { %1689 = vmatprep.subr.mxu1 %v1041_v11  ;;  %1766 = vmatprep.subr.mxu0 %v1117_v36  ;;  %v2477_v11 = vunpack.i.l.bf16 %v2476_v31  ;;  %v1107_v36 = vld [vmem:[%s6157_s1 + $0x998] sm:$0xff] }
  0xaf   :  { %1536 = vmatmul.mubr.f32.gmra.mxu1 %v504_v50  ;;  %1767 = vmatpush2.msra.mxu0 %v1116_v38  ;;  %v2482_v50 = vunpack.i.l.bf16 %v3989_v60  ;;  %v1030_v38 = vld [vmem:[%s6157_s1 + $0x730] sm:$0xff]  ;;  %v1095_v31 = vld [vmem:[%s6157_s1 + $0x938] sm:$0xff] }
  0xb0   :  { %1690 = vmatpush2.msra.mxu1 %v1040_v6  ;;  %1624 = vmatprep.mubr.f32.mxu0 %v545_v23  ;;  %v508_v6 = vsel %vm90_vm2, %v3638_v53, %v2452_v16  ;;  %v4020_v23 = vld [vmem:[%s6156_s0 + $0x48] sm:$0xff]  ;;  %v1028_v53 = vld [vmem:[%s6157_s1 + $0x720] sm:$0xff] }
  0xb1   :  { %1691 = vmatprep.subr.mxu1 %v1039_v5  ;;  %1768 = vmatprep.subr.mxu0 %v1115_v54  ;;  %v1105_v5 = vld [vmem:[%s6157_s1 + $0x988] sm:$0xff]  ;;  %v549_v54 = vsel %vm143_vm3, %v2477_v11, %v2478_v30  ;;  %v548_v0 = vsel %vm143_vm3, %v2482_v50, %v2477_v11  ;;  %v1092_v11 = vld [vmem:[%s6157_s1 + $0x920] sm:$0xff] }
  0xb2   :  { %72 = vrot.lane.b32.xlu0 %v3923_v13, %s2630_s23  ;;  %70 = vrot.lane.b32.xlu1 %v3930_v45, %s2630_s23  ;;  %v1149_v16 = vld [vmem:[%s6157_s1 + $0xae8] sm:$0xff] }
  0xb3   :  { %1625 = vmatmul.mubr.f32.gmra.mxu0 %v544_v2  ;;  %1692 = vmatpush2.msra.mxu1 %v1038_v7  ;;  %v1103_v2 = vld [vmem:[%s6157_s1 + $0x978] sm:$0xff]  ;;  %v1026_v7 = vld [vmem:[%s6157_s1 + $0x710] sm:$0xff]  ;;  %v1145_v30 = vld [vmem:[%s6157_s1 + $0xac8] sm:$0xff] }
  0xb4   :  { %1769 = vmatpush2.msra.mxu0 %v1114_v8  ;;  %1541 = vmatprep.mubr.f32.mxu1 %v507_v47  ;;  %v1102_v8 = vld [vmem:[%s6157_s1 + $0x970] sm:$0xff]  ;;  %v1025_v47 = vld [vmem:[%s6157_s1 + $0x708] sm:$0xff] }
  0xb5   :  { %1693 = vmatprep.subr.mxu1 %v1037_v14  ;;  %1770 = vmatprep.subr.mxu0 %v1113_v18  ;;  %v4053_v14 = vld [vmem:[%s6156_s0 + $0x60] sm:$0xff]  ;;  %v1101_v18 = vld [vmem:[%s6157_s1 + $0x968] sm:$0xff] }
  0xb6   :  { %1542 = vmatmul.mubr.f32.gmra.mxu1 %v506_v59  ;;  %1771 = vmatpush2.msra.mxu0 %v1112_v21  ;;  %v4066_v59 = vld [vmem:[%s6156_s0 + $0x58] sm:$0xff]  ;;  %v1100_v21 = vld [vmem:[%s6157_s1 + $0x960] sm:$0xff] }
  0xb7   :  { %1694 = vmatpush2.msra.mxu1 %v1036_v22  ;;  %1630 = vmatprep.mubr.f32.mxu0 %v547_v26  ;;  %v1099_v22 = vld [vmem:[%s6157_s1 + $0x958] sm:$0xff] }
  0xb8   :  { %1695 = vmatprep.subr.mxu1 %v1035_v4  ;;  %1772 = vmatprep.subr.mxu0 %v1111_v34  ;;  %v1151_v26 = vld [vmem:[%s6157_s1 + $0xaf8] sm:$0xff]  ;;  %v4079_v4 = vpop.permute.xlu1 %2490  ;;  %v1098_v34 = vld [vmem:[%s6157_s1 + $0x950] sm:$0xff] }
  0xb9   :  { %76 = vrot.lane.b32.xlu0 %v3969_v19, %s2630_s23  ;;  %74 = vrot.lane.b32.xlu1 %v3976_v15, %s2630_s23 }
  0xba   :  { %1631 = vmatmul.mubr.f32.gmra.mxu0 %v546_v35  ;;  %1696 = vmatpush2.msra.mxu1 %v1034_v32  ;;  %v1150_v35 = vld [vmem:[%s6157_s1 + $0xaf0] sm:$0xff]  ;;  %v1097_v32 = vld [vmem:[%s6157_s1 + $0x948] sm:$0xff] }
  0xbb   :  { %1773 = vmatpush2.msra.mxu0 %v1110_v39  ;;  %1697 = vmatprep.subr.mxu1 %v1033_v41  ;;  %v1096_v39 = vld [vmem:[%s6157_s1 + $0x940] sm:$0xff] }
  0xbc   :  { %1774 = vmatprep.subr.mxu0 %v1109_v52  ;;  %1698 = vmatpush2.msra.mxu1 %v1032_v46  ;;  %v1148_v41 = vld [vmem:[%s6157_s1 + $0xae0] sm:$0xff]  ;;  %v4119_v52 = vpop.permute.xlu1 %2495  ;;  %v1094_v46 = vld [vmem:[%s6157_s1 + $0x930] sm:$0xff] }
  0xbd   :  { %1775 = vmatpush2.msra.mxu0 %v1108_v44  ;;  %1699 = vmatprep.subr.mxu1 %v1031_v12  ;;  %v1093_v44 = vld [vmem:[%s6157_s1 + $0x928] sm:$0xff]  ;;  %v2486_v12 = vpop.permute.xlu0 %2485 }
  0xbe   :  { %1776 = vmatprep.subr.mxu0 %v1107_v36  ;;  %80 = vrot.lane.b32.xlu0 %v4008_v61, %s2630_s23  ;;  %v1144_v36 = vld [vmem:[%s6157_s1 + $0xac0] sm:$0xff]  ;;  %v2487_v50 = vunpack.i.l.bf16 %v2486_v12 }
  0xbf   :  { %78 = vrot.lane.b32.xlu1 %v4020_v23, %s2630_s23  ;;  %1547 = vmatprep.mubr.f32.mxu1 %v509_v42  ;;  %v2488_v42 = vunpack.i.h.bf16 %v2486_v12  ;;  %v1209_v12 = vld [vmem:[%s6157_s1 + $0xcc8] sm:$0xff] }
  0xc0   :  { %1700 = vmatpush2.msra.mxu1 %v1030_v38  ;;  %1777 = vmatpush2.msra.mxu0 %v1106_v58  ;;  %v4151_v38 = vpop.permute.xlu1 %2505  ;;  %v1143_v58 = vld [vmem:[%s6157_s1 + $0xab8] sm:$0xff] }
  0xc1   :  { %1548 = vmatmul.mubr.f32.gmra.mxu1 %v508_v6  ;;  %1701 = vmatprep.subr.mxu1 %v1029_v63  ;;  %v1090_v6 = vld [vmem:[%s6157_s1 + $0x910] sm:$0xff]  ;;  %v1089_v63 = vld [vmem:[%s6157_s1 + $0x908] sm:$0xff] }
  0xc2   :  { %1778 = vmatprep.subr.mxu0 %v1105_v5  ;;  %1636 = vmatprep.mubr.f32.mxu0 %v549_v54  ;;  %v603_v5 = vpop.permute.xlu0 %602  ;;  %v1141_v54 = vld [vmem:[%s6157_s1 + $0xaa8] sm:$0xff] }
  0xc3   :  { %1702 = vmatpush2.msra.mxu1 %v1028_v53  ;;  %1779 = vmatpush2.msra.mxu0 %v1104_v3  ;;  %v1088_v53 = vld [vmem:[%s6157_s1 + $0x900] sm:$0xff]  ;;  %v627_v3 = vsel %vm90_vm2, %v2487_v50, %v2488_v42 }
  0xc4   :  { %1637 = vmatmul.mubr.f32.gmra.mxu0 %v548_v0  ;;  %1703 = vmatprep.subr.mxu1 %v1027_v55  ;;  %v1140_v0 = vld [vmem:[%s6157_s1 + $0xaa0] sm:$0xff]  ;;  %v2498_v55 = vunpack.i.h.bf16 %v4119_v52 }
  0xc5   :  { %1780 = vmatprep.subr.mxu0 %v1103_v2  ;;  %84 = vrot.lane.b32.xlu0 %v4053_v14, %s2630_s23  ;;  %v2497_v2 = vunpack.i.l.bf16 %v4119_v52  ;;  %v1208_v42 = vld [vmem:[%s6157_s1 + $0xcc0] sm:$0xff] }
  0xc6   :  { %82 = vrot.lane.b32.xlu1 %v4066_v59, %s2630_s23  ;;  %1704 = vmatpush2.msra.mxu1 %v1026_v7  ;;  %v626_v7 = vsel %vm90_vm2, %v603_v5, %v2487_v50 }
  0xc7   :  { %1781 = vmatpush2.msra.mxu0 %v1102_v8  ;;  %1705 = vmatprep.subr.mxu1 %v1025_v47  ;;  %v2516_v8 = vpop.permute.xlu1 %2515  ;;  %v1139_v47 = vld [vmem:[%s6157_s1 + $0xa98] sm:$0xff] }
  0xc8   :  { %1782 = vmatprep.subr.mxu0 %v1101_v18  ;;  %1706 = vmatpush2.msra.mxu1 %v1024_v20  ;;  %v1214_v18 = vld [vmem:[%s6157_s1 + $0xcf0] sm:$0xff]  ;;  %v2507_v20 = vunpack.i.l.bf16 %v4151_v38 }
  0xc9   :  { %1707 = vmatprep.mubr.f32.mxu1 %v2886_v10  ;;  %1783 = vmatpush2.msra.mxu0 %v1100_v21  ;;  %v4101_v10 = vld [vmem:[%s6156_s0 + $0x68] sm:$0xff] }
  0xca   :  { %1784 = vmatprep.subr.mxu0 %v1099_v22  ;;  %1821 = vmatprep.subr.mxu1 %v1151_v26  ;;  %v1213_v21 = vld [vmem:[%s6157_s1 + $0xce8] sm:$0xff]  ;;  %v629_v26 = vsel %vm90_vm2, %v2497_v2, %v2498_v55 }
  0xcb   :  { %88 = vrot.lane.b32.xlu0 %v4094_v33, %s2630_s23  ;;  %86 = vrot.lane.b32.xlu1 %v4101_v10, %s2630_s23  ;;  %v1137_v22 = vld [vmem:[%s6157_s1 + $0xa88] sm:$0xff] }
  0xcc   :  { %1708 = vmatmul.mubr.f32.vlgmr.msra.gmra.mxu1 %v2956_v40  ;;  %1785 = vmatpush2.msra.mxu0 %v1098_v34  ;;  %v1147_v40 = vld [vmem:[%s6157_s1 + $0xad8] sm:$0xff]  ;;  %v1136_v34 = vld [vmem:[%s6157_s1 + $0xa80] sm:$0xff]  ;;  %v1205_v55 = vld [vmem:[%s6157_s1 + $0xca8] sm:$0xff] }
  0xcd   :  { %1822 = vmatpush1.msra.mxu1 %v1150_v35  ;;  %1786 = vmatprep.subr.mxu0 %v1097_v32  ;;  %v1212_v35 = vld [vmem:[%s6157_s1 + $0xce0] sm:$0xff]  ;;  %v2179_v32 = vlaneseq }
  0xce   :  { %1823 = vmatprep.subr.mxu1 %v1149_v16  ;;  %1713 = vmatprep.mubr.f32.mxu1 %v3002_v1  ;;  %v1146_v1 = vld [vmem:[%s6157_s1 + $0xad0] sm:$0xff]  ;;  %v2508_v16 = vunpack.i.h.bf16 %v4151_v38 }
  0xcf   :  { %1787 = vmatpush2.msra.mxu0 %v1096_v39  ;;  %1824 = vmatpush1.msra.mxu1 %v1148_v41  ;;  %v1211_v39 = vld [vmem:[%s6157_s1 + $0xcd8] sm:$0xff]  ;;  %v2526_v41 = vpop.permute.xlu1 %2525 }
  0xd0   :  { %1788 = vmatprep.subr.mxu0 %v1095_v31  ;;  %121 = vrot.lane.b32.xlu0 %v3887_v43, %s2631_s7  ;;  %v628_v31 = vsel %vm90_vm2, %v2507_v20, %v2497_v2  ;;  %v2528_v50 = vunpack.i.h.bf16 %v2526_v41  ;;  %v2527_v38 = vunpack.i.l.bf16 %v2526_v41  ;;  %v1129_v2 = vld [vmem:[%s6157_s1 + $0xa48] sm:$0xff]  ;;  %v1203_v20 = vld [vmem:[%s6157_s1 + $0xc98] sm:$0xff] }
  0xd1   :  { %119 = vrot.lane.b32.xlu1 %v3655_v24, %s2631_s7  ;;  %1714 = vmatmul.mubr.f32.gmra.mxu1 %v3056_v28  ;;  %v1091_v28 = vld [vmem:[%s6157_s1 + $0x918] sm:$0xff] }
  0xd2   :  { %1825 = vmatprep.subr.mxu1 %v1147_v40  ;;  %1789 = vmatpush2.msra.mxu0 %v1094_v46  ;;  %v1135_v40 = vld [vmem:[%s6157_s1 + $0xa78] sm:$0xff]  ;;  %v1210_v46 = vld [vmem:[%s6157_s1 + $0xcd0] sm:$0xff] }
  0xd3   :  { %1826 = vmatpush1.msra.mxu1 %v1146_v1  ;;  %1790 = vmatprep.subr.mxu0 %v1093_v44  ;;  %v2518_v1 = vunpack.i.h.bf16 %v2516_v8  ;;  %v1134_v44 = vld [vmem:[%s6157_s1 + $0xa70] sm:$0xff] }
  0xd4   :  { %1827 = vmatprep.subr.mxu1 %v1145_v30  ;;  %1719 = vmatprep.mubr.f32.mxu1 %v3061_v29  ;;  %v1142_v29 = vld [vmem:[%s6157_s1 + $0xab0] sm:$0xff]  ;;  %v4220_v52 = vpop.permute.xlu0 %2500  ;;  %v4236_v30 = vshrl.u32 %v2179_v32, 7  ;;  %v1201_v32 = vld [vmem:[%s6157_s1 + $0xc88] sm:$0xff] }
  0xd5   :  { %1791 = vmatpush2.msra.mxu0 %v1092_v11  ;;  %1828 = vmatpush1.msra.mxu1 %v1144_v36  ;;  %v1133_v11 = vld [vmem:[%s6157_s1 + $0xa68] sm:$0xff] }
  0xd6   :  { %1792 = vmatprep.subr.mxu0 %v1091_v28  ;;  %125 = vrot.lane.b32.xlu0 %v3923_v13, %s2631_s7  ;;  %6228 = vst [vmem:[#allocation2_spill] sm:$0xff] %v4236_v30  ;;  %v1132_v28 = vld [vmem:[%s6157_s1 + $0xa60] sm:$0xff] }
  0xd7   :  { %123 = vrot.lane.b32.xlu1 %v3930_v45, %s2631_s7  ;;  %1720 = vmatmul.mubr.f32.gmra.mxu1 %v3119_v57  ;;  %v1215_v57 = vld [vmem:[%s6157_s1 + $0xcf8] sm:$0xff] }
  0xd8   :  { %1829 = vmatprep.subr.mxu1 %v1143_v58  ;;  %1793 = vmatpush2.msra.mxu0 %v1090_v6  ;;  %v1207_v58 = vld [vmem:[%s6157_s1 + $0xcb8] sm:$0xff]  ;;  %v4253_v6 = vpop.permute.xlu1 %2535 }
  0xd9   :  { %1830 = vmatpush1.msra.mxu1 %v1142_v29  ;;  %1794 = vmatprep.subr.mxu0 %v1089_v63  ;;  %v630_v29 = vsel %vm90_vm2, %v2518_v1, %v2508_v16  ;;  %v6163_v63 = vsub.s32 0, %v4236_v30  ;;  %v4257_v5 = vpop.permute.xlu0 %2510  ;;  %v1123_v1 = vld [vmem:[%s6157_s1 + $0xa18] sm:$0xff] }
  0xda   :  { %1831 = vmatprep.subr.mxu1 %v1141_v54  ;;  %1725 = vmatprep.mubr.f32.mxu1 %v3166_v17  ;;  %v1138_v17 = vld [vmem:[%s6157_s1 + $0xa90] sm:$0xff]  ;;  %v1131_v54 = vld [vmem:[%s6157_s1 + $0xa58] sm:$0xff] }
  0xdb   :  { %1795 = vmatpush2.msra.mxu0 %v1088_v53  ;;  %1796 = vmatprep.mubr.f32.mxu0 %v627_v3  ;;  %v1206_v53 = vld [vmem:[%s6157_s1 + $0xcb0] sm:$0xff]  ;;  %v2197_v3 = vld [vmem:[%s6158_s3] sm:$0x3] }
  0xdc   :  { %1832 = vmatpush1.msra.mxu1 %v1140_v0  ;;  %1910 = vmatprep.subr.mxu0 %v1215_v57  ;;  %v2537_v0 = vunpack.i.l.bf16 %v4253_v6  ;;  %v1130_v57 = vld [vmem:[%s6157_s1 + $0xa50] sm:$0xff] }
  0xdd   :  { %129 = vrot.lane.b32.xlu0 %v3969_v19, %s2631_s7  ;;  %1797 = vmatmul.mubr.f32.vlgmr.msra.gmra.mxu0 %v626_v7  ;;  %v633_v7 = vsel %vm90_vm2, %v2527_v38, %v2528_v50 }
  0xde   :  { %127 = vrot.lane.b32.xlu1 %v3976_v15, %s2631_s7  ;;  %1726 = vmatmul.mubr.f32.gmra.mxu1 %v3211_v48  ;;  %v2517_v48 = vunpack.i.l.bf16 %v2516_v8  ;;  %v1128_v8 = vld [vmem:[%s6157_s1 + $0xa40] sm:$0xff] }
  0xdf   :  { %1833 = vmatprep.subr.mxu1 %v1139_v47  ;;  %1911 = vmatpush1.msra.mxu0 %v1214_v18  ;;  %v1204_v47 = vld [vmem:[%s6157_s1 + $0xca0] sm:$0xff]  ;;  %v2202_v18 = vrot.slane %v2197_v3, %v6163_v63 }
  0xe0   :  { %1834 = vmatpush1.msra.mxu1 %v1138_v17  ;;  %1912 = vmatprep.subr.mxu0 %v1213_v21  ;;  %v631_v36 = vsel %vm90_vm2, %v2508_v16, %v2517_v48  ;;  %v632_v17 = vsel %vm90_vm2, %v2537_v0, %v2527_v38  ;;  %v6162_v21 = vsub.s32 1, %v4236_v30  ;;  %v1125_v16 = vld [vmem:[%s6157_s1 + $0xa28] sm:$0xff]  ;;  %v1200_v48 = vld [vmem:[%s6157_s1 + $0xc80] sm:$0xff]  ;;  %v1195_v38 = vld [vmem:[%s6157_s1 + $0xc58] sm:$0xff]  ;;  %v215_v0 = vrot.slane %v3930_v45, 1 }
  0xe1   :  { %1835 = vmatprep.subr.mxu1 %v1137_v22  ;;  %1802 = vmatprep.mubr.f32.mxu0 %v629_v26  ;;  %v4296_v22 = vpop.permute.xlu0 %2520  ;;  %v1127_v26 = vld [vmem:[%s6157_s1 + $0xa38] sm:$0xff]  ;;  %v1181_v45 = vld [vmem:[%s6157_s1 + $0xbe8] sm:$0xff] }
  0xe2   :  { %1836 = vmatpush1.msra.mxu1 %v1136_v34  ;;  %1913 = vmatpush1.msra.mxu0 %v1212_v35  ;;  %v1202_v34 = vld [vmem:[%s6157_s1 + $0xc90] sm:$0xff]  ;;  %v2206_v41 = vrot.slane %v2197_v3, %v6162_v21 }
  0xe3   :  { %133 = vrot.lane.b32.xlu0 %v4008_v61, %s2631_s7  ;;  %1914 = vmatprep.subr.mxu0 %v1211_v39  ;;  %v1126_v35 = vld [vmem:[%s6157_s1 + $0xa30] sm:$0xff]  ;;  %v1124_v39 = vld [vmem:[%s6157_s1 + $0xa20] sm:$0xff] }
  0xe4   :  { %131 = vrot.lane.b32.xlu1 %v4020_v23, %s2631_s7  ;;  %1803 = vmatmul.mubr.f32.gmra.mxu0 %v628_v31  ;;  %v1199_v31 = vld [vmem:[%s6157_s1 + $0xc78] sm:$0xff]  ;;  %v1194_v3 = vld [vmem:[%s6157_s1 + $0xc50] sm:$0xff] }
  0xe5   :  { %1837 = vmatprep.subr.mxu1 %v1135_v40  ;;  %1915 = vmatpush1.msra.mxu0 %v1210_v46  ;;  %v176_v40 = vrot.slane %v3887_v43, 1  ;;  %v177_v46 = vrot.slane %v3976_v15, 1  ;;  %v1122_v43 = vld [vmem:[%s6157_s1 + $0xa10] sm:$0xff]  ;;  %v184_v15 = vrot.slane %v4053_v14, 1 }
  0xe6   :  { %1838 = vmatpush1.msra.mxu1 %v1134_v44  ;;  %1916 = vmatprep.subr.mxu0 %v1209_v12  ;;  %v1198_v44 = vld [vmem:[%s6157_s1 + $0xc70] sm:$0xff]  ;;  %v173_v12 = vrot.slane %v3655_v24, 1  ;;  %v1121_v24 = vld [vmem:[%s6157_s1 + $0xa08] sm:$0xff] }
  0xe7   :  { %1839 = vmatprep.subr.mxu1 %v1133_v11  ;;  %1808 = vmatprep.mubr.f32.mxu0 %v631_v36  ;;  %v174_v11 = vrot.slane %v3923_v13, 1  ;;  %v4336_v36 = vpop.permute.xlu0 %2530  ;;  %v1196_v13 = vld [vmem:[%s6157_s1 + $0xc60] sm:$0xff]  ;;  %v4358_v50 = vsel %vm172_vm1, %v176_v40, %v177_v46 }
  0xe8   :  { %1840 = vmatpush1.msra.mxu1 %v1132_v28  ;;  %1917 = vmatpush1.msra.mxu0 %v1208_v42  ;;  %v1197_v28 = vld [vmem:[%s6157_s1 + $0xc68] sm:$0xff]  ;;  %v1120_v42 = vld [vmem:[%s6157_s1 + $0xa00] sm:$0xff] }
  0xe9   :  { %137 = vrot.lane.b32.xlu0 %v4053_v14, %s2631_s7  ;;  %1918 = vmatprep.subr.mxu0 %v1207_v58  ;;  %v4364_v58 = vsel %vm172_vm1, %v173_v12, %v174_v11  ;;  %v1188_v40 = vld [vmem:[%s6157_s1 + $0xc20] sm:$0xff] }
  0xea   :  { %135 = vrot.lane.b32.xlu1 %v4066_v59, %s2631_s7  ;;  %1809 = vmatmul.mubr.f32.gmra.mxu0 %v630_v29  ;;  %v4369_v29 = vld [vmem:[%s6156_s0 + $0x30] sm:$0x3]  ;;  %v1184_v14 = vld [vmem:[%s6157_s1 + $0xc00] sm:$0xff] }
  0xeb   :  { %1841 = vmatprep.subr.mxu1 %v1131_v54  ;;  %1919 = vmatpush1.msra.mxu0 %v1206_v53  ;;  %v179_v54 = vrot.slane %v4369_v29, 1  ;;  %v1183_v53 = vld [vmem:[%s6157_s1 + $0xbf8] sm:$0xff] }
  0xec   :  { %1842 = vmatpush1.msra.mxu1 %v1130_v57  ;;  %1920 = vmatprep.subr.mxu0 %v1205_v55  ;;  %v216_v57 = vrot.slane %v3969_v19, 1  ;;  %v1182_v55 = vld [vmem:[%s6157_s1 + $0xbf0] sm:$0xff]  ;;  %v1192_v19 = vld [vmem:[%s6157_s1 + $0xc40] sm:$0xff] }
  0xed   :  { %1843 = vmatprep.subr.mxu1 %v1129_v2  ;;  %1814 = vmatprep.mubr.f32.mxu0 %v633_v7  ;;  %v1193_v2 = vld [vmem:[%s6157_s1 + $0xc48] sm:$0xff]  ;;  %v4388_v7 = vpop.permute.xlu0 %660 }
  0xee   :  { %1844 = vmatpush1.msra.mxu1 %v1128_v8  ;;  %1921 = vmatpush1.msra.mxu0 %v1204_v47  ;;  %v4398_v8 = vpop.permute.xlu1 %2540  ;;  %v1180_v47 = vld [vmem:[%s6157_s1 + $0xbe0] sm:$0xff] }
  0xef   :  { %2207 = vrot.lane.b32.xlu0 %v2202_v18, %s2632_s12  ;;  %1922 = vmatprep.subr.mxu0 %v1203_v20  ;;  %v4404_v18 = vsel %vm172_vm1, %v174_v11, %v179_v54  ;;  %v1191_v20 = vld [vmem:[%s6157_s1 + $0xc38] sm:$0xff]  ;;  %v183_v54 = vrot.slane %v4020_v23, 1  ;;  %v1173_v23 = vld [vmem:[%s6157_s1 + $0xba8] sm:$0xff] }
  0xf0   :  { %139 = vrot.lane.b32.xlu1 %v4101_v10, %s2631_s7  ;;  %1815 = vmatmul.mubr.f32.gmra.mxu0 %v632_v17  ;;  %v4410_v17 = vsel %vm172_vm1, %v215_v0, %v216_v57 }
  0xf1   :  { %1845 = vmatprep.subr.mxu1 %v1127_v26  ;;  %1923 = vmatpush1.msra.mxu0 %v1202_v34  ;;  %v4415_v26 = vld [vmem:[%s6156_s0 + $0x40] sm:$0x3] }
  0xf2   :  { %1846 = vmatpush1.msra.mxu1 %v1126_v35  ;;  %1924 = vmatprep.subr.mxu0 %v1201_v32  ;;  %v218_v34 = vrot.slane %v4415_v26, 1  ;;  %v1179_v35 = vld [vmem:[%s6157_s1 + $0xbd8] sm:$0xff]  ;;  %v1190_v32 = vld [vmem:[%s6157_s1 + $0xc30] sm:$0xff]  ;;  %v4454_v11 = vpop.permute.xlu1 %2550 }
  0xf3   :  { %1847 = vmatprep.subr.mxu1 %v1125_v16  ;;  %1925 = vmatpush1.msra.mxu0 %v1200_v48  ;;  %v4427_v16 = vld [vmem:[%s6156_s0 + $0x38] sm:$0x3] }
  0xf4   :  { %1848 = vmatpush1.msra.mxu1 %v1124_v39  ;;  %141 = vrot.lane.b32.xlu0 %v4094_v33, %s2631_s7  ;;  %v181_v48 = vrot.slane %v4427_v16, 1  ;;  %v1178_v39 = vld [vmem:[%s6157_s1 + $0xbd0] sm:$0xff]  ;;  %v4452_v12 = vsel %vm172_vm1, %v216_v57, %v218_v34  ;;  %v1247_v57 = vld [vmem:[%s6157_s1 + $0xdf8] sm:$0xff]  ;;  %v220_v34 = vrot.slane %v4066_v59, 1  ;;  %v1169_v59 = vld [vmem:[%s6157_s1 + $0xb88] sm:$0xff] }
  0xf5   :  { %1926 = vmatprep.subr.mxu0 %v1199_v31  ;;  %2209 = vrot.lane.b32.xlu1 %v2206_v41, %s2632_s12  ;;  %v1189_v41 = vld [vmem:[%s6157_s1 + $0xc28] sm:$0xff] }
  0xf6   :  { %1849 = vmatprep.subr.mxu1 %v1123_v1  ;;  %1927 = vmatpush1.msra.mxu0 %v1198_v44  ;;  %v1177_v31 = vld [vmem:[%s6157_s1 + $0xbc8] sm:$0xff]  ;;  %v4446_v1 = vpop.permute.xlu0 %2545  ;;  %v1176_v44 = vld [vmem:[%s6157_s1 + $0xbc0] sm:$0xff] }
  0xf7   :  { %1850 = vmatpush1.msra.mxu1 %v1122_v43  ;;  %1928 = vmatprep.subr.mxu0 %v1197_v28  ;;  %v1187_v43 = vld [vmem:[%s6157_s1 + $0xc18] sm:$0xff]  ;;  %v4462_v28 = vsel %vm172_vm1, %v177_v46, %v181_v48  ;;  %v1185_v46 = vld [vmem:[%s6157_s1 + $0xc08] sm:$0xff] }
  0xf8   :  { %1851 = vmatprep.subr.mxu1 %v1121_v24  ;;  %1929 = vmatpush1.msra.mxu0 %v1196_v13  ;;  %v186_v24 = vrot.slane %v4008_v61, 1  ;;  %v187_v13 = vrot.slane %v4101_v10, 1  ;;  %v1174_v61 = vld [vmem:[%s6157_s1 + $0xbb0] sm:$0xff]  ;;  %v1245_v48 = vld [vmem:[%s6157_s1 + $0xde8] sm:$0xff] }
  0xf9   :  { %1852 = vmatpush1.msra.mxu1 %v1120_v42  ;;  %227 = vrot.lane.b32.xlu0 %v4358_v50, %s2630_s23  ;;  %v1175_v42 = vld [vmem:[%s6157_s1 + $0xbb8] sm:$0xff]  ;;  %v1162_v10 = vld [vmem:[%s6157_s1 + $0xb50] sm:$0xff] }
  0xfa   :  { %1930 = vmatprep.subr.mxu0 %v1195_v38  ;;  %225 = vrot.lane.b32.xlu1 %v4364_v58, %s2630_s23  ;;  %v1186_v38 = vld [vmem:[%s6157_s1 + $0xc10] sm:$0xff]  ;;  %v4498_v0 = vpop.permute.xlu0 %2555 }
  0xfb   :  { %1853 = vmatprep.subr.mxu1 %v1183_v53  ;;  %1931 = vmatpush1.msra.mxu0 %v1194_v3  ;;  %v1172_v53 = vld [vmem:[%s6157_s1 + $0xba0] sm:$0xff]  ;;  %v4496_v3 = vsel %vm172_vm1, %v186_v24, %v187_v13 }
  0xfc   :  { %1854 = vmatpush2.msra.mxu1 %v1182_v55  ;;  %1932 = vmatprep.subr.mxu0 %v1193_v2  ;;  %v4504_v55 = vsel %vm172_vm1, %v183_v54, %v184_v15  ;;  %v4509_v2 = vld [vmem:[%s6156_s0 + $0x78] sm:$0x3]  ;;  %v4567_v54 = vld [vmem:[%s6156_s0 + $0x80] sm:$0x3] }
  0xfd   :  { %1855 = vmatprep.subr.mxu1 %v1181_v45  ;;  %1933 = vmatpush1.msra.mxu0 %v1192_v19  ;;  %v189_v45 = vrot.slane %v4509_v2, 1  ;;  %v4512_v19 = vpop.permute.xlu1 %2560 }
  0xfe   :  { %1856 = vmatpush2.msra.mxu1 %v1180_v47  ;;  %231 = vrot.lane.b32.xlu0 %v4404_v18, %s2630_s23  ;;  %v1171_v47 = vld [vmem:[%s6157_s1 + $0xb98] sm:$0xff]  ;;  %v4556_v24 = vpop.permute.xlu0 %738 }
  0xff   :  { %1934 = vmatprep.subr.mxu0 %v1191_v20  ;;  %229 = vrot.lane.b32.xlu1 %v4410_v17, %s2630_s23  ;;  %v1246_v20 = vld [vmem:[%s6157_s1 + $0xdf0] sm:$0xff] }
 0x100   :  { %1857 = vmatprep.subr.mxu1 %v1179_v35  ;;  %1935 = vmatpush1.msra.mxu0 %v1190_v32  ;;  %v221_v35 = vrot.slane %v4094_v33, 1  ;;  %v1170_v32 = vld [vmem:[%s6157_s1 + $0xb90] sm:$0xff]  ;;  %v1244_v33 = vld [vmem:[%s6157_s1 + $0xde0] sm:$0xff] }
 0x101   :  { %1858 = vmatpush2.msra.mxu1 %v1178_v39  ;;  %1936 = vmatprep.subr.mxu0 %v1189_v41  ;;  %v1168_v39 = vld [vmem:[%s6157_s1 + $0xb80] sm:$0xff]  ;;  %v4542_v41 = vsel %vm172_vm1, %v184_v15, %v189_v45  ;;  %v191_v15 = vrot.slane %v4567_v54, 1 }
 0x102   :  { %1859 = vmatprep.subr.mxu1 %v1177_v31  ;;  %1937 = vmatpush1.msra.mxu0 %v1188_v40  ;;  %6229 = vst [vmem:[#allocation3_spill] sm:$0xff] %v4542_v41  ;;  %v1243_v31 = vld [vmem:[%s6157_s1 + $0xdd8] sm:$0xff]  ;;  %v4548_v40 = vsel %vm172_vm1, %v220_v34, %v221_v35 }
 0x103   :  { %1860 = vmatpush2.msra.mxu1 %v1176_v44  ;;  %235 = vrot.lane.b32.xlu0 %v4452_v12, %s2630_s23  ;;  %v4553_v44 = vld [vmem:[%s6156_s0 + $0x88] sm:$0x3]  ;;  %v1163_v34 = vld [vmem:[%s6157_s1 + $0xb58] sm:$0xff] }
 0x104   :  { %1938 = vmatprep.subr.mxu0 %v1187_v43  ;;  %233 = vrot.lane.b32.xlu1 %v4462_v28, %s2630_s23  ;;  %v223_v43 = vrot.slane %v4553_v44, 1 }
 0x105   :  { %1861 = vmatprep.subr.mxu1 %v1175_v42  ;;  %1939 = vmatpush1.msra.mxu0 %v1186_v38  ;;  %v1167_v42 = vld [vmem:[%s6157_s1 + $0xb78] sm:$0xff]  ;;  %v1242_v38 = vld [vmem:[%s6157_s1 + $0xdd0] sm:$0xff] }
 0x106   :  { %1862 = vmatpush2.msra.mxu1 %v1174_v61  ;;  %1940 = vmatprep.subr.mxu0 %v1185_v46  ;;  %v4570_v61 = vpop.permute.xlu1 %2565  ;;  %v1166_v46 = vld [vmem:[%s6157_s1 + $0xb70] sm:$0xff]  ;;  %v4592_v45 = vsel %vm172_vm1, %v221_v35, %v223_v43 }
 0x107   :  { %1863 = vmatprep.subr.mxu1 %v1173_v23  ;;  %1941 = vmatpush1.msra.mxu0 %v1184_v14  ;;  %v1241_v23 = vld [vmem:[%s6157_s1 + $0xdc8] sm:$0xff]  ;;  %v1238_v35 = vld [vmem:[%s6157_s1 + $0xdb0] sm:$0xff] }
 0x108   :  { %1864 = vmatpush2.msra.mxu1 %v1172_v53  ;;  %239 = vrot.lane.b32.xlu0 %v4496_v3, %s2630_s23  ;;  %v1165_v14 = vld [vmem:[%s6157_s1 + $0xb68] sm:$0xff]  ;;  %v1240_v53 = vld [vmem:[%s6157_s1 + $0xdc0] sm:$0xff] }
 0x109   :  { %1942 = vmatprep.subr.mxu0 %v1247_v57  ;;  %237 = vrot.lane.b32.xlu1 %v4504_v55, %s2630_s23  ;;  %v1164_v57 = vld [vmem:[%s6157_s1 + $0xb60] sm:$0xff] }
 0x10a   :  { %1865 = vmatprep.subr.mxu1 %v1171_v47  ;;  %1943 = vmatpush2.msra.mxu0 %v1246_v20  ;;  %v1239_v47 = vld [vmem:[%s6157_s1 + $0xdb8] sm:$0xff]  ;;  %v4600_v20 = vsel %vm172_vm1, %v187_v13, %v191_v15  ;;  %v1237_v13 = vld [vmem:[%s6157_s1 + $0xda8] sm:$0xff]  ;;  %v2483_v15 = vunpack.i.h.bf16 %v3989_v60 }
 0x10b   :  { %1866 = vmatpush2.msra.mxu1 %v1170_v32  ;;  %1944 = vmatprep.subr.mxu0 %v1245_v48  ;;  %6230 = vst [vmem:[#allocation4_spill] sm:$0xff] %v4600_v20  ;;  %v4618_v48 = vpop.permute.xlu1 %2575  ;;  %v1157_v60 = vld [vmem:[%s6157_s1 + $0xb28] sm:$0xff] }
 0x10c   :  { %1867 = vmatprep.subr.mxu1 %v1169_v59  ;;  %1945 = vmatpush2.msra.mxu0 %v1244_v33  ;;  %6231 = vst [vmem:[#allocation5_spill] sm:$0xff] %v4618_v48  ;;  %v1161_v59 = vld [vmem:[%s6157_s1 + $0xb48] sm:$0xff]  ;;  %v1236_v33 = vld [vmem:[%s6157_s1 + $0xda0] sm:$0xff] }
 0x10d   :  { %1868 = vmatpush2.msra.mxu1 %v1168_v39  ;;  %243 = vrot.lane.b32.xlu0 %v4542_v41, %s2630_s23  ;;  %v1160_v39 = vld [vmem:[%s6157_s1 + $0xb40] sm:$0xff] }
 0x10e   :  { %1946 = vmatprep.subr.mxu0 %v1243_v31  ;;  %241 = vrot.lane.b32.xlu1 %v4548_v40, %s2630_s23  ;;  %v1235_v31 = vld [vmem:[%s6157_s1 + $0xd98] sm:$0xff] }
 0x10f   :  { %1869 = vmatprep.subr.mxu1 %v1167_v42  ;;  %1947 = vmatpush2.msra.mxu0 %v1242_v38  ;;  %v1159_v42 = vld [vmem:[%s6157_s1 + $0xb38] sm:$0xff]  ;;  %v1234_v38 = vld [vmem:[%s6157_s1 + $0xd90] sm:$0xff] }
 0x110   :  { %1870 = vmatpush2.msra.mxu1 %v1166_v46  ;;  %1948 = vmatprep.subr.mxu0 %v1241_v23  ;;  %v2492_v46 = vunpack.i.l.bf16 %v4079_v4  ;;  %v1158_v23 = vld [vmem:[%s6157_s1 + $0xb30] sm:$0xff] }
 0x111   :  { %1871 = vmatprep.subr.mxu1 %v1165_v14  ;;  %1949 = vmatpush2.msra.mxu0 %v1240_v53  ;;  %v4608_v32 = vpop.permute.xlu0 %2570  ;;  %v1233_v14 = vld [vmem:[%s6157_s1 + $0xd88] sm:$0xff]  ;;  %v1232_v53 = vld [vmem:[%s6157_s1 + $0xd80] sm:$0xff] }
 0x112   :  { %1872 = vmatpush2.msra.mxu1 %v1164_v57  ;;  %247 = vrot.lane.b32.xlu0 %v4592_v45, %s2630_s23  ;;  %v4660_v57 = vpop.permute.xlu1 %2585 }
 0x113   :  { %1950 = vmatprep.subr.mxu0 %v1239_v47  ;;  %245 = vrot.lane.b32.xlu1 %v4600_v20, %s2630_s23  ;;  %6233 = vst [vmem:[#allocation7_spill] sm:$0xff] %v4660_v57  ;;  %v1156_v47 = vld [vmem:[%s6157_s1 + $0xb20] sm:$0xff] }
 0x114   :  { %1873 = vmatprep.subr.mxu1 %v1163_v34  ;;  %1951 = vmatpush2.msra.mxu0 %v1238_v35  ;;  %v1231_v34 = vld [vmem:[%s6157_s1 + $0xd78] sm:$0xff] }
 0x115   :  { %1874 = vmatpush2.msra.mxu1 %v1162_v10  ;;  %1952 = vmatprep.subr.mxu0 %v1237_v13  ;;  %v4634_v43 = vpop.permute.xlu0 %2580  ;;  %v1155_v10 = vld [vmem:[%s6157_s1 + $0xb18] sm:$0xff]  ;;  %v667_v13 = vsel %vm143_vm3, %v2483_v15, %v2492_v46 }
 0x116   :  { %6232 = vst [vmem:[#allocation6_spill] sm:$0xff] %v4634_v43  ;;  %1875 = vmatprep.subr.mxu1 %v1161_v59  ;;  %1953 = vmatpush2.msra.mxu0 %v1236_v33  ;;  %v1154_v59 = vld [vmem:[%s6157_s1 + $0xb10] sm:$0xff] }
 0x117   :  { %1876 = vmatpush2.msra.mxu1 %v1160_v39  ;;  %277 = vrot.lane.b32.xlu0 %v4358_v50, %s2631_s7  ;;  %v1230_v33 = vld [vmem:[%s6157_s1 + $0xd70] sm:$0xff]  ;;  %v1229_v39 = vld [vmem:[%s6157_s1 + $0xd68] sm:$0xff] }
 0x118   :  { %1954 = vmatprep.subr.mxu0 %v1235_v31  ;;  %275 = vrot.lane.b32.xlu1 %v4364_v58, %s2631_s7  ;;  %v1153_v31 = vld [vmem:[%s6157_s1 + $0xb08] sm:$0xff] }
 0x119   :  { %1877 = vmatprep.subr.mxu1 %v1159_v42  ;;  %1955 = vmatpush2.msra.mxu0 %v1234_v38  ;;  %v2493_v42 = vunpack.i.h.bf16 %v4079_v4  ;;  %v1152_v38 = vld [vmem:[%s6157_s1 + $0xb00] sm:$0xff]  ;;  %v1227_v4 = vld [vmem:[%s6157_s1 + $0xd58] sm:$0xff] }
 0x11a   :  { %1878 = vmatpush2.msra.mxu1 %v1158_v23  ;;  %1956 = vmatprep.subr.mxu0 %v1233_v14  ;;  %v4668_v35 = vpop.permute.xlu0 %2590  ;;  %v67_v23 = vpop.permute.xlu1 %66  ;;  %v2503_v14 = vunpack.i.h.bf16 %v4220_v52 }
 0x11b   :  { %6234 = vst [vmem:[#allocation8_spill] sm:$0xff] %v4668_v35  ;;  %1879 = vmatprep.subr.mxu1 %v1157_v60  ;;  %1957 = vmatpush2.msra.mxu0 %v1232_v53  ;;  %v2502_v60 = vunpack.i.l.bf16 %v4220_v52  ;;  %v1226_v52 = vld [vmem:[%s6157_s1 + $0xd50] sm:$0xff]  ;;  %v2593_v21 = vunpack.i.h.bf16 %v4668_v35 }
 0x11c   :  { %1880 = vmatpush2.msra.mxu1 %v1156_v47  ;;  %281 = vrot.lane.b32.xlu0 %v4404_v18, %s2631_s7  ;;  %v1279_v47 = vld [vmem:[%s6157_s1 + $0xef8] sm:$0xff] }
 0x11d   :  { %1958 = vmatprep.subr.mxu0 %v1231_v34  ;;  %279 = vrot.lane.b32.xlu1 %v4410_v17, %s2631_s7  ;;  %v1228_v17 = vld [vmem:[%s6157_s1 + $0xd60] sm:$0xff]  ;;  %v2512_v34 = vunpack.i.l.bf16 %v4257_v5 }
 0x11e   :  { %1881 = vmatprep.subr.mxu1 %v1155_v10  ;;  %1885 = vmatprep.mubr.f32.mxu1 %v667_v13  ;;  %v69_v46 = vpop.permute.xlu0 %68  ;;  %v666_v10 = vsel %vm143_vm3, %v2493_v42, %v2483_v15  ;;  %v1278_v13 = vld [vmem:[%s6157_s1 + $0xef0] sm:$0xff]  ;;  %v1224_v15 = vld [vmem:[%s6157_s1 + $0xd40] sm:$0xff]  ;;  %v2513_v42 = vunpack.i.h.bf16 %v4257_v5  ;;  %v1275_v5 = vld [vmem:[%s6157_s1 + $0xed8] sm:$0xff] }
 0x11f   :  { %1882 = vmatpush2.msra.mxu1 %v1154_v59  ;;  %1959 = vmatpush2.msra.mxu0 %v1230_v33  ;;  %v4703_v53 = vsel %vm90_vm2, %v67_v23, %v69_v46  ;;  %v1225_v59 = vld [vmem:[%s6157_s1 + $0xd48] sm:$0xff] }
 0x120   :  { %1960 = vmatprep.subr.mxu0 %v1229_v39  ;;  %1883 = vmatprep.subr.mxu1 %v1153_v31  ;;  %v1277_v33 = vld [vmem:[%s6157_s1 + $0xee8] sm:$0xff]  ;;  %v1276_v39 = vld [vmem:[%s6157_s1 + $0xee0] sm:$0xff] }
 0x121   :  { %1884 = vmatpush2.msra.mxu1 %v1152_v38  ;;  %1961 = vmatpush2.msra.mxu0 %v1228_v17  ;;  %v2522_v38 = vunpack.i.l.bf16 %v4296_v22  ;;  %v1223_v17 = vld [vmem:[%s6157_s1 + $0xd38] sm:$0xff] }
 0x122   :  { %285 = vrot.lane.b32.xlu0 %v4452_v12, %s2631_s7  ;;  %1962 = vmatprep.subr.mxu0 %v1227_v4  ;;  %v669_v12 = vsel %vm143_vm3, %v2502_v60, %v2503_v14  ;;  %v668_v4 = vsel %vm143_vm3, %v2512_v34, %v2502_v60  ;;  %v1221_v60 = vld [vmem:[%s6157_s1 + $0xd28] sm:$0xff] }
 0x123   :  { %283 = vrot.lane.b32.xlu1 %v4462_v28, %s2631_s7  ;;  %1886 = vmatmul.mubr.f32.vlgmr.msra.gmra.mxu1 %v666_v10  ;;  %v671_v34 = vsel %vm143_vm3, %v2513_v42, %v2522_v38  ;;  %v1220_v10 = vld [vmem:[%s6157_s1 + $0xd20] sm:$0xff] }
 0x124   :  { %1999 = vmatprep.subr.mxu1 %v1279_v47  ;;  %1963 = vmatpush2.msra.mxu0 %v1226_v52  ;;  %v71_v31 = vpop.permute.xlu1 %70  ;;  %v73_v23 = vpop.permute.xlu0 %72  ;;  %v1222_v47 = vld [vmem:[%s6157_s1 + $0xd30] sm:$0xff]  ;;  %v2523_v52 = vunpack.i.h.bf16 %v4296_v22  ;;  %v1273_v22 = vld [vmem:[%s6157_s1 + $0xec8] sm:$0xff] }
 0x125   :  { %2000 = vmatpush1.msra.mxu1 %v1278_v13  ;;  %1964 = vmatprep.subr.mxu0 %v1225_v59  ;;  %v4739_v14 = vsel %vm90_vm2, %v69_v46, %v71_v31  ;;  %v1274_v46 = vld [vmem:[%s6157_s1 + $0xed0] sm:$0xff]  ;;  %v1272_v13 = vld [vmem:[%s6157_s1 + $0xec0] sm:$0xff]  ;;  %v2533_v59 = vunpack.i.h.bf16 %v4336_v36 }
 0x126   :  { %2001 = vmatprep.subr.mxu1 %v1277_v33  ;;  %1891 = vmatprep.mubr.f32.mxu1 %v669_v12  ;;  %v2532_v33 = vunpack.i.l.bf16 %v4336_v36  ;;  %v1219_v12 = vld [vmem:[%s6157_s1 + $0xd18] sm:$0xff]  ;;  %v670_v31 = vsel %vm143_vm3, %v2523_v52, %v2513_v42  ;;  %v1270_v42 = vld [vmem:[%s6157_s1 + $0xeb0] sm:$0xff]  ;;  %v1216_v52 = vld [vmem:[%s6157_s1 + $0xd00] sm:$0xff] }
 0x127   :  { %1965 = vmatpush2.msra.mxu0 %v1224_v15  ;;  %2002 = vmatpush1.msra.mxu1 %v1276_v39  ;;  %v1271_v36 = vld [vmem:[%s6157_s1 + $0xeb8] sm:$0xff] }
 0x128   :  { %289 = vrot.lane.b32.xlu0 %v4496_v3, %s2631_s7  ;;  %1966 = vmatprep.subr.mxu0 %v1223_v17 }
 0x129   :  { %287 = vrot.lane.b32.xlu1 %v4504_v55, %s2631_s7  ;;  %1892 = vmatmul.mubr.f32.gmra.mxu1 %v668_v4  ;;  %v1218_v4 = vld [vmem:[%s6157_s1 + $0xd10] sm:$0xff] }
 0x12a   :  { %2003 = vmatprep.subr.mxu1 %v1275_v5  ;;  %1967 = vmatpush2.msra.mxu0 %v1222_v47  ;;  %v1269_v5 = vld [vmem:[%s6157_s1 + $0xea8] sm:$0xff]  ;;  %v673_v47 = vsel %vm143_vm3, %v2532_v33, %v2533_v59  ;;  %v4826_v59 = vld [vmem:[%s6157_s1 + $0x10f0] sm:$0xff] }
 0x12b   :  { %2004 = vmatpush1.msra.mxu1 %v1274_v46  ;;  %1968 = vmatprep.subr.mxu0 %v1221_v60  ;;  %v77_v15 = vpop.permute.xlu0 %76  ;;  %v75_v39 = vpop.permute.xlu1 %74  ;;  %v1268_v46 = vld [vmem:[%s6157_s1 + $0xea0] sm:$0xff] }
 0x12c   :  { %2005 = vmatprep.subr.mxu1 %v1273_v22  ;;  %1897 = vmatprep.mubr.f32.mxu1 %v671_v34  ;;  %v4776_v38 = vsel %vm90_vm2, %v73_v23, %v75_v39  ;;  %v4779_v17 = vsel %vm90_vm2, %v75_v39, %v77_v15  ;;  %v1217_v23 = vld [vmem:[%s6157_s1 + $0xd08] sm:$0xff]  ;;  %v4810_v22 = vld [vmem:[%s6157_s1 + $0x10f8] sm:$0xff] }
 0x12d   :  { %1969 = vmatpush2.msra.mxu0 %v1220_v10  ;;  %2006 = vmatpush1.msra.mxu1 %v1272_v13  ;;  %v672_v10 = vsel %vm143_vm3, %v4388_v7, %v2532_v33  ;;  %v1267_v13 = vld [vmem:[%s6157_s1 + $0xe98] sm:$0xff] }
 0x12e   :  { %293 = vrot.lane.b32.xlu0 %v4542_v41, %s2631_s7  ;;  %1970 = vmatprep.subr.mxu0 %v1219_v12  ;;  %v4843_v12 = vld [vmem:[%s6156_s0] sm:$0xff]  ;;  %v4849_v39 = vld [vmem:[%s6156_s0 + $0x18] sm:$0xff] }
 0x12f   :  { %291 = vrot.lane.b32.xlu1 %v4548_v40, %s2631_s7  ;;  %1898 = vmatmul.mubr.f32.gmra.mxu1 %v670_v31  ;;  %v324_v15 = vrot.slane %v4843_v12, 2  ;;  %v325_v31 = vrot.slane %v4849_v39, 2  ;;  %v5083_v41 = vld [vmem:[%s6157_s1 + $0x1080] sm:$0xff] }
 0x130   :  { %2007 = vmatprep.subr.mxu1 %v1271_v36  ;;  %1971 = vmatpush2.msra.mxu0 %v1218_v4  ;;  %v81_v40 = vpop.permute.xlu0 %80  ;;  %v1266_v36 = vld [vmem:[%s6157_s1 + $0xe90] sm:$0xff]  ;;  %v4861_v4 = vld [vmem:[%s6157_s1 + $0x10e8] sm:$0xff]  ;;  %6254 = vst [vmem:[#allocation26_spill] sm:$0xff] %v5083_v41 }
 0x131   :  { %2008 = vmatpush1.msra.mxu1 %v1270_v42  ;;  %1972 = vmatprep.subr.mxu0 %v1217_v23  ;;  %v79_v60 = vpop.permute.xlu1 %78  ;;  %v1265_v42 = vld [vmem:[%s6157_s1 + $0xe88] sm:$0xff]  ;;  %v1264_v23 = vld [vmem:[%s6157_s1 + $0xe80] sm:$0xff] }
 0x132   :  { %2009 = vmatprep.subr.mxu1 %v1269_v5  ;;  %1903 = vmatprep.mubr.f32.mxu1 %v673_v47  ;;  %v4813_v34 = vsel %vm90_vm2, %v79_v60, %v81_v40  ;;  %v4874_v5 = vld [vmem:[%s6157_s1 + $0x10e0] sm:$0xff]  ;;  %v1263_v60 = vld [vmem:[%s6157_s1 + $0xe78] sm:$0xff] }
 0x133   :  { %1973 = vmatpush2.msra.mxu0 %v1216_v52  ;;  %1974 = vmatprep.mubr.f32.mxu0 %v3216_v49  ;;  %v4831_v49 = vld [vmem:[%s6156_s0 + $0x8] sm:$0xff]  ;;  %v4883_v52 = vsel %vm323_vm0, %v324_v15, %v325_v31  ;;  %v4905_v15 = vld [vmem:[%s6156_s0 + $0x10] sm:$0xff] }
 0x134   :  { %2010 = vmatpush1.msra.mxu1 %v1268_v46  ;;  %297 = vrot.lane.b32.xlu0 %v4592_v45, %s2631_s7  ;;  %6235 = vst [vmem:[#allocation9_spill] sm:$0xff] %v4831_v49  ;;  %v327_v7 = vrot.slane %v4831_v49, 2  ;;  %v4837_v45 = vld [vmem:[%s6156_s0 + $0x20] sm:$0xff]  ;;  %6238 = vst [vmem:[#allocation12_spill] sm:$0xff] %v4883_v52 }
 0x135   :  { %6236 = vst [vmem:[#allocation10_spill] sm:$0xff] %v4837_v45  ;;  %v6164_v33 = vrot.slane %v4837_v45, 2  ;;  %2088 = vmatprep.subr.mxu0 %v4810_v22  ;;  %295 = vrot.lane.b32.xlu1 %v4600_v20, %s2631_s7  ;;  %6239 = vst [vmem:[#allocation13_spill] sm:$0xff] %v4905_v15  ;;  %v1252_v20 = vld [vmem:[%s6157_s1 + $0xe20] sm:$0xff] }
 0x136   :  { %1904 = vmatmul.mubr.f32.gmra.mxu1 %v672_v10  ;;  %1975 = vmatmul.mubr.f32.vlgmr.msra.gmra.mxu0 %v3422_v62  ;;  %v330_v10 = vrot.slane %v4369_v29, 2  ;;  %v360_v29 = vrot.slane %v4905_v15, 2  ;;  %v1255_v15 = vld [vmem:[%s6157_s1 + $0xe38] sm:$0xff] }
 0x137   :  { %2011 = vmatprep.subr.mxu1 %v1267_v13  ;;  %2089 = vmatpush1.msra.mxu0 %v4826_v59  ;;  %v85_v47 = vpop.permute.xlu0 %84  ;;  %v4880_v62 = vsel %vm323_vm0, %v327_v7, %v6164_v33  ;;  %v4897_v7 = vld [vmem:[%s6157_s1 + $0x10d8] sm:$0xff]  ;;  %v1260_v33 = vld [vmem:[%s6157_s1 + $0xe60] sm:$0xff] }
 0x138   :  { %2012 = vmatpush1.msra.mxu1 %v1266_v36  ;;  %2090 = vmatprep.subr.mxu0 %v4861_v4  ;;  %6237 = vst [vmem:[#allocation11_spill] sm:$0xff] %v4880_v62  ;;  %v83_v46 = vpop.permute.xlu1 %82 }
 0x139   :  { %2013 = vmatprep.subr.mxu1 %v1265_v42  ;;  %1980 = vmatprep.mubr.f32.mxu0 %v3543_v56  ;;  %v4891_v13 = vsel %vm90_vm2, %v81_v40, %v83_v46  ;;  %v1262_v56 = vld [vmem:[%s6157_s1 + $0xe70] sm:$0xff]  ;;  %v4911_v40 = vld [vmem:[%s6156_s0 + $0x28] sm:$0xff] }
 0x13a   :  { %2014 = vmatpush1.msra.mxu1 %v1264_v23  ;;  %2091 = vmatpush1.msra.mxu0 %v4874_v5  ;;  %6240 = vst [vmem:[#allocation14_spill] sm:$0xff] %v4911_v40  ;;  %v361_v36 = vrot.slane %v4911_v40, 2  ;;  %v4921_v42 = vld [vmem:[%s6157_s1 + $0x10d0] sm:$0xff]  ;;  %v1261_v23 = vld [vmem:[%s6157_s1 + $0xe68] sm:$0xff] }
 0x13b   :  { %372 = vrot.lane.b32.xlu0 %v4880_v62, %s2630_s23  ;;  %370 = vrot.lane.b32.xlu1 %v4883_v52, %s2630_s23  ;;  %v4930_v46 = vld [vmem:[%s6157_s1 + $0x10c8] sm:$0xff] }
 0x13c   :  { %1981 = vmatmul.mubr.f32.gmra.mxu0 %v3446_v9  ;;  %2015 = vmatprep.subr.mxu1 %v1263_v60  ;;  %v4941_v9 = vld [vmem:[%s6157_s1 + $0x10c0] sm:$0xff]  ;;  %v4944_v60 = vsel %vm323_vm0, %v325_v31, %v330_v10  ;;  %v4948_v63 = vsel %vm323_vm0, %v360_v29, %v361_v36  ;;  %v1259_v31 = vld [vmem:[%s6157_s1 + $0xe58] sm:$0xff]  ;;  %v6244_v29 = vunpack.i.l.bf16 %v4660_v57 }
 0x13d   :  { %2092 = vmatprep.subr.mxu0 %v4897_v7  ;;  %2016 = vmatpush1.msra.mxu1 %v1262_v56  ;;  %6241 = vst [vmem:[#allocation15_spill] sm:$0xff] %v4941_v9  ;;  %6242 = vst [vmem:[#allocation16_spill] sm:$0xff] %v4944_v60  ;;  %v89_v30 = vpop.permute.xlu0 %88  ;;  %v87_v40 = vpop.permute.xlu1 %86  ;;  %v4965_v10 = vld [vmem:[%s6157_s1 + $0x10b8] sm:$0xff] }
 0x13e   :  { %2093 = vmatpush1.msra.mxu0 %v4921_v42  ;;  %2017 = vmatprep.subr.mxu1 %v1261_v23  ;;  %v4951_v56 = vsel %vm90_vm2, %v85_v47, %v87_v40  ;;  %v4954_v35 = vsel %vm90_vm2, %v87_v40, %v89_v30  ;;  %6243 = vst [vmem:[#allocation17_spill] sm:$0xff] %v4965_v10  ;;  %v1258_v30 = vld [vmem:[%s6157_s1 + $0xe50] sm:$0xff]  ;;  %v363_v47 = vrot.slane %v4415_v26, 2  ;;  %v1257_v26 = vld [vmem:[%s6157_s1 + $0xe48] sm:$0xff]  ;;  %v1256_v23 = vld [vmem:[%s6157_s1 + $0xe40] sm:$0xff] }
 0x13f   :  { %2094 = vmatprep.subr.mxu0 %v4930_v46  ;;  %1986 = vmatprep.mubr.f32.mxu0 %v3449_v27  ;;  %v332_v27 = vrot.slane %v4427_v16, 2  ;;  %v4975_v40 = vsel %vm143_vm3, %v2593_v21, %v6244_v29  ;;  %v107_v16 = vadd.f32 %v4843_v12, %v4703_v53  ;;  %v4995_v21 = vld [vmem:[%s6157_s1 + $0x10a8] sm:$0xff]  ;;  %v5004_v29 = vld [vmem:[%s6157_s1 + $0x10a0] sm:$0xff] }
 0x140   :  { %2018 = vmatpush1.msra.mxu1 %v1260_v33  ;;  %2095 = vmatpush1.msra.mxu0 %v4941_v9  ;;  %6245 = vst [vmem:[#allocation18_spill] sm:$0xff] %v4975_v40  ;;  %v4984_v33 = vld [vmem:[%s6157_s1 + $0x10b0] sm:$0xff]  ;;  %6247 = vst [vmem:[#allocation20_spill] sm:$0xff] %v4995_v21  ;;  %v6249_v40 = vrot.slane %v4837_v45, 2 }
 0x141   :  { %376 = vrot.lane.b32.xlu0 %v4944_v60, %s2630_s23  ;;  %374 = vrot.lane.b32.xlu1 %v4948_v63, %s2630_s23  ;;  %6246 = vst [vmem:[#allocation19_spill] sm:$0xff] %v4984_v33  ;;  %6248 = vst [vmem:[#allocation21_spill] sm:$0xff] %v5004_v29 }
 0x142   :  { %1987 = vmatmul.mubr.f32.gmra.mxu0 %v3535_v51  ;;  %2019 = vmatprep.subr.mxu1 %v1259_v31  ;;  %v122_v53 = vpop.permute.xlu0 %121  ;;  %v5008_v31 = vsel %vm323_vm0, %v361_v36, %v363_v47  ;;  %v5024_v36 = vld [vmem:[%s6156_s0 + $0x50] sm:$0xff] }
 0x143   :  { %2096 = vmatprep.subr.mxu0 %v4965_v10  ;;  %2020 = vmatpush1.msra.mxu1 %v1258_v30  ;;  %v120_v51 = vpop.permute.xlu1 %119  ;;  %v5013_v30 = vsel %vm323_vm0, %v6249_v40, %v332_v27  ;;  %v337_v47 = vrot.slane %v5024_v36, 2  ;;  %v5030_v27 = vld [vmem:[%s6156_s0 + $0x68] sm:$0xff]  ;;  %v5063_v40 = vld [vmem:[%s6157_s1 + $0x1090] sm:$0xff] }
 0x144   :  { %2097 = vmatpush1.msra.mxu0 %v4984_v33  ;;  %2021 = vmatprep.subr.mxu1 %v1257_v26  ;;  %6250 = vst [vmem:[#allocation22_spill] sm:$0xff] %v5013_v30  ;;  %v144_v57 = vsel %vm143_vm3, %v120_v51, %v122_v53  ;;  %v1254_v51 = vld [vmem:[%s6157_s1 + $0xe30] sm:$0xff]  ;;  %6252 = vst [vmem:[#allocation24_spill] sm:$0xff] %v5063_v40  ;;  %v108_v33 = vadd.f32 %v4831_v49, %v4739_v14  ;;  %v5074_v10 = vld [vmem:[%s6157_s1 + $0x1088] sm:$0xff] }
 0x145   :  { %2098 = vmatprep.subr.mxu0 %v4995_v21  ;;  %1992 = vmatprep.mubr.f32.mxu0 %v3475_v25  ;;  %v5033_v26 = vadd.f32 %v144_v57, %v107_v16  ;;  %v5039_v25 = vld [vmem:[%s6157_s1 + $0x1098] sm:$0xff]  ;;  %v5047_v21 = vld [vmem:[%s6156_s0 + $0x48] sm:$0xff]  ;;  %v5053_v16 = vld [vmem:[%s6156_s0 + $0x60] sm:$0xff]  ;;  %6253 = vst [vmem:[#allocation25_spill] sm:$0xff] %v5074_v10 }
 0x146   :  { %2022 = vmatpush1.msra.mxu1 %v1256_v23  ;;  %2099 = vmatpush1.msra.mxu0 %v5004_v29  ;;  %6251 = vst [vmem:[#allocation23_spill] sm:$0xff] %v5039_v25  ;;  %v334_v57 = vrot.slane %v5047_v21, 2  ;;  %v335_v23 = vrot.slane %v5053_v16, 2  ;;  %v1253_v29 = vld [vmem:[%s6157_s1 + $0xe28] sm:$0xff] }
 0x147   :  { %380 = vrot.lane.b32.xlu0 %v5008_v31, %s2630_s23  ;;  %378 = vrot.lane.b32.xlu1 %v5013_v30, %s2630_s23 }
 0x148   :  { %1993 = vmatmul.mubr.f32.gmra.mxu0 %v3650_v37  ;;  %2023 = vmatprep.subr.mxu1 %v1255_v15  ;;  %v6255_v37 = vrot.slane %v5030_v27, 2  ;;  %v126_v15 = vpop.permute.xlu0 %125  ;;  %v5092_v9 = vsel %vm323_vm0, %v334_v57, %v335_v23  ;;  %v5111_v57 = vld [vmem:[%s6156_s0 + $0x58] sm:$0xff] }
 0x149   :  { %2100 = vmatprep.subr.mxu0 %v5039_v25  ;;  %2024 = vmatpush1.msra.mxu1 %v1254_v51  ;;  %v124_v49 = vpop.permute.xlu1 %123  ;;  %6257 = vst [vmem:[#allocation28_spill] sm:$0xff] %v5092_v9  ;;  %v1251_v51 = vld [vmem:[%s6157_s1 + $0xe18] sm:$0xff]  ;;  %v340_v25 = vrot.slane %v4509_v2, 2  ;;  %6259 = vst [vmem:[#allocation30_spill] sm:$0xff] %v5111_v57  ;;  %v365_v2 = vrot.slane %v5111_v57, 2  ;;  %v1249_v57 = vld [vmem:[%s6157_s1 + $0xe08] sm:$0xff] }
 0x14a   :  { %v5088_v14 = vsel %vm323_vm0, %v337_v47, %v6255_v37  ;;  %2101 = vmatpush1.msra.mxu0 %v5063_v40  ;;  %2025 = vmatprep.subr.mxu1 %v1253_v29  ;;  %v145_v43 = vsel %vm143_vm3, %v122_v53, %v124_v49  ;;  %v5103_v47 = vld [vmem:[%s6157_s1 + $0x1078] sm:$0xff]  ;;  %v1250_v29 = vld [vmem:[%s6157_s1 + $0xe10] sm:$0xff]  ;;  %v110_v40 = vadd.f32 %v4837_v45, %v4779_v17 }
 0x14b   :  { %6256 = vst [vmem:[#allocation27_spill] sm:$0xff] %v5088_v14  ;;  %2102 = vmatprep.subr.mxu0 %v5074_v10  ;;  %2026 = vmatpush1.msra.mxu1 %v1252_v20  ;;  %6258 = vst [vmem:[#allocation29_spill] sm:$0xff] %v5103_v47  ;;  %v5117_v20 = vld [vmem:[%s6156_s0 + $0x70] sm:$0xff]  ;;  %v5120_v53 = vadd.f32 %v145_v43, %v108_v33  ;;  %v5138_v43 = vld [vmem:[%s6157_s1 + $0x1068] sm:$0xff]  ;;  %v109_v10 = vadd.f32 %v4849_v39, %v4776_v38 }
 0x14c   :  { %6260 = vst [vmem:[#allocation31_spill] sm:$0xff] %v5117_v20  ;;  %v366_v49 = vrot.slane %v5117_v20, 2  ;;  %2103 = vmatpush1.msra.mxu0 %v5083_v41  ;;  %384 = vrot.lane.b32.xlu0 %v5088_v14, %s2630_s23  ;;  %v5128_v37 = vld [vmem:[%s6157_s1 + $0x1070] sm:$0xff]  ;;  %6262 = vst [vmem:[#allocation33_spill] sm:$0xff] %v5138_v43  ;;  %v1248_v33 = vld [vmem:[%s6157_s1 + $0xe00] sm:$0xff]  ;;  %v5143_v20 = vpop.f32.mrf.mxu0 }
 0x14d   :  { %6261 = vst [vmem:[#allocation32_spill] sm:$0xff] %v5128_v37  ;;  %382 = vrot.lane.b32.xlu1 %v5092_v9, %s2630_s23  ;;  %2027 = vmatprep.subr.mxu1 %v1251_v51  ;;  %6263 = vst [vmem:[#allocation34_spill] sm:$0xff] %v5143_v20  ;;  %v5149_v41 = vld [vmem:[%s6157_s1 + $0x1060] sm:$0xff]  ;;  %v5152_v51 = vsel %vm323_vm0, %v335_v23, %v340_v25  ;;  %v5170_v38 = vld [vmem:[%s6157_s1 + $0x1058] sm:$0xff]  ;;  %v342_v23 = vrot.slane %v4567_v54, 2 }
 0x14e   :  { %2104 = vmatprep.subr.mxu0 %v5103_v47  ;;  %2028 = vmatpush1.msra.mxu1 %v1250_v29  ;;  %6264 = vst [vmem:[#allocation35_spill] sm:$0xff] %v5149_v41  ;;  %6265 = vst [vmem:[#allocation36_spill] sm:$0xff] %v5152_v51  ;;  %v5160_v20 = vsel %vm323_vm0, %v365_v2, %v366_v49  ;;  %v1311_v29 = vld [vmem:[%s6157_s1 + $0xff8] sm:$0xff]  ;;  %v368_v47 = vrot.slane %v4553_v44, 2  ;;  %v1310_v17 = vld [vmem:[%s6157_s1 + $0xff0] sm:$0xff]  ;;  %v5189_v54 = vpop.f32.mrf.mxu0 }
 0x14f   :  { %2105 = vmatpush1.msra.mxu0 %v5128_v37  ;;  %2029 = vmatprep.subr.mxu1 %v1249_v57  ;;  %v130_v25 = vpop.permute.xlu0 %129  ;;  %v5182_v44 = vld [vmem:[%s6157_s1 + $0x1050] sm:$0xff]  ;;  %v1309_v2 = vld [vmem:[%s6157_s1 + $0xfe8] sm:$0xff]  ;;  %6266 = vst [vmem:[#allocation37_spill] sm:$0xff] %v5189_v54  ;;  %v1308_v37 = vld [vmem:[%s6157_s1 + $0xfe0] sm:$0xff] }
 0x150   :  { %2106 = vmatprep.subr.mxu0 %v5138_v43  ;;  %2030 = vmatpush1.msra.mxu1 %v1248_v33  ;;  %v128_v57 = vpop.permute.xlu1 %127 }
 0x151   :  { %2107 = vmatpush1.msra.mxu0 %v5149_v41  ;;  %388 = vrot.lane.b32.xlu0 %v5152_v51, %s2630_s23  ;;  %v146_v33 = vsel %vm143_vm3, %v126_v15, %v128_v57  ;;  %v147_v43 = vsel %vm143_vm3, %v128_v57, %v130_v25  ;;  %v5196_v41 = vld [vmem:[%s6157_s1 + $0x1048] sm:$0xff]  ;;  %v5212_v25 = vsel %vm323_vm0, %v366_v49, %v368_v47  ;;  %v6269_v57 = vrot.slane %v5030_v27, 2  ;;  %v5229_v47 = vld [vmem:[%s6157_s1 + $0x1038] sm:$0xff]  ;;  %v1306_v49 = vld [vmem:[%s6157_s1 + $0xfd0] sm:$0xff] }
 0x152   :  { %386 = vrot.lane.b32.xlu1 %v5160_v20, %s2630_s23  ;;  %2031 = vmatprep.subr.mxu1 %v1311_v29  ;;  %6267 = vst [vmem:[#allocation38_spill] sm:$0xff] %v5196_v41  ;;  %v5201_v45 = vadd.f32 %v146_v33, %v109_v10  ;;  %v5203_v15 = vadd.f32 %v147_v43, %v110_v40  ;;  %v5209_v29 = vld [vmem:[%s6157_s1 + $0x1040] sm:$0xff]  ;;  %v1307_v40 = vld [vmem:[%s6157_s1 + $0xfd8] sm:$0xff]  ;;  %v5252_v33 = vld [vmem:[%s6157_s1 + $0x1028] sm:$0xff] }
 0x153   :  { %2108 = vmatprep.subr.mxu0 %v5170_v38  ;;  %2032 = vmatpush2.msra.mxu1 %v1310_v17  ;;  %6268 = vst [vmem:[#allocation39_spill] sm:$0xff] %v5209_v29  ;;  %v5218_v10 = vsel %vm323_vm0, %v6269_v57, %v342_v23  ;;  %v111_v43 = vadd.f32 %v5047_v21, %v4813_v34  ;;  %v5234_v17 = vpop.f32.mrf.mxu0  ;;  %v5242_v34 = vld [vmem:[%s6157_s1 + $0x1030] sm:$0xff]  ;;  %6273 = vst [vmem:[#allocation43_spill] sm:$0xff] %v5252_v33  ;;  %v1304_v57 = vld [vmem:[%s6157_s1 + $0xfc0] sm:$0xff] }
 0x154   :  { %2109 = vmatpush1.msra.mxu0 %v5182_v44  ;;  %2033 = vmatprep.subr.mxu1 %v1309_v2  ;;  %6270 = vst [vmem:[#allocation40_spill] sm:$0xff] %v5218_v10  ;;  %6271 = vst [vmem:[#allocation41_spill] sm:$0xff] %v5234_v17  ;;  %v5262_v17 = vld [vmem:[%s6157_s1 + $0x1020] sm:$0xff] }
 0x155   :  { %2110 = vmatprep.subr.mxu0 %v5196_v41  ;;  %2034 = vmatpush2.msra.mxu1 %v1308_v37  ;;  %v134_v23 = vpop.permute.xlu0 %133  ;;  %6272 = vst [vmem:[#allocation42_spill] sm:$0xff] %v5242_v34  ;;  %v1305_v37 = vld [vmem:[%s6157_s1 + $0xfc8] sm:$0xff]  ;;  %6274 = vst [vmem:[#allocation44_spill] sm:$0xff] %v5262_v17  ;;  %v5270_v41 = vpop.f32.mrf.mxu0 }
 0x156   :  { %2111 = vmatpush1.msra.mxu0 %v5209_v29  ;;  %392 = vrot.lane.b32.xlu0 %v5212_v25, %s2630_s23  ;;  %v132_v2 = vpop.permute.xlu1 %131  ;;  %v1303_v29 = vld [vmem:[%s6157_s1 + $0xfb8] sm:$0xff]  ;;  %6275 = vst [vmem:[#allocation45_spill] sm:$0xff] %v5270_v41 }
 0x157   :  { %390 = vrot.lane.b32.xlu1 %v5218_v10, %s2630_s23  ;;  %2035 = vmatprep.subr.mxu1 %v1307_v40  ;;  %v148_v54 = vsel %vm143_vm3, %v132_v2, %v134_v23  ;;  %v1301_v2 = vld [vmem:[%s6157_s1 + $0xfa8] sm:$0xff] }
 0x158   :  { %2112 = vmatprep.subr.mxu0 %v5229_v47  ;;  %2036 = vmatpush2.msra.mxu1 %v1306_v49  ;;  %v5264_v40 = vadd.f32 %v148_v54, %v111_v43  ;;  %v5276_v49 = vld [vmem:[%s6157_s1 + $0x1018] sm:$0xff]  ;;  %v1302_v54 = vld [vmem:[%s6157_s1 + $0xfb0] sm:$0xff]  ;;  %v112_v43 = vadd.f32 %v5024_v36, %v4891_v13  ;;  %v5299_v13 = vld [vmem:[%s6157_s1 + $0x1008] sm:$0xff] }
 0x159   :  { %2113 = vmatpush1.msra.mxu0 %v5242_v34  ;;  %2037 = vmatprep.subr.mxu1 %v1305_v37  ;;  %v5289_v37 = vld [vmem:[%s6157_s1 + $0x1010] sm:$0xff]  ;;  %6277 = vst [vmem:[#allocation47_spill] sm:$0xff] %v5299_v13 }
 0x15a   :  { %2114 = vmatprep.subr.mxu0 %v5252_v33  ;;  %2038 = vmatpush2.msra.mxu1 %v1304_v57  ;;  %6276 = vst [vmem:[#allocation46_spill] sm:$0xff] %v5289_v37  ;;  %v1299_v33 = vld [vmem:[%s6157_s1 + $0xf98] sm:$0xff] }
 0x15b   :  { %2115 = vmatpush1.msra.mxu0 %v5262_v17  ;;  %420 = vrot.lane.b32.xlu0 %v4880_v62, %s2631_s7  ;;  %v138_v57 = vpop.permute.xlu0 %137  ;;  %v1300_v62 = vld [vmem:[%s6157_s1 + $0xfa0] sm:$0xff] }
 0x15c   :  { %418 = vrot.lane.b32.xlu1 %v4883_v52, %s2631_s7  ;;  %2039 = vmatprep.subr.mxu1 %v1303_v29  ;;  %v136_v41 = vpop.permute.xlu1 %135  ;;  %v5308_v17 = vld [vmem:[%s6157_s1 + $0x1000] sm:$0xff]  ;;  %v5310_v52 = vpop.f32.mrf.mxu0 }
 0x15d   :  { %2116 = vmatprep.subr.mxu0 %v5276_v49  ;;  %2040 = vmatpush2.msra.mxu1 %v1302_v54  ;;  %6278 = vst [vmem:[#allocation48_spill] sm:$0xff] %v5308_v17  ;;  %v149_v29 = vsel %vm143_vm3, %v134_v23, %v136_v41  ;;  %v5323_v54 = vld [vmem:[%s6157_s1 + $0x11f8] sm:$0xff]  ;;  %v1298_v41 = vld [vmem:[%s6157_s1 + $0xf90] sm:$0xff] }
 0x15e   :  { %2117 = vmatpush1.msra.mxu0 %v5289_v37  ;;  %2041 = vmatprep.subr.mxu1 %v1301_v2  ;;  %v5317_v34 = vadd.f32 %v149_v29, %v112_v43  ;;  %6279 = vst [vmem:[#allocation49_spill] sm:$0xff] %v5323_v54  ;;  %v5334_v23 = vld [vmem:[%s6157_s1 + $0x11f0] sm:$0xff]  ;;  %v113_v43 = vadd.f32 %v5053_v16, %v4951_v56  ;;  %v5346_v2 = vld [vmem:[%s6157_s1 + $0x11e8] sm:$0xff]  ;;  %v1296_v29 = vld [vmem:[%s6157_s1 + $0xf80] sm:$0xff] }
 0x15f   :  { %2118 = vmatprep.subr.mxu0 %v5299_v13  ;;  %2042 = vmatpush2.msra.mxu1 %v1300_v62  ;;  %6280 = vst [vmem:[#allocation50_spill] sm:$0xff] %v5334_v23  ;;  %v1297_v62 = vld [vmem:[%s6157_s1 + $0xf88] sm:$0xff]  ;;  %6281 = vst [vmem:[#allocation51_spill] sm:$0xff] %v5346_v2 }
 0x160   :  { %2119 = vmatpush1.msra.mxu0 %v5308_v17  ;;  %424 = vrot.lane.b32.xlu0 %v4944_v60, %s2631_s7  ;;  %v5351_v60 = vpop.f32.mrf.mxu0 }
 0x161   :  { %422 = vrot.lane.b32.xlu1 %v4948_v63, %s2631_s7  ;;  %2043 = vmatprep.subr.mxu1 %v1299_v33  ;;  %v5353_v17 = vpop.permute.xlu0 %2207  ;;  %v5359_v63 = vld [vmem:[%s6157_s1 + $0x11e0] sm:$0xff]  ;;  %v1295_v33 = vld [vmem:[%s6157_s1 + $0xf78] sm:$0xff] }
 0x162   :  { %2120 = vmatprep.subr.mxu0 %v5323_v54  ;;  %2044 = vmatpush2.msra.mxu1 %v1298_v41  ;;  %6282 = vst [vmem:[#allocation52_spill] sm:$0xff] %v5359_v63  ;;  %v140_v56 = vpop.permute.xlu1 %139  ;;  %v5370_v41 = vld [vmem:[%s6157_s1 + $0x11d8] sm:$0xff]  ;;  %v1294_v54 = vld [vmem:[%s6157_s1 + $0xf70] sm:$0xff] }
 0x163   :  { %2121 = vmatpush2.msra.mxu0 %v5334_v23  ;;  %2045 = vmatprep.subr.mxu1 %v1297_v62  ;;  %v150_v13 = vsel %vm143_vm3, %v138_v57, %v140_v56  ;;  %v114_v62 = vadd.f32 %v5030_v27, %v4954_v35  ;;  %v5385_v57 = vld [vmem:[%s6157_s1 + $0x11d0] sm:$0xff]  ;;  %v5397_v35 = vld [vmem:[%s6157_s1 + $0x11c8] sm:$0xff] }
 0x164   :  { %2122 = vmatprep.subr.mxu0 %v5346_v2  ;;  %2046 = vmatpush2.msra.mxu1 %v1296_v29  ;;  %v5377_v23 = vadd.f32 %v150_v13, %v113_v43  ;;  %v1293_v29 = vld [vmem:[%s6157_s1 + $0xf68] sm:$0xff]  ;;  %v5390_v2 = vpop.f32.mrf.mxu0  ;;  %6283 = vst [vmem:[#allocation53_spill] sm:$0xff] %v5397_v35  ;;  %v5406_v43 = vld [vmem:[%s6157_s1 + $0x11c0] sm:$0xff] }
 0x165   :  { %2123 = vmatpush2.msra.mxu0 %v5359_v63  ;;  %428 = vrot.lane.b32.xlu0 %v5008_v31, %s2631_s7  ;;  %v1292_v31 = vld [vmem:[%s6157_s1 + $0xf60] sm:$0xff]  ;;  %6284 = vst [vmem:[#allocation54_spill] sm:$0xff] %v5406_v43  ;;  %v1291_v63 = vld [vmem:[%s6157_s1 + $0xf58] sm:$0xff] }
 0x166   :  { %426 = vrot.lane.b32.xlu1 %v5013_v30, %s2631_s7  ;;  %2047 = vmatprep.subr.mxu1 %v1295_v33  ;;  %v142_v13 = vpop.permute.xlu0 %141 }
 0x167   :  { %2124 = vmatprep.subr.mxu0 %v5370_v41  ;;  %2048 = vmatpush2.msra.mxu1 %v1294_v54  ;;  %v151_v33 = vsel %vm143_vm3, %v140_v56, %v142_v13  ;;  %v5409_v30 = vpop.permute.xlu1 %2209  ;;  %v5421_v54 = vld [vmem:[%s6157_s1 + $0x11b8] sm:$0xff]  ;;  %v1290_v56 = vld [vmem:[%s6157_s1 + $0xf50] sm:$0xff]  ;;  %v5426_v13 = vpop.f32.mrf.mxu1 }
 0x168   :  { %2125 = vmatpush2.msra.mxu0 %v5385_v57  ;;  %2049 = vmatprep.subr.mxu1 %v1293_v29  ;;  %v5415_v37 = vadd.f32 %v151_v33, %v114_v62  ;;  %6285 = vst [vmem:[#allocation55_spill] sm:$0xff] %v5421_v54  ;;  %6286 = vst [vmem:[#allocation56_spill] sm:$0xff] %v5426_v13  ;;  %v5428_v29 = vpop.f32.mrf.mxu0  ;;  %v5436_v62 = vld [vmem:[%s6157_s1 + $0x11b0] sm:$0xff]  ;;  %v201_v33 = vadd.f32 %v4364_v58, %v5033_v26  ;;  %v5448_v13 = vld [vmem:[%s6157_s1 + $0x11a8] sm:$0xff] }
 0x169   :  { %2126 = vmatprep.subr.mxu0 %v5397_v35  ;;  %2050 = vmatpush2.msra.mxu1 %v1292_v31  ;;  %6287 = vst [vmem:[#allocation57_spill] sm:$0xff] %v5436_v62  ;;  %v1289_v31 = vld [vmem:[%s6157_s1 + $0xf48] sm:$0xff]  ;;  %6288 = vst [vmem:[#allocation58_spill] sm:$0xff] %v5448_v13  ;;  %v5457_v58 = vld [vmem:[%s6157_s1 + $0x11a0] sm:$0xff] }
 0x16a   :  { %2127 = vmatpush2.msra.mxu0 %v5406_v43  ;;  %432 = vrot.lane.b32.xlu0 %v5088_v14, %s2631_s7  ;;  %v1288_v14 = vld [vmem:[%s6157_s1 + $0xf40] sm:$0xff]  ;;  %6289 = vst [vmem:[#allocation59_spill] sm:$0xff] %v5457_v58  ;;  %v5465_v35 = vpop.f32.mrf.mxu0 }
 0x16b   :  { %430 = vrot.lane.b32.xlu1 %v5092_v9, %s2631_s7  ;;  %2051 = vmatprep.subr.mxu1 %v1291_v63  ;;  %v228_v43 = vpop.permute.xlu0 %227  ;;  %v1287_v63 = vld [vmem:[%s6157_s1 + $0xf38] sm:$0xff]  ;;  %v5463_v9 = vpop.f32.mrf.mxu1  ;;  %6291 = vst [vmem:[#allocation61_spill] sm:$0xff] %v5465_v35  ;;  %v2542_v35 = vunpack.i.l.bf16 %v4398_v8 }
 0x16c   :  { %2128 = vmatprep.subr.mxu0 %v5421_v54  ;;  %2052 = vmatpush2.msra.mxu1 %v1290_v56  ;;  %v226_v26 = vpop.permute.xlu1 %225  ;;  %6290 = vst [vmem:[#allocation60_spill] sm:$0xff] %v5463_v9  ;;  %v5472_v56 = vld [vmem:[%s6157_s1 + $0x1198] sm:$0xff]  ;;  %v5501_v9 = vld [vmem:[%s6157_s1 + $0x1188] sm:$0xff] }
 0x16d   :  { %2129 = vmatpush2.msra.mxu0 %v5436_v62  ;;  %2053 = vmatprep.subr.mxu1 %v1289_v31  ;;  %v249_v54 = vsel %vm90_vm2, %v226_v26, %v228_v43  ;;  %6292 = vst [vmem:[#allocation62_spill] sm:$0xff] %v5472_v56  ;;  %v1286_v31 = vld [vmem:[%s6157_s1 + $0xf30] sm:$0xff]  ;;  %v1285_v26 = vld [vmem:[%s6157_s1 + $0xf28] sm:$0xff] }
 0x16e   :  { %2130 = vmatprep.subr.mxu0 %v5448_v13  ;;  %2054 = vmatpush2.msra.mxu1 %v1288_v14  ;;  %v5477_v62 = vadd.f32 %v249_v54, %v201_v33  ;;  %v5487_v14 = vld [vmem:[%s6157_s1 + $0x1190] sm:$0xff]  ;;  %v202_v54 = vadd.f32 %v4358_v50, %v5120_v53  ;;  %v5510_v50 = vld [vmem:[%s6157_s1 + $0x1180] sm:$0xff] }
 0x16f   :  { %2131 = vmatpush2.msra.mxu0 %v5457_v58  ;;  %436 = vrot.lane.b32.xlu0 %v5152_v51, %s2631_s7  ;;  %6293 = vst [vmem:[#allocation63_spill] sm:$0xff] %v5487_v14  ;;  %v5494_v33 = vpop.f32.mrf.mxu1  ;;  %v1284_v51 = vld [vmem:[%s6157_s1 + $0xf20] sm:$0xff] }
 0x170   :  { %6294 = vst [vmem:[#allocation64_spill] sm:$0xff] %v5494_v33  ;;  %434 = vrot.lane.b32.xlu1 %v5160_v20, %s2631_s7  ;;  %2055 = vmatprep.subr.mxu1 %v1287_v63  ;;  %v232_v58 = vpop.permute.xlu0 %231  ;;  %v5512_v20 = vpop.f32.mrf.mxu0  ;;  %v1283_v63 = vld [vmem:[%s6157_s1 + $0xf18] sm:$0xff] }
 0x171   :  { %2132 = vmatprep.subr.mxu0 %v5472_v56  ;;  %2056 = vmatpush2.msra.mxu1 %v1286_v31  ;;  %6295 = vst [vmem:[#allocation65_spill] sm:$0xff] %v5512_v20  ;;  %v230_v53 = vpop.permute.xlu1 %229  ;;  %v5519_v13 = vpop.f32.mrf.mxu1  ;;  %v6297_v31 = vunpack.i.h.bf16 %v4253_v6  ;;  %v5528_v20 = vld [vmem:[%s6157_s1 + $0x1178] sm:$0xff] }
 0x172   :  { %2133 = vmatpush2.msra.mxu0 %v5487_v14  ;;  %2057 = vmatprep.subr.mxu1 %v1285_v26  ;;  %v250_v33 = vsel %vm90_vm2, %v228_v43, %v230_v53  ;;  %6296 = vst [vmem:[#allocation66_spill] sm:$0xff] %v5519_v13  ;;  %6298 = vst [vmem:[#allocation67_spill] sm:$0xff] %v5528_v20  ;;  %v203_v43 = vadd.f32 %v4404_v18, %v5201_v45  ;;  %v5558_v53 = vld [vmem:[%s6157_s1 + $0x1168] sm:$0xff]  ;;  %v1280_v45 = vld [vmem:[%s6157_s1 + $0xf00] sm:$0xff]  ;;  %v2552_v13 = vunpack.i.l.bf16 %v4454_v11 }
 0x173   :  { %2134 = vmatprep.subr.mxu0 %v5501_v9  ;;  %2058 = vmatpush2.msra.mxu1 %v1284_v51  ;;  %v745_v56 = vsel %vm90_vm2, %v6297_v31, %v2542_v35  ;;  %v5530_v26 = vadd.f32 %v250_v33, %v202_v54  ;;  %v5532_v14 = vpop.f32.mrf.mxu0  ;;  %v1282_v51 = vld [vmem:[%s6157_s1 + $0xf10] sm:$0xff]  ;;  %v204_v54 = vadd.f32 %v4462_v28, %v5203_v15  ;;  %v2543_v33 = vunpack.i.h.bf16 %v4398_v8  ;;  %v5571_v15 = vld [vmem:[%s6157_s1 + $0x1160] sm:$0xff] }
 0x174   :  { %6299 = vst [vmem:[#allocation68_spill] sm:$0xff] %v5532_v14  ;;  %2135 = vmatpush2.msra.mxu0 %v5510_v50  ;;  %440 = vrot.lane.b32.xlu0 %v5212_v25, %s2631_s7  ;;  %v5543_v35 = vld [vmem:[%s6157_s1 + $0x1170] sm:$0xff]  ;;  %v1281_v25 = vld [vmem:[%s6157_s1 + $0xf08] sm:$0xff]  ;;  %v2548_v28 = vunpack.i.h.bf16 %v4446_v1  ;;  %v2547_v8 = vunpack.i.l.bf16 %v4446_v1 }
 0x175   :  { %6300 = vst [vmem:[#allocation69_spill] sm:$0xff] %v5543_v35  ;;  %438 = vrot.lane.b32.xlu1 %v5218_v10, %s2631_s7  ;;  %2059 = vmatprep.subr.mxu1 %v1283_v63  ;;  %v236_v31 = vpop.permute.xlu0 %235  ;;  %v5560_v18 = vpop.f32.mrf.mxu0  ;;  %v5582_v10 = vld [vmem:[%s6157_s1 + $0x1158] sm:$0xff] }
 0x176   :  { %6301 = vst [vmem:[#allocation70_spill] sm:$0xff] %v5560_v18  ;;  %2063 = vmatprep.mubr.f32.mxu1 %v745_v56  ;;  %2136 = vmatprep.subr.mxu0 %v5528_v20  ;;  %v234_v63 = vpop.permute.xlu1 %233  ;;  %v1543_v14 = vpop.f32.mrf.mxu1 }
 0x177   :  { %2060 = vmatpush2.msra.mxu1 %v1282_v51  ;;  %2137 = vmatpush2.msra.mxu0 %v5543_v35  ;;  %v251_v18 = vsel %vm90_vm2, %v232_v58, %v234_v63  ;;  %v252_v1 = vsel %vm90_vm2, %v234_v63, %v236_v31  ;;  %v1544_v56 = vadd.f32 %v1543_v14, %v5310_v52  ;;  %v6302_v52 = vunpack.i.h.bf16 %v4253_v6  ;;  %v5595_v14 = vld [vmem:[%s6157_s1 + $0x1150] sm:$0xff]  ;;  %v5607_v6 = vld [vmem:[%s6157_s1 + $0x1148] sm:$0xff] }
 0x178   :  { %2061 = vmatprep.subr.mxu1 %v1281_v25  ;;  %2138 = vmatprep.subr.mxu0 %v5558_v53  ;;  %v5584_v20 = vadd.f32 %v251_v18, %v203_v43  ;;  %v5586_v51 = vadd.f32 %v252_v1, %v204_v54  ;;  %v1545_v35 = vpop.f32.mrf.mxu1  ;;  %v205_v25 = vadd.f32 %v4504_v55, %v5264_v40  ;;  %v2553_v54 = vunpack.i.h.bf16 %v4454_v11 }
 0x179   :  { %2062 = vmatpush2.msra.mxu1 %v1280_v45  ;;  %2139 = vmatpush2.msra.mxu0 %v5571_v15  ;;  %v744_v58 = vsel %vm90_vm2, %v2543_v33, %v6302_v52  ;;  %v1546_v43 = vadd.f32 %v1545_v35, %v5351_v60  ;;  %v2563_v31 = vunpack.i.h.bf16 %v4512_v19  ;;  %v2562_v18 = vunpack.i.l.bf16 %v4512_v19  ;;  %v5618_v19 = vld [vmem:[%s6157_s1 + $0x1140] sm:$0xff] }
 0x17a   :  { %2064 = vmatmul.mubr.f32.vlgmr.msra.gmra.mxu1 %v744_v58  ;;  %2362 = vmatprep.subr.mxu1 %v4810_v22  ;;  %v747_v33 = vsel %vm90_vm2, %v2547_v8, %v2548_v28  ;;  %v240_v45 = vpop.permute.xlu0 %239  ;;  %v1632_v55 = vpop.f32.mrf.mxu0  ;;  %v2558_v60 = vunpack.i.h.bf16 %v4498_v0  ;;  %v2557_v11 = vunpack.i.l.bf16 %v4498_v0  ;;  %v2568_v40 = vunpack.i.h.bf16 %v4570_v61 }
 0x17b   :  { %2140 = vmatprep.subr.mxu0 %v5582_v10  ;;  %2394 = vmatpush1.msra.mxu1 %v4826_v59  ;;  %v238_v22 = vpop.permute.xlu1 %237  ;;  %v5620_v35 = vadd.f32 %v1632_v55, %v1544_v56  ;;  %v2567_v28 = vunpack.i.l.bf16 %v4570_v61  ;;  %v2577_v63 = vunpack.i.l.bf16 %v4618_v48  ;;  %v746_v0 = vsel %vm90_vm2, %v2552_v13, %v2547_v8  ;;  %v5632_v56 = vld [vmem:[%s6157_s1 + $0x1138] sm:$0xff]  ;;  %v5651_v8 = vld [vmem:[%s6157_s1 + $0x1128] sm:$0xff] }
 0x17c   :  { %2141 = vmatpush2.msra.mxu0 %v5595_v14  ;;  %2363 = vmatprep.subr.mxu1 %v4861_v4  ;;  %v253_v59 = vsel %vm90_vm2, %v238_v22, %v240_v45  ;;  %v1634_v1 = vpop.f32.mrf.mxu0  ;;  %v5643_v4 = vld [vmem:[%s6157_s1 + $0x1130] sm:$0xff]  ;;  %v206_v13 = vadd.f32 %v4496_v3, %v5317_v34  ;;  %6304 = vst [vmem:[#allocation72_spill] sm:$0xff] %v5651_v8  ;;  %v5661_v3 = vld [vmem:[%s6157_s1 + $0x1120] sm:$0xff] }
 0x17d   :  { %2142 = vmatprep.subr.mxu0 %v5607_v6  ;;  %2069 = vmatprep.mubr.f32.mxu1 %v747_v33  ;;  %v5634_v61 = vadd.f32 %v253_v59, %v205_v25  ;;  %v5636_v52 = vadd.f32 %v1634_v1, %v1546_v43  ;;  %6303 = vst [vmem:[#allocation71_spill] sm:$0xff] %v5643_v4  ;;  %6305 = vst [vmem:[#allocation73_spill] sm:$0xff] %v5661_v3  ;;  %v6311_v59 = vld [vmem:[#allocation4_spill] sm:$0xff] }
 0x17e   :  { %2395 = vmatpush1.msra.mxu1 %v4874_v5  ;;  %2143 = vmatpush2.msra.mxu0 %v5618_v19  ;;  %v749_v5 = vsel %vm90_vm2, %v2553_v54, %v2557_v11  ;;  %v748_v58 = vsel %vm90_vm2, %v2558_v60, %v2553_v54  ;;  %v751_v25 = vsel %vm90_vm2, %v2562_v18, %v2563_v31 }
 0x17f   :  { %2070 = vmatmul.mubr.f32.gmra.mxu1 %v746_v0  ;;  %2364 = vmatprep.subr.mxu1 %v4897_v7  ;;  %v244_v43 = vpop.permute.xlu0 %243  ;;  %v785_v7 = vsel %vm143_vm3, %v2567_v28, %v2568_v40  ;;  %v750_v34 = vsel %vm90_vm2, %v4556_v24, %v2562_v18  ;;  %v5667_v33 = vsel %vm143_vm3, %v2577_v63, %v2567_v28  ;;  %v2573_v24 = vunpack.i.h.bf16 %v4608_v32  ;;  %v6307_v40 = vld [vmem:[#allocation6_spill] sm:$0xff]  ;;  %v6308_v28 = vld [vmem:[#allocation15_spill] sm:$0xff]  ;;  %v5700_v63 = vld [vmem:[%s6157_s1 + $0x1110] sm:$0xff] }
 0x180   :  { %2144 = vmatprep.subr.mxu0 %v5632_v56  ;;  %2396 = vmatpush1.msra.mxu1 %v4921_v42  ;;  %v242_v54 = vpop.permute.xlu1 %241  ;;  %v5674_v42 = vsel %vm2211_vm4, %v5353_v17, %v5409_v30  ;;  %v2216_v60 = vmul.f32 %v4843_v12, %v5353_v17  ;;  %v2583_v22 = vunpack.i.h.bf16 %v6307_v40  ;;  %6309 = vst [vmem:[#allocation6_spill] sm:$0xff] %v5700_v63  ;;  %v6310_v0 = vld [vmem:[#allocation3_spill] sm:$0xff] }
 0x181   :  { %2145 = vmatpush2.msra.mxu0 %v5643_v4  ;;  %2365 = vmatprep.subr.mxu1 %v4930_v46  ;;  %v254_v31 = vsel %vm90_vm2, %v240_v45, %v242_v54  ;;  %v1549_v55 = vpop.f32.mrf.mxu1  ;;  %v5684_v46 = vld [vmem:[%s6157_s1 + $0x1118] sm:$0xff]  ;;  %v5691_v45 = vmul.f32 %v4849_v39, %v5353_v17  ;;  %v208_v39 = vadd.f32 %v6311_v59, %v5415_v37  ;;  %v5711_v54 = vld [vmem:[%s6157_s1 + $0x1108] sm:$0xff]  ;;  %v6314_v37 = vld [vmem:[#allocation10_spill] sm:$0xff] }
 0x182   :  { %2146 = vmatprep.subr.mxu0 %v5651_v8  ;;  %2075 = vmatprep.mubr.f32.mxu1 %v749_v5  ;;  %6306 = vst [vmem:[#allocation74_spill] sm:$0xff] %v5684_v46  ;;  %v5686_v18 = vadd.f32 %v254_v31, %v206_v13  ;;  %v1550_v11 = vadd.f32 %v1549_v55, %v5390_v2  ;;  %v2582_v13 = vunpack.i.l.bf16 %v6307_v40  ;;  %v6312_v5 = vld [vmem:[#allocation17_spill] sm:$0xff]  ;;  %v5725_v40 = vld [vmem:[%s6157_s1 + $0x1100] sm:$0xff]  ;;  %v6319_v8 = vld [vmem:[#allocation8_spill] sm:$0xff] }
 0x183   :  { %2397 = vmatpush1.msra.mxu1 %v6308_v28  ;;  %2147 = vmatpush2.msra.mxu0 %v5661_v3  ;;  %v207_v2 = vadd.f32 %v6310_v0, %v5377_v23  ;;  %v1551_v1 = vpop.f32.mrf.mxu1  ;;  %v6313_v23 = vld [vmem:[#allocation9_spill] sm:$0xff]  ;;  %v5718_v59 = vmul.f32 %v6314_v37, %v5674_v42  ;;  %v2624_v37 = vld [vmem:[%s6156_s0 + $0x30] sm:$0x3]  ;;  %v2592_v4 = vunpack.i.l.bf16 %v6319_v8 }
 0x184   :  { %2076 = vmatmul.mubr.f32.gmra.mxu1 %v748_v58  ;;  %2366 = vmatprep.subr.mxu1 %v6312_v5  ;;  %v248_v31 = vpop.permute.xlu0 %247  ;;  %v1552_v55 = vadd.f32 %v1551_v1, %v5428_v29  ;;  %v1638_v28 = vpop.f32.mrf.mxu0  ;;  %v2217_v0 = vmul.f32 %v6313_v23, %v5674_v42  ;;  %v6315_v58 = vld [vmem:[#allocation19_spill] sm:$0xff]  ;;  %v2252_v29 = vrot.slane %v2216_v60, 1  ;;  %v6316_v1 = vld [vmem:[#allocation13_spill] sm:$0xff]  ;;  %v2253_v60 = vrot.slane %v5691_v45, 1 }
 0x185   :  { %2148 = vmatprep.subr.mxu0 %v5684_v46  ;;  %2398 = vmatpush1.msra.mxu1 %v6315_v58  ;;  %v246_v5 = vpop.permute.xlu1 %245  ;;  %v5727_v12 = vadd.f32 %v1638_v28, %v1550_v11  ;;  %v2218_v23 = vmul.f32 %v6316_v1, %v5409_v30  ;;  %v2222_v46 = vmul.f32 %v2624_v37, %v5353_v17  ;;  %v6317_v58 = vld [vmem:[#allocation20_spill] sm:$0xff]  ;;  %v6318_v28 = vld [vmem:[#allocation14_spill] sm:$0xff] }
 0x186   :  { %2149 = vmatpush2.msra.mxu0 %v5700_v63  ;;  %2367 = vmatprep.subr.mxu1 %v6317_v58  ;;  %v255_v3 = vsel %vm90_vm2, %v244_v43, %v246_v5  ;;  %v256_v48 = vsel %vm90_vm2, %v246_v5, %v248_v31  ;;  %v1640_v11 = vpop.f32.mrf.mxu0  ;;  %v5742_v1 = vmul.f32 %v6318_v28, %v5409_v30  ;;  %v6320_v43 = vld [vmem:[#allocation21_spill] sm:$0xff]  ;;  %v2255_v31 = vrot.slane %v2217_v0, 1  ;;  %v6323_v0 = vld [vmem:[#allocation24_spill] sm:$0xff] }
 0x187   :  { %2150 = vmatprep.subr.mxu0 %v5711_v54  ;;  %2081 = vmatprep.mubr.f32.mxu1 %v751_v25  ;;  %v5746_v37 = vadd.f32 %v255_v3, %v207_v2  ;;  %v5748_v63 = vadd.f32 %v256_v48, %v208_v39  ;;  %v5750_v58 = vadd.f32 %v1640_v11, %v1552_v55  ;;  %v2256_v5 = vrot.slane %v5718_v59, 1  ;;  %v6322_v48 = vld [vmem:[#allocation23_spill] sm:$0xff]  ;;  %v6324_v11 = vld [vmem:[#allocation25_spill] sm:$0xff] }
 0x188   :  { %2399 = vmatpush1.msra.mxu1 %v6320_v43  ;;  %2151 = vmatpush2.msra.mxu0 %v5725_v40  ;;  %v787_v45 = vsel %vm143_vm3, %v2582_v13, %v2583_v22  ;;  %v6321_v25 = vunpack.i.l.bf16 %v4608_v32  ;;  %v2254_v39 = vsel %vm172_vm1, %v2252_v29, %v2253_v60  ;;  %v2258_v55 = vrot.slane %v2218_v23, 1 }
 0x189   :  { %2152 = vmatprep.mubr.f32.mxu0 %v785_v7  ;;  %2082 = vmatmul.mubr.f32.gmra.mxu1 %v750_v34  ;;  %v278_v8 = vpop.permute.xlu0 %277  ;;  %v2259_v22 = vrot.slane %v5742_v1, 1  ;;  %v2625_v7 = vld [vmem:[%s6156_s0 + $0x38] sm:$0x3]  ;;  %v2257_v28 = vsel %vm172_vm1, %v2255_v31, %v2256_v5  ;;  %v2626_v1 = vld [vmem:[%s6156_s0 + $0x40] sm:$0x3] }
 0x18a   :  { %v789_v3 = vsel %vm143_vm3, %v6321_v25, %v2573_v24  ;;  %2368 = vmatprep.subr.mxu1 %v6322_v48  ;;  %2153 = vmatmul.mubr.f32.vlgmr.msra.gmra.mxu0 %v5667_v33  ;;  %v276_v2 = vpop.permute.xlu1 %275  ;;  %v2223_v34 = vmul.f32 %v2625_v7, %v5674_v42  ;;  %v786_v24 = vsel %vm143_vm3, %v2592_v4, %v2582_v13  ;;  %v2261_v33 = vrot.slane %v2222_v46, 1  ;;  %v6325_v4 = vld [vmem:[#allocation26_spill] sm:$0xff]  ;;  %v6326_v13 = vld [vmem:[#allocation29_spill] sm:$0xff] }
 0x18b   :  { %2400 = vmatpush1.msra.mxu1 %v6323_v0  ;;  %2158 = vmatprep.mubr.f32.mxu0 %v787_v45  ;;  %v299_v59 = vsel %vm143_vm3, %v276_v2, %v278_v8  ;;  %v2224_v43 = vmul.f32 %v2626_v1, %v5409_v30  ;;  %v2225_v46 = vmul.f32 %v5047_v21, %v5353_v17  ;;  %v6332_v1 = vld [vmem:[#allocation38_spill] sm:$0xff] }
 0x18c   :  { %2369 = vmatprep.subr.mxu1 %v6324_v11  ;;  %v5772_v29 = vadd.f32 %v299_v59, %v5477_v62  ;;  %2164 = vmatprep.mubr.f32.mxu1 %v789_v3  ;;  %v5774_v23 = vpop.f32.mrf.mxu1  ;;  %v5787_v62 = vmul.f32 %v5053_v16, %v5353_v17  ;;  %v2260_v31 = vsel %vm172_vm1, %v2258_v55, %v2259_v22  ;;  %v2263_v25 = vrot.slane %v2223_v34, 1  ;;  %v6327_v3 = vld [vmem:[#allocation32_spill] sm:$0xff]  ;;  %v6329_v34 = vld [vmem:[#allocation35_spill] sm:$0xff] }
 0x18d   :  { %2401 = vmatpush1.msra.mxu1 %v6325_v4  ;;  %2282 = vrot.lane.b32.xlu1 %v2254_v39, %s2630_s23  ;;  %v2262_v21 = vsel %vm172_vm1, %v2253_v60, %v2261_v33  ;;  %v6328_v39 = vld [vmem:[#allocation33_spill] sm:$0xff]  ;;  %v2265_v7 = vrot.slane %v2224_v43, 1  ;;  %v2226_v0 = vmul.f32 %v5024_v36, %v5674_v42  ;;  %v5802_v55 = vmul.f32 %v5030_v27, %v5674_v42  ;;  %v6330_v33 = vld [vmem:[#allocation30_spill] sm:$0xff]  ;;  %v6331_v27 = vld [vmem:[#allocation31_spill] sm:$0xff] }
 0x18e   :  { %2370 = vmatprep.subr.mxu1 %v6326_v13  ;;  %2159 = vmatmul.mubr.f32.gmra.mxu0 %v786_v24  ;;  %v5790_v45 = vpop.f32.mrf.mxu1  ;;  %v282_v48 = vpop.permute.xlu0 %281  ;;  %v2267_v60 = vrot.slane %v2225_v46, 1  ;;  %v2227_v11 = vmul.f32 %v6330_v33, %v5409_v30  ;;  %v2264_v36 = vsel %vm172_vm1, %v2256_v5, %v2263_v25 }
 0x18f   :  { %2402 = vmatpush1.msra.mxu1 %v6327_v3  ;;  %v280_v2 = vpop.permute.xlu1 %279  ;;  %2284 = vrot.lane.b32.xlu0 %v2257_v28, %s2630_s23  ;;  %v2230_v28 = vmul.f32 %v6331_v27, %v5409_v30  ;;  %v2266_v43 = vsel %vm172_vm1, %v2259_v22, %v2265_v7  ;;  %v2270_v4 = vrot.slane %v2226_v0, 1  ;;  %v2271_v46 = vrot.slane %v5802_v55, 1 }
 0x190   :  { %2371 = vmatprep.subr.mxu1 %v6328_v39  ;;  %v300_v16 = vsel %vm143_vm3, %v278_v8, %v280_v2  ;;  %v2268_v8 = vrot.slane %v5787_v62, 1  ;;  %v6333_v62 = vld [vmem:[#allocation39_spill] sm:$0xff]  ;;  %v2273_v25 = vrot.slane %v2227_v11, 1  ;;  %v6334_v39 = vld [vmem:[#allocation42_spill] sm:$0xff] }
 0x191   :  { %2403 = vmatpush1.msra.mxu1 %v6329_v34  ;;  %v5806_v24 = vadd.f32 %v300_v16, %v5530_v26  ;;  %v5808_v59 = vpop.f32.mrf.mxu1  ;;  %2286 = vrot.lane.b32.xlu1 %v2260_v31, %s2630_s23  ;;  %v2274_v2 = vrot.slane %v2230_v28, 1  ;;  %v2272_v55 = vsel %vm172_vm1, %v2270_v4, %v2271_v46 }
 0x192   :  { %2372 = vmatprep.subr.mxu1 %v5170_v38  ;;  %v2627_v38 = vld [vmem:[%s6156_s0 + $0x78] sm:$0x3]  ;;  %v2269_v31 = vsel %vm172_vm1, %v2267_v60, %v2268_v8  ;;  %v6336_v60 = vld [vmem:[#allocation44_spill] sm:$0xff] }
 0x193   :  { %2404 = vmatpush1.msra.mxu1 %v5182_v44  ;;  %v5819_v26 = vpop.f32.mrf.mxu1  ;;  %2288 = vrot.lane.b32.xlu0 %v2262_v21, %s2630_s23  ;;  %v2231_v5 = vmul.f32 %v2627_v38, %v5353_v17  ;;  %v2628_v17 = vld [vmem:[%s6156_s0 + $0x80] sm:$0x3]  ;;  %v6339_v38 = vld [vmem:[#allocation48_spill] sm:$0xff] }
 0x194   :  { %2373 = vmatprep.subr.mxu1 %v6332_v1  ;;  %v286_v44 = vpop.permute.xlu0 %285  ;;  %v2232_v21 = vmul.f32 %v2628_v17, %v5674_v42  ;;  %v2629_v42 = vld [vmem:[%s6156_s0 + $0x88] sm:$0x3] }
 0x195   :  { %2405 = vmatpush1.msra.mxu1 %v6333_v62  ;;  %v284_v13 = vpop.permute.xlu1 %283  ;;  %2290 = vrot.lane.b32.xlu1 %v2264_v36, %s2630_s23  ;;  %v2276_v34 = vrot.slane %v2231_v5, 1  ;;  %v6337_v36 = vld [vmem:[#allocation46_spill] sm:$0xff]  ;;  %v6338_v1 = vld [vmem:[#allocation47_spill] sm:$0xff]  ;;  %v6340_v5 = vld [vmem:[#allocation49_spill] sm:$0xff] }
 0x196   :  { %2374 = vmatprep.subr.mxu1 %v5229_v47  ;;  %v301_v22 = vsel %vm143_vm3, %v282_v48, %v284_v13  ;;  %v302_v3 = vsel %vm143_vm3, %v284_v13, %v286_v44  ;;  %v6335_v48 = vld [vmem:[#allocation43_spill] sm:$0xff]  ;;  %v2278_v11 = vrot.slane %v2232_v21, 1  ;;  %v6341_v13 = vld [vmem:[#allocation50_spill] sm:$0xff]  ;;  %v6344_v21 = vld [vmem:[#allocation53_spill] sm:$0xff] }
 0x197   :  { %2406 = vmatpush1.msra.mxu1 %v6334_v39  ;;  %v5841_v16 = vadd.f32 %v301_v22, %v5584_v20  ;;  %v5844_v7 = vadd.f32 %v302_v3, %v5586_v51  ;;  %v1721_v47 = vpop.f32.mrf.mxu1  ;;  %2292 = vrot.lane.b32.xlu0 %v2266_v43, %s2630_s23  ;;  %v2233_v20 = vmul.f32 %v2629_v42, %v5409_v30  ;;  %v6343_v22 = vld [vmem:[#allocation52_spill] sm:$0xff]  ;;  %v6348_v42 = vld [vmem:[#allocation58_spill] sm:$0xff] }
 0x198   :  { %2375 = vmatprep.subr.mxu1 %v6335_v48  ;;  %v1722_v0 = vadd.f32 %v1721_v47, %v5620_v35  ;;  %v2275_v35 = vsel %vm172_vm1, %v2273_v25, %v2274_v2  ;;  %v2277_v43 = vsel %vm172_vm1, %v2268_v8, %v2276_v34  ;;  %v2279_v44 = vsel %vm172_vm1, %v2271_v46, %v2278_v11  ;;  %v6342_v8 = vld [vmem:[#allocation51_spill] sm:$0xff] }
 0x199   :  { %2407 = vmatpush1.msra.mxu1 %v6336_v60  ;;  %v1723_v51 = vpop.f32.mrf.mxu1  ;;  %2294 = vrot.lane.b32.xlu1 %v2269_v31, %s2630_s23  ;;  %v2280_v4 = vrot.slane %v2233_v20, 1  ;;  %v6346_v47 = vld [vmem:[#allocation55_spill] sm:$0xff] }
 0x19a   :  { %2376 = vmatprep.subr.mxu1 %v5276_v49  ;;  %v1724_v33 = vadd.f32 %v1723_v51, %v5636_v52  ;;  %v290_v27 = vpop.permute.xlu0 %289  ;;  %v6349_v20 = vld [vmem:[#allocation59_spill] sm:$0xff] }
 0x19b   :  { %2408 = vmatpush1.msra.mxu1 %v6337_v36  ;;  %v288_v28 = vpop.permute.xlu1 %287  ;;  %2296 = vrot.lane.b32.xlu0 %v2272_v55, %s2630_s23  ;;  %v6347_v55 = vld [vmem:[#allocation57_spill] sm:$0xff]  ;;  %v6351_v36 = vld [vmem:[#allocation63_spill] sm:$0xff] }
 0x19c   :  { %2377 = vmatprep.subr.mxu1 %v6338_v1  ;;  %v303_v30 = vsel %vm143_vm3, %v288_v28, %v290_v27 }
 0x19d   :  { %2409 = vmatpush1.msra.mxu1 %v6339_v38  ;;  %v5866_v49 = vadd.f32 %v303_v30, %v5634_v61  ;;  %v5868_v52 = vpop.f32.mrf.mxu0  ;;  %2298 = vrot.lane.b32.xlu1 %v2275_v35, %s2630_s23  ;;  %v2281_v61 = vsel %vm172_vm1, %v2274_v2, %v2280_v4  ;;  %v6345_v2 = vld [vmem:[#allocation54_spill] sm:$0xff]  ;;  %v6356_v38 = vld [vmem:[#allocation72_spill] sm:$0xff] }
 0x19e   :  { %2378 = vmatprep.subr.mxu1 %v6340_v5  ;;  %v1727_v62 = vpop.f32.mrf.mxu1  ;;  %v6350_v35 = vld [vmem:[#allocation62_spill] sm:$0xff]  ;;  %v6357_v5 = vld [vmem:[#allocation5_spill] sm:$0xff] }
 0x19f   :  { %2410 = vmatpush2.msra.mxu1 %v6341_v13  ;;  %v1728_v31 = vadd.f32 %v1727_v62, %v5727_v12  ;;  %2300 = vrot.lane.b32.xlu0 %v2277_v43, %s2630_s23  ;;  %v5877_v25 = vpop.f32.mrf.mxu0  ;;  %v6358_v62 = vld [vmem:[#allocation73_spill] sm:$0xff]  ;;  %v6359_v13 = vld [vmem:[#allocation74_spill] sm:$0xff] }
 0x1a0   :  { %2379 = vmatprep.subr.mxu1 %v6342_v8  ;;  %v294_v3 = vpop.permute.xlu0 %293 }
 0x1a1   :  { %2411 = vmatpush2.msra.mxu1 %v6343_v22  ;;  %v292_v17 = vpop.permute.xlu1 %291  ;;  %2302 = vrot.lane.b32.xlu1 %v2279_v44, %s2630_s23 }
 0x1a2   :  { %2380 = vmatprep.subr.mxu1 %v5370_v41  ;;  %v304_v46 = vsel %vm143_vm3, %v290_v27, %v292_v17 }
 0x1a3   :  { %2412 = vmatpush2.msra.mxu1 %v5385_v57  ;;  %v320_v12 = vadd.f32 %v304_v46, %v5686_v18  ;;  %2304 = vrot.lane.b32.xlu0 %v2281_v61, %s2630_s23  ;;  %v6363_v61 = vld [vmem:[#allocation28_spill] sm:$0xff] }
 0x1a4   :  { %2381 = vmatprep.subr.mxu1 %v6344_v21  ;;  %v5888_v39 = vpop.f32.mrf.mxu0  ;;  %v356_v22 = vadd.f32 %v6363_v61, %v5866_v49  ;;  %v6364_v21 = vld [vmem:[#allocation18_spill] sm:$0xff] }
 0x1a5   :  { %2413 = vmatpush2.msra.mxu1 %v6345_v2  ;;  %v6365_v2 = vld [vmem:[#allocation27_spill] sm:$0xff] }
 0x1a6   :  { %2382 = vmatprep.subr.mxu1 %v6346_v47  ;;  %v5892_v48 = vpop.f32.mrf.mxu0  ;;  %v298_v41 = vpop.permute.xlu0 %297  ;;  %v357_v47 = vadd.f32 %v6365_v2, %v320_v12 }
 0x1a7   :  { %2414 = vmatpush2.msra.mxu1 %v6347_v55  ;;  %v296_v34 = vpop.permute.xlu1 %295 }
 0x1a8   :  { %2383 = vmatprep.subr.mxu1 %v6348_v42  ;;  %v305_v57 = vsel %vm143_vm3, %v294_v3, %v296_v34  ;;  %v306_v18 = vsel %vm143_vm3, %v296_v34, %v298_v41  ;;  %v6366_v34 = vld [vmem:[#allocation36_spill] sm:$0xff] }
 0x1a9   :  { %2415 = vmatpush2.msra.mxu1 %v6349_v20  ;;  %v321_v60 = vadd.f32 %v305_v57, %v5746_v37  ;;  %v322_v51 = vadd.f32 %v306_v18, %v5748_v63  ;;  %v6352_v37 = vld [vmem:[#allocation67_spill] sm:$0xff]  ;;  %v6353_v63 = vld [vmem:[#allocation69_spill] sm:$0xff]  ;;  %v6367_v57 = vld [vmem:[#allocation40_spill] sm:$0xff] }
 0x1aa   :  { %2384 = vmatprep.subr.mxu1 %v6350_v35  ;;  %v1810_v11 = vpop.f32.mrf.mxu0 }
 0x1ab   :  { %2416 = vmatpush2.msra.mxu1 %v6351_v36  ;;  %v5903_v27 = vadd.f32 %v1810_v11, %v1722_v0  ;;  %v358_v42 = vadd.f32 %v6366_v34, %v321_v60  ;;  %v359_v49 = vadd.f32 %v6367_v57, %v322_v51  ;;  %v6372_v57 = vld [vmem:[#allocation34_spill] sm:$0xff] }
 0x1ac   :  { %2385 = vmatprep.subr.mxu1 %v5501_v9  ;;  %v1812_v28 = vpop.f32.mrf.mxu0 }
 0x1ad   :  { %2417 = vmatpush2.msra.mxu1 %v5510_v50  ;;  %v5907_v1 = vpop.permute.xlu0 %372  ;;  %v5909_v30 = vpop.permute.xlu1 %370  ;;  %v5911_v43 = vadd.f32 %v1812_v28, %v1724_v33  ;;  %v6355_v33 = vld [vmem:[#allocation7_spill] sm:$0xff] }
 0x1ae   :  { %2386 = vmatprep.subr.mxu1 %v6352_v37 }
 0x1af   :  { %2418 = vmatpush2.msra.mxu1 %v6353_v63 }
 0x1b0   :  { %2387 = vmatprep.subr.mxu1 %v5558_v53  ;;  %v1816_v4 = vpop.f32.mrf.mxu0  ;;  %v6354_v53 = vld [vmem:[#allocation71_spill] sm:$0xff] }
 0x1b1   :  { %2419 = vmatpush2.msra.mxu1 %v5571_v15  ;;  %v5917_v0 = vadd.f32 %v1816_v4, %v1728_v31  ;;  %v2588_v15 = vunpack.i.h.bf16 %v6355_v33  ;;  %v6362_v31 = vunpack.i.l.bf16 %v4608_v32 }
 0x1b2   :  { %2388 = vmatprep.subr.mxu1 %v5582_v10  ;;  %v2578_v10 = vunpack.i.h.bf16 %v6357_v5 }
 0x1b3   :  { %2420 = vmatpush2.msra.mxu1 %v5595_v14  ;;  %v5921_v9 = vpop.permute.xlu0 %376  ;;  %v5923_v50 = vpop.permute.xlu1 %374 }
 0x1b4   :  { %2389 = vmatprep.subr.mxu1 %v5607_v6  ;;  %v6360_v6 = vld [vmem:[#allocation6_spill] sm:$0xff]  ;;  %v788_v8 = vsel %vm143_vm3, %v2578_v10, %v6362_v31 }
 0x1b5   :  { %2421 = vmatpush2.msra.mxu1 %v5618_v19  ;;  %v6361_v19 = vunpack.i.l.bf16 %v6355_v33 }
 0x1b6   :  { %2390 = vmatprep.subr.mxu1 %v5632_v56 }
 0x1b7   :  { %2422 = vmatpush2.msra.mxu1 %v6354_v53  ;;  %v791_v56 = vsel %vm143_vm3, %v6361_v19, %v2588_v15 }
 0x1b8   :  { %2391 = vmatprep.subr.mxu1 %v6356_v38 }
 0x1b9   :  { %2423 = vmatpush2.msra.mxu1 %v6358_v62  ;;  %v5933_v14 = vpop.permute.xlu0 %380  ;;  %v5935_v44 = vpop.permute.xlu1 %378 }
 0x1ba   :  { %2392 = vmatprep.subr.mxu1 %v6359_v13 }
 0x1bb   :  { %2424 = vmatpush2.msra.mxu1 %v6360_v6 }
 0x1bc   :  { %2393 = vmatprep.subr.mxu1 %v5711_v54 }
 0x1bd   :  { %2425 = vmatpush2.msra.mxu1 %v5725_v40 }
 0x1be   :  { %2165 = vmatmul.mubr.f32.vlgmr.msra.gmra.mxu1 %v788_v8  ;;  %v385_v3 = vpop.permute.xlu0 %384 }
 0x1bf   :  { %2170 = vmatprep.mubr.f32.mxu1 %v791_v56  ;;  %v383_v17 = vpop.permute.xlu1 %382 }
 0x1c0   :  { %v398_v46 = vsel %vm90_vm2, %v383_v17, %v385_v3 }
 0x1c1   :  { %v414_v54 = vadd.f32 %v398_v46, %v356_v22  ;;  %v5981_v22 = vpop.f32.mrf.mxu1  ;;  %v5983_v46 = vpop.f32.mrf.mxu0 }
 0x1c2   :  { %2171 = vmatmul.mubr.f32.gmra.mxu1 %v6364_v21 }
 0x1c3   :  { %v389_v55 = vpop.permute.xlu0 %388 }
 0x1c4   :  { %v387_v40 = vpop.permute.xlu1 %386 }
 0x1c5   :  { %v399_v32 = vsel %vm90_vm2, %v385_v3, %v387_v40 }
 0x1c6   :  { %v415_v41 = vadd.f32 %v399_v32, %v357_v47 }
 0x1c8   :  { %v393_v18 = vpop.permute.xlu0 %392 }
 0x1c9   :  { %v391_v20 = vpop.permute.xlu1 %390 }
 0x1ca   :  { %v400_v35 = vsel %vm90_vm2, %v389_v55, %v391_v20  ;;  %v401_v11 = vsel %vm90_vm2, %v391_v20, %v393_v18  ;;  %v6374_v20 = vld [vmem:[#allocation41_spill] sm:$0xff] }
 0x1cb   :  { %v416_v36 = vadd.f32 %v400_v35, %v358_v42  ;;  %v417_v28 = vadd.f32 %v401_v11, %v359_v49  ;;  %v6373_v49 = vld [vmem:[#allocation56_spill] sm:$0xff] }
 0x1cc   :  { %v1532_v18 = vadd.f32 %v6373_v49, %v6372_v57  ;;  %v6375_v35 = vld [vmem:[#allocation64_spill] sm:$0xff] }
 0x1cd   :  { %v5957_v37 = vpop.permute.xlu0 %420  ;;  %v1538_v11 = vadd.f32 %v6375_v35, %v6374_v20  ;;  %v2177_v20 = vld [vmem:[%s6159_s2] sm:$0x3]  ;;  %v6382_v35 = vld [vmem:[#allocation68_spill] sm:$0xff] }
 0x1ce   :  { %v5959_v12 = vpop.permute.xlu1 %418 }
 0x1d2   :  { %v5961_v63 = vpop.permute.xlu0 %424 }
 0x1d3   :  { %v5963_v4 = vpop.permute.xlu1 %422 }
 0x1d7   :  { %v5965_v53 = vpop.permute.xlu0 %428 }
 0x1d8   :  { %v5967_v60 = vpop.permute.xlu1 %426 }
 0x1dc   :  { %v433_v51 = vpop.permute.xlu0 %432 }
 0x1dd   :  { %v431_v33 = vpop.permute.xlu1 %430 }
 0x1de   :  { %v446_v15 = vsel %vm143_vm3, %v431_v33, %v433_v51 }
 0x1df   :  { %v5970_v38 = vadd.f32 %v446_v15, %v414_v54  ;;  %v6378_v15 = vld [vmem:[#allocation61_spill] sm:$0xff] }
 0x1e1   :  { %6368 = vst [vmem:[#allocation15_spill] sm:$0xff] %v5970_v38  ;;  %v437_v5 = vpop.permute.xlu0 %436 }
 0x1e2   :  { %v435_v10 = vpop.permute.xlu1 %434 }
 0x1e3   :  { %v447_v62 = vsel %vm143_vm3, %v433_v51, %v435_v10  ;;  %v1887_v3 = vpop.f32.mrf.mxu1  ;;  %v6377_v51 = vld [vmem:[#allocation60_spill] sm:$0xff]  ;;  %v6379_v10 = vld [vmem:[#allocation45_spill] sm:$0xff] }
 0x1e4   :  { %v5973_v13 = vadd.f32 %v447_v62, %v415_v41  ;;  %v6380_v62 = vld [vmem:[#allocation66_spill] sm:$0xff] }
 0x1e5   :  { %v1889_v17 = vpop.f32.mrf.mxu1 }
 0x1e6   :  { %6369 = vst [vmem:[#allocation3_spill] sm:$0xff] %v5973_v13  ;;  %v441_v6 = vpop.permute.xlu0 %440 }
 0x1e7   :  { %v439_v19 = vpop.permute.xlu1 %438 }
 0x1e8   :  { %v448_v56 = vsel %vm143_vm3, %v437_v5, %v439_v19  ;;  %v449_v31 = vsel %vm143_vm3, %v439_v19, %v441_v6  ;;  %v1621_v5 = vadd.f32 %v6378_v15, %v1532_v18  ;;  %v1540_v6 = vadd.f32 %v6380_v62, %v6379_v10 }
 0x1e9   :  { %v5977_v8 = vadd.f32 %v448_v56, %v416_v36  ;;  %v5979_v61 = vadd.f32 %v449_v31, %v417_v28  ;;  %v1893_v54 = vpop.f32.mrf.mxu1  ;;  %v6376_v28 = vld [vmem:[#allocation37_spill] sm:$0xff] }
 0x1ea   :  { %v1534_v33 = vadd.f32 %v6377_v51, %v6376_v28  ;;  %v6381_v31 = vld [vmem:[#allocation65_spill] sm:$0xff]  ;;  %v1710_v57 = vadd.f32 %v5774_v23, %v1621_v5  ;;  %v6383_v28 = vld [vmem:[#allocation12_spill] sm:$0xff]  ;;  %v394_v51 = vsel %vm90_vm2, %v5909_v30, %v5907_v1  ;;  %v6384_v23 = vld [vmem:[#allocation70_spill] sm:$0xff] }
 0x1eb   :  { %6370 = vst [vmem:[#allocation4_spill] sm:$0xff] %v5977_v8  ;;  %6371 = vst [vmem:[#allocation17_spill] sm:$0xff] %v5979_v61  ;;  %v5985_v2 = vpop.f32.mrf.mxu1  ;;  %v1627_v8 = vadd.f32 %v6382_v35, %v1538_v11  ;;  %v352_v18 = vadd.f32 %v6383_v28, %v5772_v29  ;;  %v1629_v5 = vadd.f32 %v6384_v23, %v1540_v6  ;;  %v6386_v29 = vld [vmem:[#allocation2_spill] sm:$0xff] }
 0x1ec   :  { %v1623_v61 = vadd.f32 %v6381_v31, %v1534_v33  ;;  %v1799_v33 = vadd.f32 %v5868_v52, %v1710_v57  ;;  %v6385_v31 = vld [vmem:[#allocation11_spill] sm:$0xff]  ;;  %v6387_v28 = vsub.s32 0, %v6386_v29  ;;  %v396_v57 = vsel %vm90_vm2, %v5921_v9, %v5935_v44 }
 0x1ed   :  { %v1716_v62 = vadd.f32 %v5808_v59, %v1627_v8  ;;  %v353_v13 = vadd.f32 %v6385_v31, %v5806_v24  ;;  %v1718_v59 = vadd.f32 %v5819_v26, %v1629_v5  ;;  %v6388_v8 = vld [vmem:[#allocation16_spill] sm:$0xff]  ;;  %v442_v23 = vsel %vm143_vm3, %v5959_v12, %v5957_v37 }
 0x1ee   :  { %v1712_v15 = vadd.f32 %v5790_v45, %v1623_v61  ;;  %v6031_v38 = vrot.slane %v2177_v20, %v6387_v28  ;;  %v395_v45 = vsel %vm90_vm2, %v5907_v1, %v5923_v50  ;;  %v1888_v30 = vadd.f32 %v1887_v3, %v1799_v33 }
 0x1ef   :  { %v5987_v55 = vpop.f32.mrf.mxu1  ;;  %v410_v61 = vadd.f32 %v394_v51, %v352_v18  ;;  %v354_v24 = vadd.f32 %v6388_v8, %v5841_v16  ;;  %v1805_v6 = vadd.f32 %v5888_v39, %v1716_v62  ;;  %v411_v3 = vadd.f32 %v395_v45, %v353_v13  ;;  %v6389_v18 = vld [vmem:[#allocation22_spill] sm:$0xff]  ;;  %v6078_v45 = vld [vmem:[%s6160_s4 + $0x8] sm:$0xff] }
 0x1f0   :  { %v1801_v52 = vadd.f32 %v5877_v25, %v1712_v15  ;;  %v355_v26 = vadd.f32 %v6389_v18, %v5844_v7  ;;  %v397_v16 = vsel %vm90_vm2, %v5935_v44, %v5933_v14  ;;  %v1807_v39 = vadd.f32 %v5892_v48, %v1718_v59  ;;  %v6068_v44 = vld [vmem:[%s6160_s4] sm:$0xff] }
 0x1f1   :  { %v5989_v32 = vpop.f32.mrf.mxu1  ;;  %v443_v12 = vsel %vm143_vm3, %v5957_v37, %v5963_v4  ;;  %v6390_v33 = vsub.s32 1, %v6386_v29  ;;  %v412_v5 = vadd.f32 %v396_v57, %v354_v24  ;;  %v458_v62 = vadd.f32 %v442_v23, %v410_v61 }
 0x1f2   :  { %v1890_v1 = vadd.f32 %v1889_v17, %v1801_v52  ;;  %v1894_v17 = vadd.f32 %v1893_v54, %v1805_v6  ;;  %v444_v48 = vsel %vm143_vm3, %v5961_v63, %v5967_v60  ;;  %v1896_v37 = vadd.f32 %v5985_v2, %v1807_v39 }
 0x1f3   :  { %v6060_v7 = vrot.slane %v2177_v20, %v6390_v33  ;;  %v459_v20 = vadd.f32 %v443_v12, %v411_v3  ;;  %v445_v31 = vsel %vm143_vm3, %v5967_v60, %v5965_v53  ;;  %v2334_v61 = vmul.f32 %v6068_v44, %v458_v62 }
 0x1f4   :  { %v460_v59 = vadd.f32 %v444_v48, %v412_v5 }
 0x1f5   :  { %v2335_v23 = vmul.f32 %v6078_v45, %v459_v20 }
 0x1f6   :  { %v1976_v21 = vpop.f32.mrf.mxu0  ;;  %v5993_v34 = vpop.f32.mrf.mxu1 }
 0x1f7   :  { %v1977_v50 = vadd.f32 %v1976_v21, %v1888_v30 }
 0x1f8   :  { %v1978_v47 = vpop.f32.mrf.mxu0  ;;  %v6001_v36 = vpop.f32.mrf.mxu1 }
 0x1f9   :  { %v1979_v21 = vadd.f32 %v1978_v47, %v1890_v1 }
 0x1fc   :  { %v1982_v40 = vpop.f32.mrf.mxu0 }
 0x1fd   :  { %v1983_v4 = vadd.f32 %v1982_v40, %v1894_v17 }
 0x1fe   :  { %v5991_v41 = vpop.f32.mrf.mxu0 }
 0x1ff   :  { %v2283_v49 = vpop.permute.xlu1 %2282  ;;  %v1985_v2 = vadd.f32 %v5991_v41, %v1896_v37  ;;  %v6089_v41 = vld [vmem:[%s6160_s4 + $0x10] sm:$0xff] }
 0x201   :  { %v2285_v10 = vpop.permute.xlu0 %2284 }
 0x202   :  { %v5995_v42 = vpop.f32.mrf.mxu0  ;;  %v2306_v63 = vsel %vm90_vm2, %v2283_v49, %v2285_v10 }
 0x203   :  { %v2287_v25 = vpop.permute.xlu1 %2286 }
 0x204   :  { %v6008_v19 = vpop.f32.mrf.mxu0  ;;  %v2307_v53 = vsel %vm90_vm2, %v2285_v10, %v2287_v25 }
 0x205   :  { %v2289_v13 = vpop.permute.xlu0 %2288 }
 0x207   :  { %v2291_v30 = vpop.permute.xlu1 %2290 }
 0x208   :  { %v6027_v11 = vpop.f32.mrf.mxu0  ;;  %v2308_v3 = vsel %vm90_vm2, %v2289_v13, %v2291_v30 }
 0x209   :  { %v2293_v57 = vpop.permute.xlu0 %2292 }
 0x20a   :  { %v6053_v51 = vpop.f32.mrf.mxu0  ;;  %v2309_v39 = vsel %vm90_vm2, %v2291_v30, %v2293_v57 }
 0x23a   :  { %v2065_v56 = vpop.f32.mrf.mxu1 }
 0x23b   :  { %v2066_v15 = vadd.f32 %v2065_v56, %v1977_v50  ;;  %v413_v56 = vadd.f32 %v397_v16, %v355_v26  ;;  %v6096_v16 = vld [vmem:[%s6160_s4 + $0x18] sm:$0xff] }
 0x23c   :  { %v2067_v35 = vpop.f32.mrf.mxu1 }
 0x23d   :  { %v2068_v54 = vadd.f32 %v2067_v35, %v1979_v21  ;;  %v461_v1 = vadd.f32 %v445_v31, %v413_v56  ;;  %v1902_v56 = vadd.f32 %v5989_v32, %v5911_v43 }
 0x23f   :  { %v2071_v9 = vpop.f32.mrf.mxu1 }
 0x240   :  { %v2072_v40 = vadd.f32 %v2071_v9, %v1983_v4  ;;  %v2336_v9 = vmul.f32 %v6089_v41, %v460_v59  ;;  %v1900_v4 = vadd.f32 %v5987_v55, %v5903_v27 }
 0x241   :  { %v2073_v29 = vpop.f32.mrf.mxu1 }
 0x242   :  { %v2074_v49 = vadd.f32 %v2073_v29, %v1985_v2  ;;  %v1989_v20 = vadd.f32 %v5995_v42, %v1900_v4 }
 0x244   :  { %v2077_v62 = vpop.f32.mrf.mxu1 }
 0x245   :  { %v2078_v2 = vadd.f32 %v2077_v62, %v1989_v20 }
 0x246   :  { %v2079_v48 = vpop.f32.mrf.mxu1 }
 0x249   :  { %v2083_v37 = vpop.f32.mrf.mxu1 }
 0x24a   :  { %v2154_v14 = vpop.f32.mrf.mxu0 }
 0x24b   :  { %v2155_v47 = vadd.f32 %v2154_v14, %v2066_v15  ;;  %v2337_v15 = vmul.f32 %v6096_v16, %v461_v1  ;;  %v2295_v14 = vpop.permute.xlu1 %2294  ;;  %v2085_v31 = vpop.f32.mrf.mxu1 }
 0x24c   :  { %v2156_v28 = vpop.f32.mrf.mxu0 }
 0x24d   :  { %v2189_v35 = vadd.f32 %v6031_v38, %v2155_v47  ;;  %v2157_v52 = vadd.f32 %v2156_v28, %v2068_v54  ;;  %v2297_v54 = vpop.permute.xlu0 %2296  ;;  %v1730_v47 = vadd.f32 %v5981_v22, %v5750_v58  ;;  %v1991_v28 = vadd.f32 %v6008_v19, %v1902_v56 }
 0x24e   :  { %v2160_v60 = vpop.f32.mrf.mxu0  ;;  %v2310_v19 = vsel %vm90_vm2, %v2295_v14, %v2297_v54 }
 0x24f   :  { %v2322_v8 = vadd.f32 %v2306_v63, %v2189_v35  ;;  %v2190_v24 = vadd.f32 %v6060_v7, %v2157_v52  ;;  %v2161_v6 = vadd.f32 %v2160_v60, %v2072_v40  ;;  %v1819_v29 = vadd.f32 %v5983_v46, %v1730_v47  ;;  %v2299_v40 = vpop.permute.xlu1 %2298 }
 0x250   :  { %v2162_v50 = vpop.f32.mrf.mxu0  ;;  %v1906_v63 = vadd.f32 %v5993_v34, %v5917_v0  ;;  %v2080_v22 = vadd.f32 %v2079_v48, %v1991_v28  ;;  %v6391_v0 = vld [vmem:[#allocation15_spill] sm:$0xff] }
 0x251   :  { %v2342_v18 = vadd.f32 %v2334_v61, %v2322_v8  ;;  %v2323_v10 = vadd.f32 %v2307_v53, %v2190_v24  ;;  %v2191_v25 = vadd.f32 %v6031_v38, %v2161_v6  ;;  %v2163_v26 = vadd.f32 %v2162_v50, %v2074_v49  ;;  %v2301_v35 = vpop.permute.xlu0 %2300  ;;  %v6392_v49 = vld [vmem:[#allocation3_spill] sm:$0xff] }
 0x252   :  { %v1908_v55 = vadd.f32 %v6001_v36, %v1819_v29  ;;  %v1995_v58 = vadd.f32 %v6027_v11, %v1906_v63  ;;  %v2338_v34 = vmul.f32 %v6068_v44, %v6391_v0  ;;  %v2339_v8 = vmul.f32 %v6078_v45, %v6392_v49 }
 0x253   :  { %2350 = vst [vmem:[%s6161_s5] sm:$0xff] %v2342_v18  ;;  %v2343_v12 = vadd.f32 %v2335_v23, %v2323_v10  ;;  %v2192_v17 = vadd.f32 %v6060_v7, %v2163_v26  ;;  %v2324_v21 = vadd.f32 %v2308_v3, %v2191_v25  ;;  %v2303_v36 = vpop.permute.xlu1 %2302  ;;  %v6393_v3 = vld [vmem:[#allocation4_spill] sm:$0xff] }
 0x254   :  { %v1997_v42 = vadd.f32 %v6053_v51, %v1908_v55  ;;  %v2084_v52 = vadd.f32 %v2083_v37, %v1995_v58  ;;  %v2311_v51 = vsel %vm90_vm2, %v2297_v54, %v2299_v40  ;;  %v2312_v50 = vsel %vm90_vm2, %v2301_v35, %v2303_v36 }
 0x255   :  { %2351 = vst [vmem:[%s6161_s5 + $0x8] sm:$0xff] %v2343_v12  ;;  %v2344_v13 = vadd.f32 %v2336_v9, %v2324_v21  ;;  %v2325_v33 = vadd.f32 %v2309_v39, %v2192_v17  ;;  %v2305_v6 = vpop.permute.xlu0 %2304  ;;  %v2340_v18 = vmul.f32 %v6089_v41, %v6393_v3  ;;  %v6394_v39 = vld [vmem:[#allocation17_spill] sm:$0xff] }
 0x256   :  { %v2086_v59 = vadd.f32 %v2085_v31, %v1997_v42  ;;  %v2313_v26 = vsel %vm90_vm2, %v2303_v36, %v2305_v6  ;;  %v2341_v9 = vmul.f32 %v6096_v16, %v6394_v39 }
 0x257   :  { %2352 = vst [vmem:[%s6161_s5 + $0x10] sm:$0xff] %v2344_v13  ;;  %v2345_v5 = vadd.f32 %v2337_v15, %v2325_v33 }
 0x259   :  { %2353 = vst [vmem:[%s6161_s5 + $0x18] sm:$0xff] %v2345_v5 }
 0x27e   :  { %v2166_v27 = vpop.f32.mrf.mxu1 }
 0x27f   :  { %v2167_v43 = vadd.f32 %v2166_v27, %v2078_v2 }
 0x280   :  { %v2168_v32 = vpop.f32.mrf.mxu1 }
 0x281   :  { %v2193_v46 = vadd.f32 %v6031_v38, %v2167_v43  ;;  %v2169_v30 = vadd.f32 %v2168_v32, %v2080_v22 }
 0x282   :  { %v2172_v61 = vpop.f32.mrf.mxu1 }
 0x283   :  { %v2326_v53 = vadd.f32 %v2310_v19, %v2193_v46  ;;  %v2194_v11 = vadd.f32 %v6060_v7, %v2169_v30  ;;  %v2173_v60 = vadd.f32 %v2172_v61, %v2084_v52 }
 0x284   :  { %v2174_v24 = vpop.f32.mrf.mxu1 }
 0x285   :  { %v2346_v57 = vadd.f32 %v2338_v34, %v2326_v53  ;;  %v2327_v23 = vadd.f32 %v2311_v51, %v2194_v11  ;;  %v2195_v44 = vadd.f32 %v6031_v38, %v2173_v60  ;;  %v2175_v1 = vadd.f32 %v2174_v24, %v2086_v59 }
 0x287   :  { %2354 = vst [vmem:[%s6161_s5 + $0x20] sm:$0xff] %v2346_v57  ;;  %v2347_v10 = vadd.f32 %v2339_v8, %v2327_v23  ;;  %v2328_v45 = vadd.f32 %v2312_v50, %v2195_v44  ;;  %v2196_v25 = vadd.f32 %v6060_v7, %v2175_v1 }
 0x289   :  { %2355 = vst [vmem:[%s6161_s5 + $0x28] sm:$0xff] %v2347_v10  ;;  %v2348_v38 = vadd.f32 %v2340_v18, %v2328_v45  ;;  %v2329_v12 = vadd.f32 %v2313_v26, %v2196_v25 }
 0x28b   :  { %2356 = vst [vmem:[%s6161_s5 + $0x30] sm:$0xff] %v2348_v38  ;;  %v2349_v41 = vadd.f32 %v2341_v9, %v2329_v12 }
 0x28d   :  { %2357 = vst [vmem:[%s6161_s5 + $0x38] sm:$0xff] %v2349_v41 }

</bundles_post_ra>
